<compile_context>
chip_gen: v7x
topology: tpu7x:2x2x1
jax: 0.10.0
libtpu: 0.0.40
codegen_flags: <defaults>
</compile_context>

<pallas_src>
import functools

import jax
import jax.numpy as jnp
from jax import lax
from jax.experimental import pallas as pl
from jax.experimental.pallas import tpu as pltpu

_LANES = 128
_VMEM_LIMIT = 32 * 1024 * 1024      # within default scoped limits on v5e/v6e/v7x


# ----------------------------- small helpers -----------------------------

def _round_up(x, m):
    return (x + m - 1) // m * m


def _pick_tile(size, target, quantum):
    """Largest tile <= target that is a multiple of `quantum` and divides the
    quantum-rounded size.  Returns (tile, padded_size)."""
    padded = _round_up(size, quantum)
    tile = quantum
    for t in range(quantum, min(padded, target) + 1, quantum):
        if padded % t == 0:
            tile = t
    return tile, padded


def _pad2d(a, rows, cols):
    r, c = a.shape
    if r == rows and c == cols:
        return a
    return jnp.pad(a, ((0, rows - r), (0, cols - c)))


def _pad_vec(v, n):
    v = v.reshape(-1).astype(jnp.float32)
    return jnp.pad(v, (0, n - v.shape[0]))


# ----------------------------- Pallas kernels -----------------------------

def bn_stats_kernel(m_rows, eps, x_ref, g_ref, b_ref, scale_ref, shift_ref,
                    sum_acc, ssq_acc, pivot):
    """Grid over row tiles ("arbitrary").  Accumulates per-channel pivot-shifted
    sum / sum-of-squares; the last step emits BN scale/shift directly."""
    i = pl.program_id(0)
    tm = x_ref.shape[0]

    @pl.when(i == 0)
    def _init():
        pivot[...] = x_ref[0:1, :]               # per-channel pivot: avoids
        sum_acc[...] = jnp.zeros_like(sum_acc)   # catastrophic cancellation in
        ssq_acc[...] = jnp.zeros_like(ssq_acc)   # E[x^2] - E[x]^2

    x = x_ref[...]
    rid = i * tm + lax.broadcasted_iota(jnp.int32, (tm, 1), 0)
    xc = jnp.where(rid < m_rows, x - pivot[...], 0.0)     # mask padded rows
    sum_acc[...] += jnp.sum(xc, axis=0, keepdims=True)
    ssq_acc[...] += jnp.sum(xc * xc, axis=0, keepdims=True)

    @pl.when(i == pl.num_programs(0) - 1)
    def _finalize():
        inv_m = 1.0 / m_rows
        mean_c = sum_acc[...] * inv_m
        var = jnp.maximum(ssq_acc[...] * inv_m - mean_c * mean_c, 0.0)  # biased
        scale = g_ref[...] * lax.rsqrt(var + eps)
        mean = pivot[...] + mean_c
        scale_ref[...] = scale
        shift_ref[...] = b_ref[...] - mean * scale


def bn_apply_relu_kernel(x_ref, scale_ref, shift_ref, o_ref):
    x = x_ref[...].astype(jnp.float32)
    y = jnp.maximum(x * scale_ref[...] + shift_ref[...], 0.0)
    o_ref[...] = y.astype(o_ref.dtype)


def matmul_kernel(a_ref, b_ref, o_ref, acc_ref):
    @pl.when(pl.program_id(2) == 0)
    def _init():
        acc_ref[...] = jnp.zeros_like(acc_ref)

    acc_ref[...] += jnp.dot(a_ref[...], b_ref[...],
                            preferred_element_type=jnp.float32)

    @pl.when(pl.program_id(2) == pl.num_programs(2) - 1)
    def _finalize():
        o_ref[...] = acc_ref[...].astype(o_ref.dtype)


def matmul_residual_kernel(a_ref, b_ref, r_ref, o_ref, acc_ref):
    @pl.when(pl.program_id(2) == 0)
    def _init():
        acc_ref[...] = jnp.zeros_like(acc_ref)

    acc_ref[...] += jnp.dot(a_ref[...], b_ref[...],
                            preferred_element_type=jnp.float32)

    @pl.when(pl.program_id(2) == pl.num_programs(2) - 1)
    def _finalize():
        o_ref[...] = (acc_ref[...] + r_ref[...].astype(jnp.float32)).astype(o_ref.dtype)


# ----------------------------- pallas_call wrappers -----------------------------

def batchnorm_relu(x2d, gamma_p, beta_p, *, eps=1e-5, row_tile=256,
                   out_dtype=jnp.bfloat16):
    """Training-mode BatchNorm (batch stats) + ReLU over (rows, C); C already
    padded to a multiple of 128 lanes.  Returns (rows, C) in `out_dtype`."""
    M, C = x2d.shape
    tm, Mp = _pick_tile(M, row_tile, 8)
    x_p = _pad2d(x2d.astype(jnp.float32), Mp, C)
    g = gamma_p.reshape(1, C)
    b = beta_p.reshape(1, C)
    grid = (Mp // tm,)

    row_spec = pl.BlockSpec((tm, C), lambda i: (i, 0))
    vec_spec = pl.BlockSpec((1, C), lambda i: (0, 0))

    # Pass 1: tiled per-channel reduction -> BN scale/shift.
    scale, shift = pl.pallas_call(
        functools.partial(bn_stats_kernel, M, eps),
        out_shape=(jax.ShapeDtypeStruct((1, C), jnp.float32),
                   jax.ShapeDtypeStruct((1, C), jnp.float32)),
        grid_spec=pltpu.PrefetchScalarGridSpec(
            num_scalar_prefetch=0, grid=grid,
            in_specs=[row_spec, vec_spec, vec_spec],
            out_specs=(vec_spec, vec_spec),
            scratch_shapes=[pltpu.VMEM((1, C), jnp.float32),
                            pltpu.VMEM((1, C), jnp.float32),
                            pltpu.VMEM((1, C), jnp.float32)]),
        compiler_params=pltpu.CompilerParams(
            dimension_semantics=("arbitrary",), vmem_limit_bytes=_VMEM_LIMIT),
    )(x_p, g, b)

    # Pass 2: tiled elementwise normalize + affine + ReLU ("parallel" grid).
    a = pl.pallas_call(
        bn_apply_relu_kernel,
        out_shape=jax.ShapeDtypeStruct((Mp, C), out_dtype),
        grid_spec=pltpu.PrefetchScalarGridSpec(
            num_scalar_prefetch=0, grid=grid,
            in_specs=[row_spec, vec_spec, vec_spec],
            out_specs=row_spec),
        compiler_params=pltpu.CompilerParams(
            dimension_semantics=("parallel",), vmem_limit_bytes=_VMEM_LIMIT),
    )(x_p, scale, shift)
    return a[:M]


def fused_matmul(a, b, residual=None, *, tm=256, tn=256, tk=512,
                 out_dtype=jnp.float32):
    """Tiled MXU matmul: out = a @ b (+ residual).  bf16 operands, f32 VMEM
    accumulator, K-axis accumulation with pl.when init/finalize; the residual
    (shortcut) add is fused into the epilogue."""
    M, K = a.shape
    K2, N = b.shape
    assert K == K2
    tm, Mp = _pick_tile(M, tm, 8)
    tn, Np = _pick_tile(N, tn, _LANES)
    tk, Kp = _pick_tile(K, tk, _LANES)

    a_p = _pad2d(a, Mp, Kp).astype(jnp.bfloat16)
    b_p = _pad2d(b, Kp, Np).astype(jnp.bfloat16)

    in_specs = [pl.BlockSpec((tm, tk), lambda i, j, k: (i, k)),
                pl.BlockSpec((tk, tn), lambda i, j, k: (k, j))]
    operands = [a_p, b_p]
    bytes_accessed = a_p.size * 2 + b_p.size * 2 + Mp * Np * 4
    if residual is not None:
        r_p = _pad2d(residual.astype(jnp.float32), Mp, Np)
        in_specs.append(pl.BlockSpec((tm, tn), lambda i, j, k: (i, j)))
        operands.append(r_p)
        bytes_accessed += Mp * Np * 4
        kernel = matmul_residual_kernel
    else:
        kernel = matmul_kernel

    out = pl.pallas_call(
        kernel,
        out_shape=jax.ShapeDtypeStruct((Mp, Np), out_dtype),
        grid_spec=pltpu.PrefetchScalarGridSpec(
            num_scalar_prefetch=0,
            grid=(Mp // tm, Np // tn, Kp // tk),
            in_specs=in_specs,
            out_specs=pl.BlockSpec((tm, tn), lambda i, j, k: (i, j)),
            scratch_shapes=[pltpu.VMEM((tm, tn), jnp.float32)]),
        compiler_params=pltpu.CompilerParams(
            dimension_semantics=("parallel", "parallel", "arbitrary"),
            vmem_limit_bytes=_VMEM_LIMIT),
        cost_estimate=pl.CostEstimate(flops=2 * Mp * Np * Kp,
                                      transcendentals=0,
                                      bytes_accessed=bytes_accessed),
    )(*operands)
    return out[:M, :N]


# ----------------------------- glue (plain JAX) -----------------------------

def extract_patches_3x3(x_nhwc, stride):
    """im2col for a 3x3 conv with padding=1.  Returns ((N*Ho*Wo, 9*C), (Ho, Wo)).
    TODO(synk): replace with implicit im2col (9-step grid axis whose BlockSpec
    selects the (kh,kw)-shifted window) to avoid the 9x HBM patch materialization."""
    N, H, W, C = x_nhwc.shape
    xp = jnp.pad(x_nhwc, ((0, 0), (1, 1), (1, 1), (0, 0)))
    Ho = (H - 1) // stride + 1
    Wo = (W - 1) // stride + 1
    cols = []
    for kh in range(3):
        for kw in range(3):
            win = xp[:, kh:kh + (Ho - 1) * stride + 1:stride,
                        kw:kw + (Wo - 1) * stride + 1:stride, :]
            cols.append(win)
    patches = jnp.concatenate(cols, axis=-1)     # (N,Ho,Wo,9*C); (kh,kw,cin) order
    return patches.reshape(N * Ho * Wo, 9 * C), (Ho, Wo)


def prep_conv3x3_weight(w_oihw, cin_p, cout_p):
    # (Cout,Cin,3,3) -> (9*cin_p, cout_p) bf16, matching the (kh,kw,cin) patch order.
    cout, cin, _, _ = w_oihw.shape
    w = jnp.transpose(w_oihw, (2, 3, 1, 0))                     # (3,3,cin,cout)
    w = jnp.pad(w, ((0, 0), (0, 0), (0, cin_p - cin), (0, cout_p - cout)))
    return w.reshape(9 * cin_p, cout_p).astype(jnp.bfloat16)


def prep_conv1x1_weight(w_oihw, cin_p, cout_p):
    cout, cin = w_oihw.shape[0], w_oihw.shape[1]
    w = jnp.transpose(w_oihw[:, :, 0, 0])                       # (cin, cout)
    w = jnp.pad(w, ((0, cin_p - cin), (0, cout_p - cout)))
    return w.astype(jnp.bfloat16)


# ----------------------------- PreActBlock forward -----------------------------

def preact_block_forward(x_nchw, params, stride):
    x = jnp.transpose(x_nchw, (0, 2, 3, 1)).astype(jnp.float32)   # NCHW -> NHWC
    N, H, W, Cin = x.shape
    Cout = params["w1"].shape[0]
    cin_p = _round_up(Cin, _LANES)
    cout_p = _round_up(Cout, _LANES)

    # out = relu(bn1(x))   (two-pass tiled BN; bf16 activation for the MXU)
    x2d = jnp.pad(x, ((0, 0), (0, 0), (0, 0), (0, cin_p - Cin))).reshape(N * H * W, cin_p)
    a1_2d = batchnorm_relu(x2d, _pad_vec(params["bn1_gamma"], cin_p),
                           _pad_vec(params["bn1_beta"], cin_p))
    a1 = a1_2d.reshape(N, H, W, cin_p)

    # shortcut = self.shortcut(out)  (both branches act on relu(bn1(x)), per the module)
    if stride != 1 or Cin != Cout:
        # TODO(synk): fold this strided gather + 1x1 matmul into the conv2 kernel
        # (express the ::stride selection via a BlockSpec index_map).
        sc_in = a1[:, ::stride, ::stride, :].reshape(-1, cin_p)
        shortcut = fused_matmul(sc_in,
                                prep_conv1x1_weight(params["w_sc"], cin_p, cout_p))
    else:
        shortcut = a1_2d.astype(jnp.float32)          # cin_p == cout_p here

    # conv1: 3x3, stride s, pad 1
    patches1, (Ho, Wo) = extract_patches_3x3(a1, stride)
    y1 = fused_matmul(patches1, prep_conv3x3_weight(params["w1"], cin_p, cout_p))

    # relu(bn2(conv1_out))
    a2 = batchnorm_relu(y1, _pad_vec(params["bn2_gamma"], cout_p),
                        _pad_vec(params["bn2_beta"], cout_p)).reshape(N, Ho, Wo, cout_p)

    # conv2: 3x3, stride 1, pad 1 -- residual add fused into the matmul epilogue
    patches2, _ = extract_patches_3x3(a2, 1)
    out = fused_matmul(patches2, prep_conv3x3_weight(params["w2"], cout_p, cout_p),
                       residual=shortcut)
    out = out.reshape(N, Ho, Wo, cout_p)[..., :Cout]
    return jnp.transpose(out, (0, 3, 1, 2))           # NHWC -> NCHW


# ----------------------------- pure-JAX reference -----------------------------

def reference_forward(x_nchw, params, stride):
    def bn(x, gamma, beta):
        g = gamma.reshape(1, -1, 1, 1)
        b = beta.reshape(1, -1, 1, 1)
        m = jnp.mean(x, axis=(0, 2, 3), keepdims=True)
        v = jnp.mean((x - m) ** 2, axis=(0, 2, 3), keepdims=True)
        return (x - m) * lax.rsqrt(v + 1e-5) * g + b

    def conv(x, w, s, p):
        return lax.conv_general_dilated(
            x, w, (s, s), [(p, p), (p, p)],
            dimension_numbers=("NCHW", "OIHW", "NCHW"),
            precision=lax.Precision.HIGHEST)

    cin = x_nchw.shape[1]
    cout = params["w1"].shape[0]
    a1 = jax.nn.relu(bn(x_nchw, params["bn1_gamma"], params["bn1_beta"]))
    sc = conv(a1, params["w_sc"], stride, 0) if (stride != 1 or cin != cout) else a1
    y1 = conv(a1, params["w1"], stride, 1)
    a2 = jax.nn.relu(bn(y1, params["bn2_gamma"], params["bn2_beta"]))
    return conv(a2, params["w2"], 1, 1) + sc


# ----------------------------- main -----------------------------

if __name__ == "__main__":
    key = jax.random.PRNGKey(0)
    k1, k2, k3, k4, k5, k6, k7 = jax.random.split(key, 7)

    # Small deterministic configuration exercising the 1x1 shortcut conv.
    N, Cin, H, W = 2, 4, 16, 16
    Cout, stride = 8, 2

    x = jax.random.normal(k1, (N, Cin, H, W), dtype=jnp.float32)

    params = {
        "bn1_gamma": (1.0 + 0.1 * jax.random.normal(k2, (Cin,))).astype(jnp.float32),
        "bn1_beta":  (0.1 * jax.random.normal(k3, (Cin,))).astype(jnp.float32),
        "bn2_gamma": (1.0 + 0.1 * jax.random.normal(k4, (Cout,))).astype(jnp.float32),
        "bn2_beta":  (0.1 * jax.random.normal(k5, (Cout,))).astype(jnp.float32),
        # conv weights in PyTorch OIHW layout
        "w1":   (jax.random.normal(k6, (Cout, Cin, 3, 3)) * (2.0 / (9 * Cin)) ** 0.5).astype(jnp.float32),
        "w2":   (jax.random.normal(k7, (Cout, Cout, 3, 3)) * (2.0 / (9 * Cout)) ** 0.5).astype(jnp.float32),
        "w_sc": (jax.random.normal(k1, (Cout, Cin, 1, 1)) * (2.0 / Cin) ** 0.5).astype(jnp.float32),
    }

    fwd = jax.jit(functools.partial(preact_block_forward, stride=stride))
    out = jax.block_until_ready(fwd(x, params))

    ref = reference_forward(x, params, stride)
    assert out.shape == ref.shape == (N, Cout, H // stride, W // stride)
    # bf16 MXU inputs with f32 accumulation (per perf guidance): relative error
    # stays ~1e-3, but near-zero outputs need a slightly wider atol than the
    # pure-f32 1e-2 used previously.
    assert jnp.allclose(out, ref, rtol=1e-2, atol=2e-2), "mismatch vs reference"

    print("KERNEL_OK")
</pallas_src>

<mosaic_0001>
module attributes {stable_mosaic.version = 11 : i64} {
  func.func @bn_stats_kernel(%arg0: i32, %arg1: memref<256x128xf32, #tpu.memory_space<vmem>>, %arg2: memref<1x128xf32, #tpu.memory_space<vmem>>, %arg3: memref<1x128xf32, #tpu.memory_space<vmem>>, %arg4: memref<1x128xf32, #tpu.memory_space<vmem>>, %arg5: memref<1x128xf32, #tpu.memory_space<vmem>>, %arg6: memref<1x128xf32, #tpu.memory_space<vmem>>, %arg7: memref<1x128xf32, #tpu.memory_space<vmem>>, %arg8: memref<1x128xf32, #tpu.memory_space<vmem>>) attributes {dimension_semantics = [#tpu.dimension_semantics<arbitrary>], iteration_bounds = array<i64: 2>, scalar_prefetch = 0 : i64, scratch_operands = 3 : i64, tpu.core_type = #tpu.core_type<tc>, window_params = [{transform_indices = @transform_0, window_bounds = array<i64: 256, 128>}, {pipeline_mode = #tpu.pipeline_mode<synchronous>, transform_indices = @transform_1, window_bounds = array<i64: 1, 128>}, {pipeline_mode = #tpu.pipeline_mode<synchronous>, transform_indices = @transform_2, window_bounds = array<i64: 1, 128>}, {pipeline_mode = #tpu.pipeline_mode<synchronous>, transform_indices = @transform_3, window_bounds = array<i64: 1, 128>}, {pipeline_mode = #tpu.pipeline_mode<synchronous>, transform_indices = @transform_4, window_bounds = array<i64: 1, 128>}]} {
    %c0_i32 = arith.constant 0 : i32
    %0 = arith.cmpi eq, %arg0, %c0_i32 : i32
    %1 = arith.extui %0 : i1 to i32
    %c0_i32_0 = arith.constant 0 : i32
    %2 = arith.cmpi ne, %1, %c0_i32_0 : i32
    scf.if %2 {
      %c0_15 = arith.constant 0 : index
      %c0_16 = arith.constant 0 : index
      %31 = vector.load %arg1[%c0_15, %c0_16] : memref<256x128xf32, #tpu.memory_space<vmem>>, vector<1x128xf32>
      %c0_17 = arith.constant 0 : index
      %c0_18 = arith.constant 0 : index
      %32 = vector.load %arg8[%c0_17, %c0_18] : memref<1x128xf32, #tpu.memory_space<vmem>>, vector<1x128xf32>
      tpu.vector_store %arg8[%c0_17, %c0_18], %31 {strides = array<i32>} : memref<1x128xf32, #tpu.memory_space<vmem>>, vector<1x128xf32>,
      %cst_19 = arith.constant 0.000000e+00 : f32
      %33 = vector.broadcast %cst_19 : f32 to vector<1x128xf32>
      %c0_20 = arith.constant 0 : index
      %c0_21 = arith.constant 0 : index
      %34 = vector.load %arg6[%c0_20, %c0_21] : memref<1x128xf32, #tpu.memory_space<vmem>>, vector<1x128xf32>
      tpu.vector_store %arg6[%c0_20, %c0_21], %33 {strides = array<i32>} : memref<1x128xf32, #tpu.memory_space<vmem>>, vector<1x128xf32>,
      %cst_22 = arith.constant 0.000000e+00 : f32
      %35 = vector.broadcast %cst_22 : f32 to vector<1x128xf32>
      %c0_23 = arith.constant 0 : index
      %c0_24 = arith.constant 0 : index
      %36 = vector.load %arg7[%c0_23, %c0_24] : memref<1x128xf32, #tpu.memory_space<vmem>>, vector<1x128xf32>
      tpu.vector_store %arg7[%c0_23, %c0_24], %35 {strides = array<i32>} : memref<1x128xf32, #tpu.memory_space<vmem>>, vector<1x128xf32>,
    } else {
    }
    %c0 = arith.constant 0 : index
    %c0_1 = arith.constant 0 : index
    %3 = vector.load %arg1[%c0, %c0_1] : memref<256x128xf32, #tpu.memory_space<vmem>>, vector<256x128xf32>
    %c256_i32 = arith.constant 256 : i32
    %4 = arith.muli %arg0, %c256_i32 : i32
    %5 = tpu.iota {dimensions = array<i32: 0>} : vector<256x1xi32>
    %6 = vector.broadcast %4 : i32 to vector<256x1xi32>
    %7 = arith.addi %6, %5 : vector<256x1xi32>
    %c512_i32 = arith.constant 512 : i32
    %8 = vector.broadcast %c512_i32 : i32 to vector<256x1xi32>
    %9 = arith.cmpi slt, %7, %8 : vector<256x1xi32>
    %c0_2 = arith.constant 0 : index
    %c0_3 = arith.constant 0 : index
    %10 = vector.load %arg8[%c0_2, %c0_3] : memref<1x128xf32, #tpu.memory_space<vmem>>, vector<1x128xf32>
    %11 = vector.broadcast %10 : vector<1x128xf32> to vector<256x128xf32>
    %12 = arith.subf %3, %11 : vector<256x128xf32>
    %cst = arith.constant 0.000000e+00 : f32
    %13 = vector.shape_cast %9 : vector<256x1xi1> to vector<256x1xi1>
    %14 = vector.broadcast %13 : vector<256x1xi1> to vector<256x128xi1>
    %15 = vector.broadcast %cst : f32 to vector<256x128xf32>
    %16 = arith.select %14, %12, %15 : vector<256x128xi1>, vector<256x128xf32>
    %c0_4 = arith.constant 0 : index
    %c0_5 = arith.constant 0 : index
    %17 = vector.load %arg6[%c0_4, %c0_5] : memref<1x128xf32, #tpu.memory_space<vmem>>, vector<1x128xf32>
    %cst_6 = arith.constant dense<0.000000e+00> : vector<128xf32>
    %18 = vector.multi_reduction <add>, %16, %cst_6 [0] : vector<256x128xf32> to vector<128xf32>
    %19 = vector.shape_cast %18 : vector<128xf32> to vector<1x128xf32>
    %20 = arith.addf %17, %19 : vector<1x128xf32>
    %c0_7 = arith.constant 0 : index
    %c0_8 = arith.constant 0 : index
    %21 = vector.load %arg6[%c0_7, %c0_8] : memref<1x128xf32, #tpu.memory_space<vmem>>, vector<1x128xf32>
    tpu.vector_store %arg6[%c0_7, %c0_8], %20 {strides = array<i32>} : memref<1x128xf32, #tpu.memory_space<vmem>>, vector<1x128xf32>,
    %c0_9 = arith.constant 0 : index
    %c0_10 = arith.constant 0 : index
    %22 = vector.load %arg7[%c0_9, %c0_10] : memref<1x128xf32, #tpu.memory_space<vmem>>, vector<1x128xf32>
    %23 = arith.mulf %16, %16 : vector<256x128xf32>
    %cst_11 = arith.constant dense<0.000000e+00> : vector<128xf32>
    %24 = vector.multi_reduction <add>, %23, %cst_11 [0] : vector<256x128xf32> to vector<128xf32>
    %25 = vector.shape_cast %24 : vector<128xf32> to vector<1x128xf32>
    %26 = arith.addf %22, %25 : vector<1x128xf32>
    %c0_12 = arith.constant 0 : index
    %c0_13 = arith.constant 0 : index
    %27 = vector.load %arg7[%c0_12, %c0_13] : memref<1x128xf32, #tpu.memory_space<vmem>>, vector<1x128xf32>
    tpu.vector_store %arg7[%c0_12, %c0_13], %26 {strides = array<i32>} : memref<1x128xf32, #tpu.memory_space<vmem>>, vector<1x128xf32>,
    %c1_i32 = arith.constant 1 : i32
    %28 = arith.cmpi eq, %arg0, %c1_i32 : i32
    %29 = arith.extui %28 : i1 to i32
    %c0_i32_14 = arith.constant 0 : i32
    %30 = arith.cmpi ne, %29, %c0_i32_14 : i32
    scf.if %30 {
      %c0_15 = arith.constant 0 : index
      %c0_16 = arith.constant 0 : index
      %31 = vector.load %arg6[%c0_15, %c0_16] : memref<1x128xf32, #tpu.memory_space<vmem>>, vector<1x128xf32>
      %cst_17 = arith.constant 0.001953125 : f32
      %32 = vector.broadcast %cst_17 : f32 to vector<1x128xf32>
      %33 = arith.mulf %31, %32 : vector<1x128xf32>
      %c0_18 = arith.constant 0 : index
      %c0_19 = arith.constant 0 : index
      %34 = vector.load %arg7[%c0_18, %c0_19] : memref<1x128xf32, #tpu.memory_space<vmem>>, vector<1x128xf32>
      %cst_20 = arith.constant 0.001953125 : f32
      %35 = vector.broadcast %cst_20 : f32 to vector<1x128xf32>
      %36 = arith.mulf %34, %35 : vector<1x128xf32>
      %37 = arith.mulf %33, %33 : vector<1x128xf32>
      %38 = arith.subf %36, %37 : vector<1x128xf32>
      %cst_21 = arith.constant 0.000000e+00 : f32
      %39 = vector.broadcast %cst_21 : f32 to vector<1x128xf32>
      %40 = arith.maximumf %38, %39 : vector<1x128xf32>
      %c0_22 = arith.constant 0 : index
      %c0_23 = arith.constant 0 : index
      %41 = vector.load %arg2[%c0_22, %c0_23] : memref<1x128xf32, #tpu.memory_space<vmem>>, vector<1x128xf32>
      %cst_24 = arith.constant 9.99999974E-6 : f32
      %42 = vector.broadcast %cst_24 : f32 to vector<1x128xf32>
      %43 = arith.addf %40, %42 : vector<1x128xf32>
      %44 = math.rsqrt %43 : vector<1x128xf32>
      %45 = arith.mulf %41, %44 : vector<1x128xf32>
      %c0_25 = arith.constant 0 : index
      %c0_26 = arith.constant 0 : index
      %46 = vector.load %arg8[%c0_25, %c0_26] : memref<1x128xf32, #tpu.memory_space<vmem>>, vector<1x128xf32>
      %47 = arith.addf %46, %33 : vector<1x128xf32>
      %c0_27 = arith.constant 0 : index
      %c0_28 = arith.constant 0 : index
      %48 = vector.load %arg4[%c0_27, %c0_28] : memref<1x128xf32, #tpu.memory_space<vmem>>, vector<1x128xf32>
      tpu.vector_store %arg4[%c0_27, %c0_28], %45 {strides = array<i32>} : memref<1x128xf32, #tpu.memory_space<vmem>>, vector<1x128xf32>,
      %c0_29 = arith.constant 0 : index
      %c0_30 = arith.constant 0 : index
      %49 = vector.load %arg3[%c0_29, %c0_30] : memref<1x128xf32, #tpu.memory_space<vmem>>, vector<1x128xf32>
      %50 = arith.mulf %47, %45 : vector<1x128xf32>
      %51 = arith.subf %49, %50 : vector<1x128xf32>
      %c0_31 = arith.constant 0 : index
      %c0_32 = arith.constant 0 : index
      %52 = vector.load %arg5[%c0_31, %c0_32] : memref<1x128xf32, #tpu.memory_space<vmem>>, vector<1x128xf32>
      tpu.vector_store %arg5[%c0_31, %c0_32], %51 {strides = array<i32>} : memref<1x128xf32, #tpu.memory_space<vmem>>, vector<1x128xf32>,
    } else {
    }
    return
  }
  func.func @transform_0(%arg0: i32) -> (i32, i32) {
    %c0_i32 = arith.constant 0 : i32
    %c0_i32_0 = arith.constant 0 : i32
    return %arg0, %c0_i32 : i32, i32
  }
  func.func @transform_1(%arg0: i32) -> (i32, i32) {
    %c0_i32 = arith.constant 0 : i32
    %c0_i32_0 = arith.constant 0 : i32
    %c0_i32_1 = arith.constant 0 : i32
    return %c0_i32, %c0_i32_0 : i32, i32
  }
  func.func @transform_2(%arg0: i32) -> (i32, i32) {
    %c0_i32 = arith.constant 0 : i32
    %c0_i32_0 = arith.constant 0 : i32
    %c0_i32_1 = arith.constant 0 : i32
    return %c0_i32, %c0_i32_0 : i32, i32
  }
  func.func @transform_3(%arg0: i32) -> (i32, i32) {
    %c0_i32 = arith.constant 0 : i32
    %c0_i32_0 = arith.constant 0 : i32
    %c0_i32_1 = arith.constant 0 : i32
    return %c0_i32, %c0_i32_0 : i32, i32
  }
  func.func @transform_4(%arg0: i32) -> (i32, i32) {
    %c0_i32 = arith.constant 0 : i32
    %c0_i32_0 = arith.constant 0 : i32
    %c0_i32_1 = arith.constant 0 : i32
    return %c0_i32, %c0_i32_0 : i32, i32
  }
}

module attributes {stable_mosaic.version = 11 : i64} {
  func.func @bn_apply_relu_kernel(%arg0: i32, %arg1: memref<256x128xf32, #tpu.memory_space<vmem>>, %arg2: memref<1x128xf32, #tpu.memory_space<vmem>>, %arg3: memref<1x128xf32, #tpu.memory_space<vmem>>, %arg4: memref<256x128xbf16, #tpu.memory_space<vmem>>) attributes {dimension_semantics = [#tpu.dimension_semantics<parallel>], iteration_bounds = array<i64: 2>, scalar_prefetch = 0 : i64, scratch_operands = 0 : i64, tpu.core_type = #tpu.core_type<tc>, window_params = [{transform_indices = @transform_0, window_bounds = array<i64: 256, 128>}, {pipeline_mode = #tpu.pipeline_mode<synchronous>, transform_indices = @transform_1, window_bounds = array<i64: 1, 128>}, {pipeline_mode = #tpu.pipeline_mode<synchronous>, transform_indices = @transform_2, window_bounds = array<i64: 1, 128>}, {transform_indices = @transform_3, window_bounds = array<i64: 256, 128>}]} {
    %c0 = arith.constant 0 : index
    %c0_0 = arith.constant 0 : index
    %0 = vector.load %arg1[%c0, %c0_0] : memref<256x128xf32, #tpu.memory_space<vmem>>, vector<256x128xf32>
    %c0_1 = arith.constant 0 : index
    %c0_2 = arith.constant 0 : index
    %1 = vector.load %arg2[%c0_1, %c0_2] : memref<1x128xf32, #tpu.memory_space<vmem>>, vector<1x128xf32>
    %2 = vector.broadcast %1 : vector<1x128xf32> to vector<256x128xf32>
    %3 = arith.mulf %0, %2 : vector<256x128xf32>
    %c0_3 = arith.constant 0 : index
    %c0_4 = arith.constant 0 : index
    %4 = vector.load %arg3[%c0_3, %c0_4] : memref<1x128xf32, #tpu.memory_space<vmem>>, vector<1x128xf32>
    %5 = vector.broadcast %4 : vector<1x128xf32> to vector<256x128xf32>
    %6 = arith.addf %3, %5 : vector<256x128xf32>
    %cst = arith.constant 0.000000e+00 : f32
    %7 = vector.broadcast %cst : f32 to vector<256x128xf32>
    %8 = arith.maximumf %6, %7 : vector<256x128xf32>
    %9 = arith.truncf %8 : vector<256x128xf32> to vector<256x128xbf16>
    %c0_5 = arith.constant 0 : index
    %c0_6 = arith.constant 0 : index
    %10 = vector.load %arg4[%c0_5, %c0_6] : memref<256x128xbf16, #tpu.memory_space<vmem>>, vector<256x128xbf16>
    tpu.vector_store %arg4[%c0_5, %c0_6], %9 {strides = array<i32>} : memref<256x128xbf16, #tpu.memory_space<vmem>>, vector<256x128xbf16>,
    return
  }
  func.func @transform_0(%arg0: i32) -> (i32, i32) {
    %c0_i32 = arith.constant 0 : i32
    %c0_i32_0 = arith.constant 0 : i32
    return %arg0, %c0_i32 : i32, i32
  }
  func.func @transform_1(%arg0: i32) -> (i32, i32) {
    %c0_i32 = arith.constant 0 : i32
    %c0_i32_0 = arith.constant 0 : i32
    %c0_i32_1 = arith.constant 0 : i32
    return %c0_i32, %c0_i32_0 : i32, i32
  }
  func.func @transform_2(%arg0: i32) -> (i32, i32) {
    %c0_i32 = arith.constant 0 : i32
    %c0_i32_0 = arith.constant 0 : i32
    %c0_i32_1 = arith.constant 0 : i32
    return %c0_i32, %c0_i32_0 : i32, i32
  }
  func.func @transform_3(%arg0: i32) -> (i32, i32) {
    %c0_i32 = arith.constant 0 : i32
    %c0_i32_0 = arith.constant 0 : i32
    return %arg0, %c0_i32 : i32, i32
  }
}

module attributes {stable_mosaic.version = 11 : i64} {
  func.func @bn_stats_kernel(%arg0: i32, %arg1: memref<128x128xf32, #tpu.memory_space<vmem>>, %arg2: memref<1x128xf32, #tpu.memory_space<vmem>>, %arg3: memref<1x128xf32, #tpu.memory_space<vmem>>, %arg4: memref<1x128xf32, #tpu.memory_space<vmem>>, %arg5: memref<1x128xf32, #tpu.memory_space<vmem>>, %arg6: memref<1x128xf32, #tpu.memory_space<vmem>>, %arg7: memref<1x128xf32, #tpu.memory_space<vmem>>, %arg8: memref<1x128xf32, #tpu.memory_space<vmem>>) attributes {dimension_semantics = [#tpu.dimension_semantics<arbitrary>], iteration_bounds = array<i64: 1>, scalar_prefetch = 0 : i64, scratch_operands = 3 : i64, tpu.core_type = #tpu.core_type<tc>, window_params = [{transform_indices = @transform_0, window_bounds = array<i64: 128, 128>}, {pipeline_mode = #tpu.pipeline_mode<synchronous>, transform_indices = @transform_1, window_bounds = array<i64: 1, 128>}, {pipeline_mode = #tpu.pipeline_mode<synchronous>, transform_indices = @transform_2, window_bounds = array<i64: 1, 128>}, {pipeline_mode = #tpu.pipeline_mode<synchronous>, transform_indices = @transform_3, window_bounds = array<i64: 1, 128>}, {pipeline_mode = #tpu.pipeline_mode<synchronous>, transform_indices = @transform_4, window_bounds = array<i64: 1, 128>}]} {
    %c0_i32 = arith.constant 0 : i32
    %0 = arith.cmpi eq, %arg0, %c0_i32 : i32
    %1 = arith.extui %0 : i1 to i32
    %c0_i32_0 = arith.constant 0 : i32
    %2 = arith.cmpi ne, %1, %c0_i32_0 : i32
    scf.if %2 {
      %c0_17 = arith.constant 0 : index
      %c0_18 = arith.constant 0 : index
      %31 = vector.load %arg1[%c0_17, %c0_18] : memref<128x128xf32, #tpu.memory_space<vmem>>, vector<1x128xf32>
      %c0_19 = arith.constant 0 : index
      %c0_20 = arith.constant 0 : index
      %32 = vector.load %arg8[%c0_19, %c0_20] : memref<1x128xf32, #tpu.memory_space<vmem>>, vector<1x128xf32>
      tpu.vector_store %arg8[%c0_19, %c0_20], %31 {strides = array<i32>} : memref<1x128xf32, #tpu.memory_space<vmem>>, vector<1x128xf32>,
      %cst_21 = arith.constant 0.000000e+00 : f32
      %33 = vector.broadcast %cst_21 : f32 to vector<1x128xf32>
      %c0_22 = arith.constant 0 : index
      %c0_23 = arith.constant 0 : index
      %34 = vector.load %arg6[%c0_22, %c0_23] : memref<1x128xf32, #tpu.memory_space<vmem>>, vector<1x128xf32>
      tpu.vector_store %arg6[%c0_22, %c0_23], %33 {strides = array<i32>} : memref<1x128xf32, #tpu.memory_space<vmem>>, vector<1x128xf32>,
      %cst_24 = arith.constant 0.000000e+00 : f32
      %35 = vector.broadcast %cst_24 : f32 to vector<1x128xf32>
      %c0_25 = arith.constant 0 : index
      %c0_26 = arith.constant 0 : index
      %36 = vector.load %arg7[%c0_25, %c0_26] : memref<1x128xf32, #tpu.memory_space<vmem>>, vector<1x128xf32>
      tpu.vector_store %arg7[%c0_25, %c0_26], %35 {strides = array<i32>} : memref<1x128xf32, #tpu.memory_space<vmem>>, vector<1x128xf32>,
    } else {
    }
    %c0 = arith.constant 0 : index
    %c0_1 = arith.constant 0 : index
    %3 = vector.load %arg1[%c0, %c0_1] : memref<128x128xf32, #tpu.memory_space<vmem>>, vector<128x128xf32>
    %c128_i32 = arith.constant 128 : i32
    %4 = arith.muli %arg0, %c128_i32 : i32
    %5 = tpu.iota {dimensions = array<i32: 0>} : vector<128x1xi32>
    %6 = vector.broadcast %4 : i32 to vector<128x1xi32>
    %7 = arith.addi %6, %5 : vector<128x1xi32>
    %c128_i32_2 = arith.constant 128 : i32
    %8 = vector.broadcast %c128_i32_2 : i32 to vector<128x1xi32>
    %9 = arith.cmpi slt, %7, %8 : vector<128x1xi32>
    %c0_3 = arith.constant 0 : index
    %c0_4 = arith.constant 0 : index
    %10 = vector.load %arg8[%c0_3, %c0_4] : memref<1x128xf32, #tpu.memory_space<vmem>>, vector<1x128xf32>
    %11 = vector.broadcast %10 : vector<1x128xf32> to vector<128x128xf32>
    %12 = arith.subf %3, %11 : vector<128x128xf32>
    %cst = arith.constant 0.000000e+00 : f32
    %13 = vector.shape_cast %9 : vector<128x1xi1> to vector<128x1xi1>
    %14 = vector.broadcast %13 : vector<128x1xi1> to vector<128x128xi1>
    %15 = vector.broadcast %cst : f32 to vector<128x128xf32>
    %16 = arith.select %14, %12, %15 : vector<128x128xi1>, vector<128x128xf32>
    %c0_5 = arith.constant 0 : index
    %c0_6 = arith.constant 0 : index
    %17 = vector.load %arg6[%c0_5, %c0_6] : memref<1x128xf32, #tpu.memory_space<vmem>>, vector<1x128xf32>
    %cst_7 = arith.constant dense<0.000000e+00> : vector<128xf32>
    %18 = vector.multi_reduction <add>, %16, %cst_7 [0] : vector<128x128xf32> to vector<128xf32>
    %19 = vector.shape_cast %18 : vector<128xf32> to vector<1x128xf32>
    %20 = arith.addf %17, %19 : vector<1x128xf32>
    %c0_8 = arith.constant 0 : index
    %c0_9 = arith.constant 0 : index
    %21 = vector.load %arg6[%c0_8, %c0_9] : memref<1x128xf32, #tpu.memory_space<vmem>>, vector<1x128xf32>
    tpu.vector_store %arg6[%c0_8, %c0_9], %20 {strides = array<i32>} : memref<1x128xf32, #tpu.memory_space<vmem>>, vector<1x128xf32>,
    %c0_10 = arith.constant 0 : index
    %c0_11 = arith.constant 0 : index
    %22 = vector.load %arg7[%c0_10, %c0_11] : memref<1x128xf32, #tpu.memory_space<vmem>>, vector<1x128xf32>
    %23 = arith.mulf %16, %16 : vector<128x128xf32>
    %cst_12 = arith.constant dense<0.000000e+00> : vector<128xf32>
    %24 = vector.multi_reduction <add>, %23, %cst_12 [0] : vector<128x128xf32> to vector<128xf32>
    %25 = vector.shape_cast %24 : vector<128xf32> to vector<1x128xf32>
    %26 = arith.addf %22, %25 : vector<1x128xf32>
    %c0_13 = arith.constant 0 : index
    %c0_14 = arith.constant 0 : index
    %27 = vector.load %arg7[%c0_13, %c0_14] : memref<1x128xf32, #tpu.memory_space<vmem>>, vector<1x128xf32>
    tpu.vector_store %arg7[%c0_13, %c0_14], %26 {strides = array<i32>} : memref<1x128xf32, #tpu.memory_space<vmem>>, vector<1x128xf32>,
    %c0_i32_15 = arith.constant 0 : i32
    %28 = arith.cmpi eq, %arg0, %c0_i32_15 : i32
    %29 = arith.extui %28 : i1 to i32
    %c0_i32_16 = arith.constant 0 : i32
    %30 = arith.cmpi ne, %29, %c0_i32_16 : i32
    scf.if %30 {
      %c0_17 = arith.constant 0 : index
      %c0_18 = arith.constant 0 : index
      %31 = vector.load %arg6[%c0_17, %c0_18] : memref<1x128xf32, #tpu.memory_space<vmem>>, vector<1x128xf32>
      %cst_19 = arith.constant 7.812500e-03 : f32
      %32 = vector.broadcast %cst_19 : f32 to vector<1x128xf32>
      %33 = arith.mulf %31, %32 : vector<1x128xf32>
      %c0_20 = arith.constant 0 : index
      %c0_21 = arith.constant 0 : index
      %34 = vector.load %arg7[%c0_20, %c0_21] : memref<1x128xf32, #tpu.memory_space<vmem>>, vector<1x128xf32>
      %cst_22 = arith.constant 7.812500e-03 : f32
      %35 = vector.broadcast %cst_22 : f32 to vector<1x128xf32>
      %36 = arith.mulf %34, %35 : vector<1x128xf32>
      %37 = arith.mulf %33, %33 : vector<1x128xf32>
      %38 = arith.subf %36, %37 : vector<1x128xf32>
      %cst_23 = arith.constant 0.000000e+00 : f32
      %39 = vector.broadcast %cst_23 : f32 to vector<1x128xf32>
      %40 = arith.maximumf %38, %39 : vector<1x128xf32>
      %c0_24 = arith.constant 0 : index
      %c0_25 = arith.constant 0 : index
      %41 = vector.load %arg2[%c0_24, %c0_25] : memref<1x128xf32, #tpu.memory_space<vmem>>, vector<1x128xf32>
      %cst_26 = arith.constant 9.99999974E-6 : f32
      %42 = vector.broadcast %cst_26 : f32 to vector<1x128xf32>
      %43 = arith.addf %40, %42 : vector<1x128xf32>
      %44 = math.rsqrt %43 : vector<1x128xf32>
      %45 = arith.mulf %41, %44 : vector<1x128xf32>
      %c0_27 = arith.constant 0 : index
      %c0_28 = arith.constant 0 : index
      %46 = vector.load %arg8[%c0_27, %c0_28] : memref<1x128xf32, #tpu.memory_space<vmem>>, vector<1x128xf32>
      %47 = arith.addf %46, %33 : vector<1x128xf32>
      %c0_29 = arith.constant 0 : index
      %c0_30 = arith.constant 0 : index
      %48 = vector.load %arg4[%c0_29, %c0_30] : memref<1x128xf32, #tpu.memory_space<vmem>>, vector<1x128xf32>
      tpu.vector_store %arg4[%c0_29, %c0_30], %45 {strides = array<i32>} : memref<1x128xf32, #tpu.memory_space<vmem>>, vector<1x128xf32>,
      %c0_31 = arith.constant 0 : index
      %c0_32 = arith.constant 0 : index
      %49 = vector.load %arg3[%c0_31, %c0_32] : memref<1x128xf32, #tpu.memory_space<vmem>>, vector<1x128xf32>
      %50 = arith.mulf %47, %45 : vector<1x128xf32>
      %51 = arith.subf %49, %50 : vector<1x128xf32>
      %c0_33 = arith.constant 0 : index
      %c0_34 = arith.constant 0 : index
      %52 = vector.load %arg5[%c0_33, %c0_34] : memref<1x128xf32, #tpu.memory_space<vmem>>, vector<1x128xf32>
      tpu.vector_store %arg5[%c0_33, %c0_34], %51 {strides = array<i32>} : memref<1x128xf32, #tpu.memory_space<vmem>>, vector<1x128xf32>,
    } else {
    }
    return
  }
  func.func @transform_0(%arg0: i32) -> (i32, i32) {
    %c0_i32 = arith.constant 0 : i32
    %c0_i32_0 = arith.constant 0 : i32
    return %arg0, %c0_i32 : i32, i32
  }
  func.func @transform_1(%arg0: i32) -> (i32, i32) {
    %c0_i32 = arith.constant 0 : i32
    %c0_i32_0 = arith.constant 0 : i32
    %c0_i32_1 = arith.constant 0 : i32
    return %c0_i32, %c0_i32_0 : i32, i32
  }
  func.func @transform_2(%arg0: i32) -> (i32, i32) {
    %c0_i32 = arith.constant 0 : i32
    %c0_i32_0 = arith.constant 0 : i32
    %c0_i32_1 = arith.constant 0 : i32
    return %c0_i32, %c0_i32_0 : i32, i32
  }
  func.func @transform_3(%arg0: i32) -> (i32, i32) {
    %c0_i32 = arith.constant 0 : i32
    %c0_i32_0 = arith.constant 0 : i32
    %c0_i32_1 = arith.constant 0 : i32
    return %c0_i32, %c0_i32_0 : i32, i32
  }
  func.func @transform_4(%arg0: i32) -> (i32, i32) {
    %c0_i32 = arith.constant 0 : i32
    %c0_i32_0 = arith.constant 0 : i32
    %c0_i32_1 = arith.constant 0 : i32
    return %c0_i32, %c0_i32_0 : i32, i32
  }
}

module attributes {stable_mosaic.version = 11 : i64} {
  func.func @matmul_kernel(%arg0: i32, %arg1: i32, %arg2: i32, %arg3: memref<128x384xbf16, #tpu.memory_space<vmem>>, %arg4: memref<384x128xbf16, #tpu.memory_space<vmem>>, %arg5: memref<128x128xf32, #tpu.memory_space<vmem>>, %arg6: memref<128x128xf32, #tpu.memory_space<vmem>>) attributes {dimension_semantics = [#tpu.dimension_semantics<parallel>, #tpu.dimension_semantics<parallel>, #tpu.dimension_semantics<arbitrary>], iteration_bounds = array<i64: 1, 1, 3>, scalar_prefetch = 0 : i64, scratch_operands = 1 : i64, tpu.core_type = #tpu.core_type<tc>, window_params = [{transform_indices = @transform_0, window_bounds = array<i64: 128, 384>}, {transform_indices = @transform_1, window_bounds = array<i64: 384, 128>}, {transform_indices = @transform_2, window_bounds = array<i64: 128, 128>}]} {
    %c0_i32 = arith.constant 0 : i32
    %0 = arith.cmpi eq, %arg2, %c0_i32 : i32
    %1 = arith.extui %0 : i1 to i32
    %c0_i32_0 = arith.constant 0 : i32
    %2 = arith.cmpi ne, %1, %c0_i32_0 : i32
    scf.if %2 {
      %cst_9 = arith.constant 0.000000e+00 : f32
      %12 = vector.broadcast %cst_9 : f32 to vector<128x128xf32>
      %c0_10 = arith.constant 0 : index
      %c0_11 = arith.constant 0 : index
      %13 = vector.load %arg6[%c0_10, %c0_11] : memref<128x128xf32, #tpu.memory_space<vmem>>, vector<128x128xf32>
      tpu.vector_store %arg6[%c0_10, %c0_11], %12 {strides = array<i32>} : memref<128x128xf32, #tpu.memory_space<vmem>>, vector<128x128xf32>,
    } else {
    }
    %c0 = arith.constant 0 : index
    %c0_1 = arith.constant 0 : index
    %3 = vector.load %arg6[%c0, %c0_1] : memref<128x128xf32, #tpu.memory_space<vmem>>, vector<128x128xf32>
    %c0_2 = arith.constant 0 : index
    %c0_3 = arith.constant 0 : index
    %4 = vector.load %arg3[%c0_2, %c0_3] : memref<128x384xbf16, #tpu.memory_space<vmem>>, vector<128x384xbf16>
    %c0_4 = arith.constant 0 : index
    %c0_5 = arith.constant 0 : index
    %5 = vector.load %arg4[%c0_4, %c0_5] : memref<384x128xbf16, #tpu.memory_space<vmem>>, vector<384x128xbf16>
    %cst = arith.constant dense<0.000000e+00> : vector<128x128xf32>
    %6 = tpu.matmul %4, %5, %cst {dimension_numbers = #tpu.dot_dimension_numbers<[1], [0], [0], [1], [0, 0, 1, 1], [], []>} : vector<128x384xbf16>, vector<384x128xbf16>, vector<128x128xf32> -> vector<128x128xf32>
    %7 = arith.addf %3, %6 : vector<128x128xf32>
    %c0_6 = arith.constant 0 : index
    %c0_7 = arith.constant 0 : index
    %8 = vector.load %arg6[%c0_6, %c0_7] : memref<128x128xf32, #tpu.memory_space<vmem>>, vector<128x128xf32>
    tpu.vector_store %arg6[%c0_6, %c0_7], %7 {strides = array<i32>} : memref<128x128xf32, #tpu.memory_space<vmem>>, vector<128x128xf32>,
    %c2_i32 = arith.constant 2 : i32
    %9 = arith.cmpi eq, %arg2, %c2_i32 : i32
    %10 = arith.extui %9 : i1 to i32
    %c0_i32_8 = arith.constant 0 : i32
    %11 = arith.cmpi ne, %10, %c0_i32_8 : i32
    scf.if %11 {
      %c0_9 = arith.constant 0 : index
      %c0_10 = arith.constant 0 : index
      %12 = vector.load %arg6[%c0_9, %c0_10] : memref<128x128xf32, #tpu.memory_space<vmem>>, vector<128x128xf32>
      %c0_11 = arith.constant 0 : index
      %c0_12 = arith.constant 0 : index
      %13 = vector.load %arg5[%c0_11, %c0_12] : memref<128x128xf32, #tpu.memory_space<vmem>>, vector<128x128xf32>
      tpu.vector_store %arg5[%c0_11, %c0_12], %12 {strides = array<i32>} : memref<128x128xf32, #tpu.memory_space<vmem>>, vector<128x128xf32>,
    } else {
    }
    return
  }
  func.func @transform_0(%arg0: i32, %arg1: i32, %arg2: i32) -> (i32, i32) {
    %c0_i32 = arith.constant 0 : i32
    return %arg0, %arg2 : i32, i32
  }
  func.func @transform_1(%arg0: i32, %arg1: i32, %arg2: i32) -> (i32, i32) {
    %c0_i32 = arith.constant 0 : i32
    return %arg2, %arg1 : i32, i32
  }
  func.func @transform_2(%arg0: i32, %arg1: i32, %arg2: i32) -> (i32, i32) {
    %c0_i32 = arith.constant 0 : i32
    return %arg0, %arg1 : i32, i32
  }
}

module attributes {stable_mosaic.version = 11 : i64} {
  func.func @bn_apply_relu_kernel(%arg0: i32, %arg1: memref<128x128xf32, #tpu.memory_space<vmem>>, %arg2: memref<1x128xf32, #tpu.memory_space<vmem>>, %arg3: memref<1x128xf32, #tpu.memory_space<vmem>>, %arg4: memref<128x128xbf16, #tpu.memory_space<vmem>>) attributes {dimension_semantics = [#tpu.dimension_semantics<parallel>], iteration_bounds = array<i64: 1>, scalar_prefetch = 0 : i64, scratch_operands = 0 : i64, tpu.core_type = #tpu.core_type<tc>, window_params = [{transform_indices = @transform_0, window_bounds = array<i64: 128, 128>}, {pipeline_mode = #tpu.pipeline_mode<synchronous>, transform_indices = @transform_1, window_bounds = array<i64: 1, 128>}, {pipeline_mode = #tpu.pipeline_mode<synchronous>, transform_indices = @transform_2, window_bounds = array<i64: 1, 128>}, {transform_indices = @transform_3, window_bounds = array<i64: 128, 128>}]} {
    %c0 = arith.constant 0 : index
    %c0_0 = arith.constant 0 : index
    %0 = vector.load %arg1[%c0, %c0_0] : memref<128x128xf32, #tpu.memory_space<vmem>>, vector<128x128xf32>
    %c0_1 = arith.constant 0 : index
    %c0_2 = arith.constant 0 : index
    %1 = vector.load %arg2[%c0_1, %c0_2] : memref<1x128xf32, #tpu.memory_space<vmem>>, vector<1x128xf32>
    %2 = vector.broadcast %1 : vector<1x128xf32> to vector<128x128xf32>
    %3 = arith.mulf %0, %2 : vector<128x128xf32>
    %c0_3 = arith.constant 0 : index
    %c0_4 = arith.constant 0 : index
    %4 = vector.load %arg3[%c0_3, %c0_4] : memref<1x128xf32, #tpu.memory_space<vmem>>, vector<1x128xf32>
    %5 = vector.broadcast %4 : vector<1x128xf32> to vector<128x128xf32>
    %6 = arith.addf %3, %5 : vector<128x128xf32>
    %cst = arith.constant 0.000000e+00 : f32
    %7 = vector.broadcast %cst : f32 to vector<128x128xf32>
    %8 = arith.maximumf %6, %7 : vector<128x128xf32>
    %9 = arith.truncf %8 : vector<128x128xf32> to vector<128x128xbf16>
    %c0_5 = arith.constant 0 : index
    %c0_6 = arith.constant 0 : index
    %10 = vector.load %arg4[%c0_5, %c0_6] : memref<128x128xbf16, #tpu.memory_space<vmem>>, vector<128x128xbf16>
    tpu.vector_store %arg4[%c0_5, %c0_6], %9 {strides = array<i32>} : memref<128x128xbf16, #tpu.memory_space<vmem>>, vector<128x128xbf16>,
    return
  }
  func.func @transform_0(%arg0: i32) -> (i32, i32) {
    %c0_i32 = arith.constant 0 : i32
    %c0_i32_0 = arith.constant 0 : i32
    return %arg0, %c0_i32 : i32, i32
  }
  func.func @transform_1(%arg0: i32) -> (i32, i32) {
    %c0_i32 = arith.constant 0 : i32
    %c0_i32_0 = arith.constant 0 : i32
    %c0_i32_1 = arith.constant 0 : i32
    return %c0_i32, %c0_i32_0 : i32, i32
  }
  func.func @transform_2(%arg0: i32) -> (i32, i32) {
    %c0_i32 = arith.constant 0 : i32
    %c0_i32_0 = arith.constant 0 : i32
    %c0_i32_1 = arith.constant 0 : i32
    return %c0_i32, %c0_i32_0 : i32, i32
  }
  func.func @transform_3(%arg0: i32) -> (i32, i32) {
    %c0_i32 = arith.constant 0 : i32
    %c0_i32_0 = arith.constant 0 : i32
    return %arg0, %c0_i32 : i32, i32
  }
}

module attributes {stable_mosaic.version = 11 : i64} {
  func.func @matmul_kernel(%arg0: i32, %arg1: i32, %arg2: i32, %arg3: memref<128x128xbf16, #tpu.memory_space<vmem>>, %arg4: memref<128x128xbf16, #tpu.memory_space<vmem>>, %arg5: memref<128x128xf32, #tpu.memory_space<vmem>>, %arg6: memref<128x128xf32, #tpu.memory_space<vmem>>) attributes {dimension_semantics = [#tpu.dimension_semantics<parallel>, #tpu.dimension_semantics<parallel>, #tpu.dimension_semantics<arbitrary>], iteration_bounds = array<i64: 1, 1, 1>, scalar_prefetch = 0 : i64, scratch_operands = 1 : i64, tpu.core_type = #tpu.core_type<tc>, window_params = [{transform_indices = @transform_0, window_bounds = array<i64: 128, 128>}, {transform_indices = @transform_1, window_bounds = array<i64: 128, 128>}, {transform_indices = @transform_2, window_bounds = array<i64: 128, 128>}]} {
    %c0_i32 = arith.constant 0 : i32
    %0 = arith.cmpi eq, %arg2, %c0_i32 : i32
    %1 = arith.extui %0 : i1 to i32
    %c0_i32_0 = arith.constant 0 : i32
    %2 = arith.cmpi ne, %1, %c0_i32_0 : i32
    scf.if %2 {
      %cst_10 = arith.constant 0.000000e+00 : f32
      %12 = vector.broadcast %cst_10 : f32 to vector<128x128xf32>
      %c0_11 = arith.constant 0 : index
      %c0_12 = arith.constant 0 : index
      %13 = vector.load %arg6[%c0_11, %c0_12] : memref<128x128xf32, #tpu.memory_space<vmem>>, vector<128x128xf32>
      tpu.vector_store %arg6[%c0_11, %c0_12], %12 {strides = array<i32>} : memref<128x128xf32, #tpu.memory_space<vmem>>, vector<128x128xf32>,
    } else {
    }
    %c0 = arith.constant 0 : index
    %c0_1 = arith.constant 0 : index
    %3 = vector.load %arg6[%c0, %c0_1] : memref<128x128xf32, #tpu.memory_space<vmem>>, vector<128x128xf32>
    %c0_2 = arith.constant 0 : index
    %c0_3 = arith.constant 0 : index
    %4 = vector.load %arg3[%c0_2, %c0_3] : memref<128x128xbf16, #tpu.memory_space<vmem>>, vector<128x128xbf16>
    %c0_4 = arith.constant 0 : index
    %c0_5 = arith.constant 0 : index
    %5 = vector.load %arg4[%c0_4, %c0_5] : memref<128x128xbf16, #tpu.memory_space<vmem>>, vector<128x128xbf16>
    %cst = arith.constant dense<0.000000e+00> : vector<128x128xf32>
    %6 = tpu.matmul %4, %5, %cst {dimension_numbers = #tpu.dot_dimension_numbers<[1], [0], [0], [1], [0, 0, 1, 1], [], []>} : vector<128x128xbf16>, vector<128x128xbf16>, vector<128x128xf32> -> vector<128x128xf32>
    %7 = arith.addf %3, %6 : vector<128x128xf32>
    %c0_6 = arith.constant 0 : index
    %c0_7 = arith.constant 0 : index
    %8 = vector.load %arg6[%c0_6, %c0_7] : memref<128x128xf32, #tpu.memory_space<vmem>>, vector<128x128xf32>
    tpu.vector_store %arg6[%c0_6, %c0_7], %7 {strides = array<i32>} : memref<128x128xf32, #tpu.memory_space<vmem>>, vector<128x128xf32>,
    %c0_i32_8 = arith.constant 0 : i32
    %9 = arith.cmpi eq, %arg2, %c0_i32_8 : i32
    %10 = arith.extui %9 : i1 to i32
    %c0_i32_9 = arith.constant 0 : i32
    %11 = arith.cmpi ne, %10, %c0_i32_9 : i32
    scf.if %11 {
      %c0_10 = arith.constant 0 : index
      %c0_11 = arith.constant 0 : index
      %12 = vector.load %arg6[%c0_10, %c0_11] : memref<128x128xf32, #tpu.memory_space<vmem>>, vector<128x128xf32>
      %c0_12 = arith.constant 0 : index
      %c0_13 = arith.constant 0 : index
      %13 = vector.load %arg5[%c0_12, %c0_13] : memref<128x128xf32, #tpu.memory_space<vmem>>, vector<128x128xf32>
      tpu.vector_store %arg5[%c0_12, %c0_13], %12 {strides = array<i32>} : memref<128x128xf32, #tpu.memory_space<vmem>>, vector<128x128xf32>,
    } else {
    }
    return
  }
  func.func @transform_0(%arg0: i32, %arg1: i32, %arg2: i32) -> (i32, i32) {
    %c0_i32 = arith.constant 0 : i32
    return %arg0, %arg2 : i32, i32
  }
  func.func @transform_1(%arg0: i32, %arg1: i32, %arg2: i32) -> (i32, i32) {
    %c0_i32 = arith.constant 0 : i32
    return %arg2, %arg1 : i32, i32
  }
  func.func @transform_2(%arg0: i32, %arg1: i32, %arg2: i32) -> (i32, i32) {
    %c0_i32 = arith.constant 0 : i32
    return %arg0, %arg1 : i32, i32
  }
}

module attributes {stable_mosaic.version = 11 : i64} {
  func.func @matmul_residual_kernel(%arg0: i32, %arg1: i32, %arg2: i32, %arg3: memref<128x384xbf16, #tpu.memory_space<vmem>>, %arg4: memref<384x128xbf16, #tpu.memory_space<vmem>>, %arg5: memref<128x128xf32, #tpu.memory_space<vmem>>, %arg6: memref<128x128xf32, #tpu.memory_space<vmem>>, %arg7: memref<128x128xf32, #tpu.memory_space<vmem>>) attributes {dimension_semantics = [#tpu.dimension_semantics<parallel>, #tpu.dimension_semantics<parallel>, #tpu.dimension_semantics<arbitrary>], iteration_bounds = array<i64: 1, 1, 3>, scalar_prefetch = 0 : i64, scratch_operands = 1 : i64, tpu.core_type = #tpu.core_type<tc>, window_params = [{transform_indices = @transform_0, window_bounds = array<i64: 128, 384>}, {transform_indices = @transform_1, window_bounds = array<i64: 384, 128>}, {transform_indices = @transform_2, window_bounds = array<i64: 128, 128>}, {transform_indices = @transform_3, window_bounds = array<i64: 128, 128>}]} {
    %c0_i32 = arith.constant 0 : i32
    %0 = arith.cmpi eq, %arg2, %c0_i32 : i32
    %1 = arith.extui %0 : i1 to i32
    %c0_i32_0 = arith.constant 0 : i32
    %2 = arith.cmpi ne, %1, %c0_i32_0 : i32
    scf.if %2 {
      %cst_9 = arith.constant 0.000000e+00 : f32
      %12 = vector.broadcast %cst_9 : f32 to vector<128x128xf32>
      %c0_10 = arith.constant 0 : index
      %c0_11 = arith.constant 0 : index
      %13 = vector.load %arg7[%c0_10, %c0_11] : memref<128x128xf32, #tpu.memory_space<vmem>>, vector<128x128xf32>
      tpu.vector_store %arg7[%c0_10, %c0_11], %12 {strides = array<i32>} : memref<128x128xf32, #tpu.memory_space<vmem>>, vector<128x128xf32>,
    } else {
    }
    %c0 = arith.constant 0 : index
    %c0_1 = arith.constant 0 : index
    %3 = vector.load %arg7[%c0, %c0_1] : memref<128x128xf32, #tpu.memory_space<vmem>>, vector<128x128xf32>
    %c0_2 = arith.constant 0 : index
    %c0_3 = arith.constant 0 : index
    %4 = vector.load %arg3[%c0_2, %c0_3] : memref<128x384xbf16, #tpu.memory_space<vmem>>, vector<128x384xbf16>
    %c0_4 = arith.constant 0 : index
    %c0_5 = arith.constant 0 : index
    %5 = vector.load %arg4[%c0_4, %c0_5] : memref<384x128xbf16, #tpu.memory_space<vmem>>, vector<384x128xbf16>
    %cst = arith.constant dense<0.000000e+00> : vector<128x128xf32>
    %6 = tpu.matmul %4, %5, %cst {dimension_numbers = #tpu.dot_dimension_numbers<[1], [0], [0], [1], [0, 0, 1, 1], [], []>} : vector<128x384xbf16>, vector<384x128xbf16>, vector<128x128xf32> -> vector<128x128xf32>
    %7 = arith.addf %3, %6 : vector<128x128xf32>
    %c0_6 = arith.constant 0 : index
    %c0_7 = arith.constant 0 : index
    %8 = vector.load %arg7[%c0_6, %c0_7] : memref<128x128xf32, #tpu.memory_space<vmem>>, vector<128x128xf32>
    tpu.vector_store %arg7[%c0_6, %c0_7], %7 {strides = array<i32>} : memref<128x128xf32, #tpu.memory_space<vmem>>, vector<128x128xf32>,
    %c2_i32 = arith.constant 2 : i32
    %9 = arith.cmpi eq, %arg2, %c2_i32 : i32
    %10 = arith.extui %9 : i1 to i32
    %c0_i32_8 = arith.constant 0 : i32
    %11 = arith.cmpi ne, %10, %c0_i32_8 : i32
    scf.if %11 {
      %c0_9 = arith.constant 0 : index
      %c0_10 = arith.constant 0 : index
      %12 = vector.load %arg7[%c0_9, %c0_10] : memref<128x128xf32, #tpu.memory_space<vmem>>, vector<128x128xf32>
      %c0_11 = arith.constant 0 : index
      %c0_12 = arith.constant 0 : index
      %13 = vector.load %arg5[%c0_11, %c0_12] : memref<128x128xf32, #tpu.memory_space<vmem>>, vector<128x128xf32>
      %14 = arith.addf %12, %13 : vector<128x128xf32>
      %c0_13 = arith.constant 0 : index
      %c0_14 = arith.constant 0 : index
      %15 = vector.load %arg6[%c0_13, %c0_14] : memref<128x128xf32, #tpu.memory_space<vmem>>, vector<128x128xf32>
      tpu.vector_store %arg6[%c0_13, %c0_14], %14 {strides = array<i32>} : memref<128x128xf32, #tpu.memory_space<vmem>>, vector<128x128xf32>,
    } else {
    }
    return
  }
  func.func @transform_0(%arg0: i32, %arg1: i32, %arg2: i32) -> (i32, i32) {
    %c0_i32 = arith.constant 0 : i32
    return %arg0, %arg2 : i32, i32
  }
  func.func @transform_1(%arg0: i32, %arg1: i32, %arg2: i32) -> (i32, i32) {
    %c0_i32 = arith.constant 0 : i32
    return %arg2, %arg1 : i32, i32
  }
  func.func @transform_2(%arg0: i32, %arg1: i32, %arg2: i32) -> (i32, i32) {
    %c0_i32 = arith.constant 0 : i32
    return %arg0, %arg1 : i32, i32
  }
  func.func @transform_3(%arg0: i32, %arg1: i32, %arg2: i32) -> (i32, i32) {
    %c0_i32 = arith.constant 0 : i32
    return %arg0, %arg1 : i32, i32
  }
}

</mosaic_0001>

<bundles_post_ra>
// kernel: preact_block_forward.8
= control target key start
LH: loop header
LB: loop body
LE: loop exit
PB: predicated region body
PF: predicated region fallthrough
CT: control target
= control target key end

     0   :  { %s740_s12 = smov 0   ;;  %s887_s0 = inlined_call_operand.vmem [shape: f32[512,128], index: 0, kind: input, shape index: {}]   ;;  %s888_s1 = inlined_call_operand.vmem [shape: f32[1,128], index: 1, kind: input, shape index: {}]   ;;  %s889_s2 = inlined_call_operand.vmem [shape: f32[1,128], index: 2, kind: input, shape index: {}]   ;;  %s890_s3 = inlined_call_operand.vmem [shape: bf16[512,128], index: 3, kind: output, shape index: {}]  }
   0x1 LB: > { %s532_s13 = sadd.s32 4294967295, %s718_s12   ;;  %p536_p0 = scmp.ge.s32.totalorder %s718_s12, 1  ;;  %s718_s12 = sphi %s740_s12, %s13_s12  }
   0x2   : > { %p138_p1 = scmp.lt.s32.totalorder %s718_s12, 3 }
   0x4   : > { %p139_p2 = pnand %p536_p0, %p138_p1 }
   0x5   : > { %s537_s14 = sshll.u32 (!%p139_p2), %s532_s13, 5  ;;  %v754_v0 = vld [vmem:[%s888_s1] ss:$0 sm:$0xff] (!%p139_p2) }
   0x6   : > { %142 = sbr.rel (%p139_p2) target bundleno = 51 (0x33), region = 32  ;;  %p163_p3 = scmp.lt.s32.totalorder (!%p139_p2), %s537_s14, 63  ;;  %v764_v1 = vld [vmem:[%s889_s2] ss:$0 sm:$0xff] (!%p139_p2) }
   0xd   : > { %s892_s14 = smov (!%p163_p3, %s537_s14), 63 }
   0xe   : > { %s538_s15 = sshll.u32 %s892_s14, 3  ;;  %s540_s23 = sshll.u32 %s892_s14, 2 }
   0xf   : > { %s759_s20 = scalar_lea.vmem %s887_s0, %s538_s15  ;;  %s796_s26 = scalar_lea.vmem %s890_s3, %s540_s23 }
  0x10   : > { %v174_v2 = vld [vmem:[%s759_s20] sm:$0xff]  ;;  %v175_v3 = vld [vmem:[%s759_s20 + $0x8] sm:$0xff]  ;;  %v176_v4 = vld [vmem:[%s759_s20 + $0x10] sm:$0xff] }
  0x11   : > { %v213_v5 = vmul.f32 %v754_v0, %v174_v2  ;;  %v214_v6 = vmul.f32 %v754_v0, %v175_v3  ;;  %v177_v7 = vld [vmem:[%s759_s20 + $0x18] sm:$0xff]  ;;  %v215_v8 = vmul.f32 %v754_v0, %v176_v4  ;;  %v178_v9 = vld [vmem:[%s759_s20 + $0x20] sm:$0xff]  ;;  %v179_v10 = vld [vmem:[%s759_s20 + $0x28] sm:$0xff] }
  0x12   : > { %v216_v11 = vmul.f32 %v754_v0, %v177_v7  ;;  %v217_v12 = vmul.f32 %v754_v0, %v178_v9  ;;  %v218_v13 = vmul.f32 %v754_v0, %v179_v10  ;;  %v180_v14 = vld [vmem:[%s759_s20 + $0x30] sm:$0xff]  ;;  %v181_v15 = vld [vmem:[%s759_s20 + $0x38] sm:$0xff]  ;;  %v182_v24 = vld [vmem:[%s759_s20 + $0x40] sm:$0xff] }
  0x13   : > { %v252_v16 = vadd.f32 %v764_v1, %v213_v5  ;;  %v253_v17 = vadd.f32 %v764_v1, %v214_v6  ;;  %v254_v18 = vadd.f32 %v764_v1, %v215_v8  ;;  %v219_v19 = vmul.f32 %v754_v0, %v180_v14  ;;  %v183_v25 = vld [vmem:[%s759_s20 + $0x48] sm:$0xff]  ;;  %v184_v30 = vld [vmem:[%s759_s20 + $0x50] sm:$0xff]  ;;  %v185_v35 = vld [vmem:[%s759_s20 + $0x58] sm:$0xff] }
  0x14   : > { %v255_v20 = vadd.f32 %v764_v1, %v216_v11  ;;  %v256_v21 = vadd.f32 %v764_v1, %v217_v12  ;;  %v257_v22 = vadd.f32 %v764_v1, %v218_v13  ;;  %v220_v23 = vmul.f32 %v754_v0, %v181_v15  ;;  %v186_v36 = vld [vmem:[%s759_s20 + $0x60] sm:$0xff]  ;;  %v187_v41 = vld [vmem:[%s759_s20 + $0x68] sm:$0xff]  ;;  %v188_v42 = vld [vmem:[%s759_s20 + $0x70] sm:$0xff] }
  0x15   : > { %v284_v26 = vmax.f32 %v252_v16, 0.0  ;;  %v285_v27 = vmax.f32 %v253_v17, 0.0  ;;  %v286_v28 = vmax.f32 %v254_v18, 0.0  ;;  %v258_v29 = vadd.f32 %v764_v1, %v219_v19  ;;  %v189_v51 = vld [vmem:[%s759_s20 + $0x78] sm:$0xff]  ;;  %v190_v56 = vld [vmem:[%s759_s20 + $0x80] sm:$0xff]  ;;  %v191_v61 = vld [vmem:[%s759_s20 + $0x88] sm:$0xff] }
  0x16   : > { %v287_v31 = vmax.f32 %v255_v20, 0.0  ;;  %v288_v32 = vmax.f32 %v256_v21, 0.0  ;;  %v289_v33 = vmax.f32 %v257_v22, 0.0  ;;  %v259_v34 = vadd.f32 %v764_v1, %v220_v23  ;;  %v192_v4 = vld [vmem:[%s759_s20 + $0x90] sm:$0xff]  ;;  %v193_v5 = vld [vmem:[%s759_s20 + $0x98] sm:$0xff]  ;;  %v194_v10 = vld [vmem:[%s759_s20 + $0xa0] sm:$0xff] }
  0x17   : > { %v612_v37 = vpack.c.bf16 %v285_v27, %v284_v26  ;;  %v290_v38 = vmax.f32 %v258_v29, 0.0  ;;  %v221_v39 = vmul.f32 %v754_v0, %v182_v24  ;;  %v222_v40 = vmul.f32 %v754_v0, %v183_v25  ;;  %v195_v15 = vld [vmem:[%s759_s20 + $0xa8] sm:$0xff]  ;;  %v196_v20 = vld [vmem:[%s759_s20 + $0xb0] sm:$0xff]  ;;  %v197_v25 = vld [vmem:[%s759_s20 + $0xb8] sm:$0xff] }
  0x18   : > { %v617_v43 = vpack.c.bf16 %v287_v31, %v286_v28  ;;  %v622_v44 = vpack.c.bf16 %v289_v33, %v288_v32  ;;  %v291_v45 = vmax.f32 %v259_v34, 0.0  ;;  %v223_v46 = vmul.f32 %v754_v0, %v184_v30  ;;  %v198_v30 = vld [vmem:[%s759_s20 + $0xc0] sm:$0xff] }
  0x19   : > { %613 = vst [vmem:[%s796_s26] sm:$0xff] %v612_v37   ;;  %v260_v47 = vadd.f32 %v764_v1, %v221_v39  ;;  %v261_v48 = vadd.f32 %v764_v1, %v222_v40  ;;  %v224_v49 = vmul.f32 %v754_v0, %v185_v35  ;;  %v225_v50 = vmul.f32 %v754_v0, %v186_v36  ;;  %v199_v35 = vld [vmem:[%s759_s20 + $0xc8] sm:$0xff]  ;;  %v200_v40 = vld [vmem:[%s759_s20 + $0xd0] sm:$0xff] }
  0x1a   : > { %689 = vst [vmem:[%s796_s26 + $0x8] sm:$0xff] %v617_v43   ;;  %690 = vst [vmem:[%s796_s26 + $0x10] sm:$0xff] %v622_v44   ;;  %v627_v52 = vpack.c.bf16 %v291_v45, %v290_v38  ;;  %v262_v53 = vadd.f32 %v764_v1, %v223_v46  ;;  %v226_v54 = vmul.f32 %v754_v0, %v187_v41  ;;  %v201_v41 = vld [vmem:[%s759_s20 + $0xd8] sm:$0xff]  ;;  %v202_v46 = vld [vmem:[%s759_s20 + $0xe0] sm:$0xff] }
  0x1b   : > { %v227_v55 = vmul.f32 %v754_v0, %v188_v42  ;;  %v292_v57 = vmax.f32 %v260_v47, 0.0  ;;  %v293_v58 = vmax.f32 %v261_v48, 0.0  ;;  %v263_v59 = vadd.f32 %v764_v1, %v224_v49 }
  0x1c   : > { %v264_v60 = vadd.f32 %v764_v1, %v225_v50  ;;  %691 = vst [vmem:[%s796_s26 + $0x18] sm:$0xff] %v627_v52   ;;  %v294_v62 = vmax.f32 %v262_v53, 0.0  ;;  %v265_v63 = vadd.f32 %v764_v1, %v226_v54  ;;  %v228_v2 = vmul.f32 %v754_v0, %v189_v51  ;;  %v203_v51 = vld [vmem:[%s759_s20 + $0xe8] sm:$0xff] }
  0x1d   : > { %v266_v3 = vadd.f32 %v764_v1, %v227_v55  ;;  %v632_v6 = vpack.c.bf16 %v293_v58, %v292_v57  ;;  %v295_v7 = vmax.f32 %v263_v59, 0.0  ;;  %v229_v9 = vmul.f32 %v754_v0, %v190_v56  ;;  %v204_v56 = vld [vmem:[%s759_s20 + $0xf0] sm:$0xff] }
  0x1e   : > { %v296_v8 = vmax.f32 %v264_v60, 0.0  ;;  %v297_v11 = vmax.f32 %v265_v63, 0.0  ;;  %v267_v12 = vadd.f32 %v764_v1, %v228_v2  ;;  %v230_v14 = vmul.f32 %v754_v0, %v191_v61  ;;  %v205_v61 = vld [vmem:[%s759_s20 + $0xf8] sm:$0xff] }
  0x1f   : > { %v298_v13 = vmax.f32 %v266_v3, 0.0  ;;  %692 = vst [vmem:[%s796_s26 + $0x20] sm:$0xff] %v632_v6   ;;  %v637_v16 = vpack.c.bf16 %v295_v7, %v294_v62  ;;  %v268_v17 = vadd.f32 %v764_v1, %v229_v9  ;;  %v231_v18 = vmul.f32 %v754_v0, %v192_v4 }
  0x20   : > { %v232_v19 = vmul.f32 %v754_v0, %v193_v5  ;;  %v642_v21 = vpack.c.bf16 %v297_v11, %v296_v8  ;;  %v299_v22 = vmax.f32 %v267_v12, 0.0  ;;  %v269_v23 = vadd.f32 %v764_v1, %v230_v14 }
  0x21   : > { %v233_v24 = vmul.f32 %v754_v0, %v194_v10  ;;  %693 = vst [vmem:[%s796_s26 + $0x28] sm:$0xff] %v637_v16   ;;  %v300_v26 = vmax.f32 %v268_v17, 0.0  ;;  %v270_v27 = vadd.f32 %v764_v1, %v231_v18  ;;  %v234_v29 = vmul.f32 %v754_v0, %v195_v15 }
  0x22   : > { %v271_v28 = vadd.f32 %v764_v1, %v232_v19  ;;  %694 = vst [vmem:[%s796_s26 + $0x30] sm:$0xff] %v642_v21   ;;  %v647_v31 = vpack.c.bf16 %v299_v22, %v298_v13  ;;  %v301_v32 = vmax.f32 %v269_v23, 0.0  ;;  %v235_v34 = vmul.f32 %v754_v0, %v196_v20 }
  0x23   : > { %v272_v33 = vadd.f32 %v764_v1, %v233_v24  ;;  %v302_v36 = vmax.f32 %v270_v27, 0.0  ;;  %v273_v38 = vadd.f32 %v764_v1, %v234_v29  ;;  %v236_v39 = vmul.f32 %v754_v0, %v197_v25 }
  0x24   : > { %v303_v37 = vmax.f32 %v271_v28, 0.0  ;;  %695 = vst [vmem:[%s796_s26 + $0x38] sm:$0xff] %v647_v31   ;;  %v652_v42 = vpack.c.bf16 %v301_v32, %v300_v26  ;;  %v274_v44 = vadd.f32 %v764_v1, %v235_v34  ;;  %v237_v45 = vmul.f32 %v754_v0, %v198_v30 }
  0x25   : > { %v304_v43 = vmax.f32 %v272_v33, 0.0  ;;  %v305_v48 = vmax.f32 %v273_v38, 0.0  ;;  %v275_v49 = vadd.f32 %v764_v1, %v236_v39  ;;  %v238_v50 = vmul.f32 %v754_v0, %v199_v35 }
  0x26   : > { %v657_v47 = vpack.c.bf16 %v303_v37, %v302_v36  ;;  %696 = vst [vmem:[%s796_s26 + $0x40] sm:$0xff] %v652_v42   ;;  %v306_v52 = vmax.f32 %v274_v44, 0.0  ;;  %v276_v53 = vadd.f32 %v764_v1, %v237_v45  ;;  %v239_v54 = vmul.f32 %v754_v0, %v200_v40 }
  0x27   : > { %v240_v55 = vmul.f32 %v754_v0, %v201_v41  ;;  %v662_v57 = vpack.c.bf16 %v305_v48, %v304_v43  ;;  %v307_v58 = vmax.f32 %v275_v49, 0.0  ;;  %v277_v59 = vadd.f32 %v764_v1, %v238_v50 }
  0x28   : > { %697 = vst [vmem:[%s796_s26 + $0x48] sm:$0xff] %v657_v47   ;;  %v241_v60 = vmul.f32 %v754_v0, %v202_v46  ;;  %v308_v62 = vmax.f32 %v276_v53, 0.0  ;;  %v278_v63 = vadd.f32 %v764_v1, %v239_v54  ;;  %v242_v3 = vmul.f32 %v754_v0, %v203_v51 }
  0x29   : > { %v279_v2 = vadd.f32 %v764_v1, %v240_v55  ;;  %698 = vst [vmem:[%s796_s26 + $0x50] sm:$0xff] %v662_v57   ;;  %v667_v4 = vpack.c.bf16 %v307_v58, %v306_v52  ;;  %v309_v5 = vmax.f32 %v277_v59, 0.0  ;;  %v243_v7 = vmul.f32 %v754_v0, %v204_v56 }
  0x2a   : > { %v280_v6 = vadd.f32 %v764_v1, %v241_v60  ;;  %v310_v8 = vmax.f32 %v278_v63, 0.0  ;;  %v281_v10 = vadd.f32 %v764_v1, %v242_v3  ;;  %v244_v11 = vmul.f32 %v754_v0, %v205_v61 }
  0x2b   : > { %v311_v9 = vmax.f32 %v279_v2, 0.0  ;;  %699 = vst [vmem:[%s796_s26 + $0x58] sm:$0xff] %v667_v4   ;;  %v672_v12 = vpack.c.bf16 %v309_v5, %v308_v62  ;;  %v282_v14 = vadd.f32 %v764_v1, %v243_v7 }
  0x2c   : > { %v312_v13 = vmax.f32 %v280_v6, 0.0  ;;  %v313_v16 = vmax.f32 %v281_v10, 0.0  ;;  %v283_v17 = vadd.f32 %v764_v1, %v244_v11 }
  0x2d   : > { %v677_v15 = vpack.c.bf16 %v311_v9, %v310_v8  ;;  %700 = vst [vmem:[%s796_s26 + $0x60] sm:$0xff] %v672_v12   ;;  %v314_v18 = vmax.f32 %v282_v14, 0.0 }
  0x2e   : > { %v682_v19 = vpack.c.bf16 %v313_v16, %v312_v13  ;;  %v315_v20 = vmax.f32 %v283_v17, 0.0 }
  0x2f   : > { %701 = vst [vmem:[%s796_s26 + $0x68] sm:$0xff] %v677_v15  }
  0x30   : > { %702 = vst [vmem:[%s796_s26 + $0x70] sm:$0xff] %v682_v19   ;;  %v687_v21 = vpack.c.bf16 %v315_v20, %v314_v18 }
  0x32   : > { %703 = vst [vmem:[%s796_s26 + $0x78] sm:$0xff] %v687_v21  }
  0x33 PF: > { %s13_s12 = sadd.s32 1, %s718_s12  }
  0x34   : > { %p10_p4 = scmp.ge.s32.totalorder %s13_s12, 4  }
  0x36   :  { %12 = sbr.rel (!%p10_p4) target bundleno = 1 (0x1), region = 62 }

// kernel: preact_block_forward.7
= control target key start
LH: loop header
LB: loop body
LE: loop exit
PB: predicated region body
PF: predicated region fallthrough
CT: control target
= control target key end

     0   :  { %s682_s15 = smov 0   ;;  %s851_s0 = inlined_call_operand.vmem [shape: f32[512,128], index: 0, kind: input, shape index: {}]   ;;  %s852_s1 = inlined_call_operand.vmem [shape: f32[1,128], index: 1, kind: input, shape index: {}]   ;;  %s853_s2 = inlined_call_operand.vmem [shape: f32[1,128], index: 2, kind: input, shape index: {}]   ;;  %s854_s3 = inlined_call_operand.vmem [shape: f32[1,128], index: 3, kind: output, shape index: {0}]   ;;  %s855_s4 = inlined_call_operand.vmem [shape: f32[1,128], index: 4, kind: output, shape index: {1}]  }
   0x1 LB: > { %s688_s16 = sadd.s32 4294967295, %s654_s15   ;;  %p628_p0 = scmp.ge.s32.totalorder %s654_s15, 1  ;;  %s654_s15 = sphi %s682_s15, %s15_s15  }
   0x2   : > { %p156_p1 = scmp.lt.s32.totalorder %s654_s15, 3 }
   0x4   : > { %p157_p2 = pnand %p628_p0, %p156_p1 }
   0x5   : > { %s629_s17 = sshll.u32 (!%p157_p2), %s688_s16, 5  ;;  %p631_p4 = scmp.ne.s32.totalorder (!%p157_p2), %s688_s16, 0 }
   0x6   : > { %160 = sbr.rel (%p157_p2) target bundleno = 147 (0x93), region = 32  ;;  %p178_p3 = scmp.lt.s32.totalorder (!%p157_p2), %s629_s17, 63 }
   0xd   : > { %s857_s17 = smov (!%p178_p3, %s629_s17), 63  ;;  %186 = sbr.rel (%p631_p4) target bundleno = 20 (0x14), region = 36 }
   0xe   : > { %s630_s18 = sshll.u32 %s857_s17, 3  ;;  %v656_v1 = vmov (!%p631_p4), 0.0  }
   0xf   : > { %s696_s21 = scalar_lea.vmem %s851_s0, %s630_s18  ;;  %189 = vst [vmem:[#allocation2] sm:$0x1] (!%p631_p4), %v656_v1  ;;  %190 = vst [vmem:[#allocation3] sm:$0x1] (!%p631_p4), %v656_v1 }
  0x10   : > { %v187_v0 = vld [vmem:[%s696_s21] sm:$0x1] (!%p631_p4) }
  0x11   : > { %188 = vst [vmem:[#allocation4] sm:$0x1] (!%p631_p4), %v187_v0 }
  0x14 PF: > { %v224_v2 = vlaneseq  ;;  %s632_s22 = sshll.u32 %s688_s16, 8  ;;  %v191_v7 = vld [vmem:[%s696_s21] sm:$0xff]  ;;  %v192_v8 = vld [vmem:[%s696_s21 + $0x8] sm:$0xff]  ;;  %v193_v13 = vld [vmem:[%s696_s21 + $0x10] sm:$0xff]  ;;  %p634_p5 = scmp.ne.s32.totalorder %s688_s16, 1 }
  0x15   : > { %v704_v5 = vstv %s632_s22  ;;  %v194_v18 = vld [vmem:[%s696_s21 + $0x18] sm:$0xff]  ;;  %v195_v22 = vld [vmem:[%s696_s21 + $0x20] sm:$0xff]  ;;  %v196_v28 = vld [vmem:[%s696_s21 + $0x28] sm:$0xff] }
  0x16   : > { %v700_v3 = vshrl.u32 %v224_v2, 7  ;;  %v197_v34 = vld [vmem:[%s696_s21 + $0x30] sm:$0xff]  ;;  %v198_v40 = vld [vmem:[%s696_s21 + $0x38] sm:$0xff]  ;;  %v199_v48 = vld [vmem:[%s696_s21 + $0x40] sm:$0xff] }
  0x17   : > { %v200_v55 = vld [vmem:[%s696_s21 + $0x48] sm:$0xff]  ;;  %v201_v63 = vld [vmem:[%s696_s21 + $0x50] sm:$0xff] }
  0x18   : > { %v226_v4 = vadd.s32 8, %v700_v3  ;;  %v227_v6 = vadd.s32 16, %v700_v3  ;;  %v228_v9 = vadd.s32 24, %v700_v3  ;;  %v258_v10 = vadd.s32 %v704_v5, %v700_v3  ;;  %v713_v12 = vld [vmem:[#allocation4] ss:$0 sm:$0xff] }
  0x19   : > { %v229_v14 = vadd.s32 32, %v700_v3  ;;  %v329_v16 = vsub.f32 %v191_v7, %v713_v12  ;;  %v330_v17 = vsub.f32 %v192_v8, %v713_v12  ;;  %v230_v19 = vadd.s32 40, %v700_v3 }
  0x1a   : > { %v259_v11 = vadd.s32 %v704_v5, %v226_v4  ;;  %v260_v15 = vadd.s32 %v704_v5, %v227_v6  ;;  %v261_v20 = vadd.s32 %v704_v5, %v228_v9  ;;  %vm290_vm0 = vcmp.lt.s32.totalorder %v258_v10, 512  ;;  %v202_v9 = vld [vmem:[%s696_s21 + $0x58] sm:$0xff] }
  0x1b   : > { %v331_v21 = vsub.f32 %v193_v13, %v713_v12  ;;  %v231_v23 = vadd.s32 48, %v700_v3  ;;  %v262_v24 = vadd.s32 %v704_v5, %v229_v14  ;;  %v332_v25 = vsub.f32 %v194_v18, %v713_v12  ;;  %v203_v18 = vld [vmem:[%s696_s21 + $0x60] sm:$0xff] }
  0x1c   : > { %vm291_vm1 = vcmp.lt.s32.totalorder %v259_v11, 512  ;;  %vm292_vm2 = vcmp.lt.s32.totalorder %v260_v15, 512  ;;  %v425_v26 = vsel %vm290_vm0, %v329_v16, 0.0  ;;  %v232_v29 = vadd.s32 56, %v700_v3 }
  0x1d   : > { %v426_v27 = vsel %vm291_vm1, %v330_v17, 0.0  ;;  %v263_v30 = vadd.s32 %v704_v5, %v230_v19  ;;  %vm293_vm3 = vcmp.lt.s32.totalorder %v261_v20, 512  ;;  %v333_v32 = vsub.f32 %v195_v22, %v713_v12 }
  0x1e   : > { %v458_v31 = vadd.f32 %v426_v27, %v425_v26  ;;  %v427_v33 = vsel %vm292_vm2, %v331_v21, 0.0  ;;  %v233_v35 = vadd.s32 64, %v700_v3  ;;  %v264_v36 = vadd.s32 %v704_v5, %v231_v23 }
  0x1f   : > { %vm294_vm4 = vcmp.lt.s32.totalorder %v262_v24, 512  ;;  %v334_v38 = vsub.f32 %v196_v28, %v713_v12  ;;  %v428_v39 = vsel %vm293_vm3, %v332_v25, 0.0  ;;  %v234_v41 = vadd.s32 72, %v700_v3 }
  0x20   : > { %v459_v37 = vadd.f32 %v458_v31, %v427_v33  ;;  %v265_v42 = vadd.s32 %v704_v5, %v232_v29  ;;  %vm295_vm5 = vcmp.lt.s32.totalorder %v263_v30, 512  ;;  %v335_v44 = vsub.f32 %v197_v34, %v713_v12  ;;  %v205_v34 = vld [vmem:[%s696_s21 + $0x70] sm:$0xff] }
  0x21   : > { %v429_v45 = vsel %vm294_vm4, %v333_v32, 0.0  ;;  %v498_v46 = vmul.f32 %v425_v26, %v425_v26  ;;  %v499_v47 = vmul.f32 %v426_v27, %v426_v27  ;;  %v235_v49 = vadd.s32 80, %v700_v3  ;;  %v204_v26 = vld [vmem:[%s696_s21 + $0x68] sm:$0xff] }
  0x22   : > { %v460_v43 = vadd.f32 %v459_v37, %v428_v39  ;;  %v266_v50 = vadd.s32 %v704_v5, %v233_v35  ;;  %vm296_vm6 = vcmp.lt.s32.totalorder %v264_v36, 512  ;;  %v336_v52 = vsub.f32 %v198_v40, %v713_v12 }
  0x23   : > { %v430_v53 = vsel %vm295_vm5, %v334_v38, 0.0  ;;  %v500_v54 = vmul.f32 %v427_v33, %v427_v33  ;;  %v236_v56 = vadd.s32 88, %v700_v3  ;;  %v267_v57 = vadd.s32 %v704_v5, %v234_v41 }
  0x24   : > { %v461_v51 = vadd.f32 %v460_v43, %v429_v45  ;;  %vm297_vm7 = vcmp.lt.s32.totalorder %v265_v42, 512  ;;  %v337_v59 = vsub.f32 %v199_v48, %v713_v12  ;;  %v431_v60 = vsel %vm296_vm6, %v335_v44, 0.0  ;;  %v206_v42 = vld [vmem:[%s696_s21 + $0x78] sm:$0xff] }
  0x25   : > { %v501_v61 = vmul.f32 %v428_v39, %v428_v39  ;;  %v530_v62 = vadd.f32 %v499_v47, %v498_v46  ;;  %v237_v0 = vadd.s32 96, %v700_v3  ;;  %v268_v1 = vadd.s32 %v704_v5, %v235_v49 }
  0x26   : > { %v462_v58 = vadd.f32 %v461_v51, %v430_v53  ;;  %vm298_vm8 = vcmp.lt.s32.totalorder %v266_v50, 512  ;;  %v338_v4 = vsub.f32 %v200_v55, %v713_v12  ;;  %v432_v6 = vsel %vm297_vm7, %v336_v52, 0.0  ;;  %v207_v50 = vld [vmem:[%s696_s21 + $0x80] sm:$0xff] }
  0x27   : > { %v502_v7 = vmul.f32 %v429_v45, %v429_v45  ;;  %v531_v8 = vadd.f32 %v530_v62, %v500_v54  ;;  %v238_v10 = vadd.s32 104, %v700_v3  ;;  %v269_v11 = vadd.s32 %v704_v5, %v236_v56 }
  0x28   : > { %v463_v2 = vadd.f32 %v462_v58, %v431_v60  ;;  %vm299_vm9 = vcmp.lt.s32.totalorder %v267_v57, 512  ;;  %v339_v14 = vsub.f32 %v201_v63, %v713_v12  ;;  %v433_v15 = vsel %vm298_vm8, %v337_v59, 0.0  ;;  %v208_v58 = vld [vmem:[%s696_s21 + $0x88] sm:$0xff] }
  0x29   : > { %v503_v16 = vmul.f32 %v430_v53, %v430_v53  ;;  %v532_v17 = vadd.f32 %v531_v8, %v501_v61  ;;  %v239_v19 = vadd.s32 112, %v700_v3  ;;  %v270_v20 = vadd.s32 %v704_v5, %v237_v0 }
  0x2a   : > { %v464_v13 = vadd.f32 %v463_v2, %v432_v6  ;;  %vm300_vm10 = vcmp.lt.s32.totalorder %v268_v1, 512  ;;  %v340_v22 = vsub.f32 %v202_v9, %v713_v12  ;;  %v434_v23 = vsel %vm299_vm9, %v338_v4, 0.0  ;;  %v209_v2 = vld [vmem:[%s696_s21 + $0x90] sm:$0xff] }
  0x2b   : > { %v504_v24 = vmul.f32 %v431_v60, %v431_v60  ;;  %v533_v25 = vadd.f32 %v532_v17, %v502_v7  ;;  %v240_v27 = vadd.s32 120, %v700_v3  ;;  %v271_v28 = vadd.s32 %v704_v5, %v238_v10 }
  0x2c   : > { %v465_v21 = vadd.f32 %v464_v13, %v433_v15  ;;  %vm301_vm11 = vcmp.lt.s32.totalorder %v269_v11, 512  ;;  %v341_v30 = vsub.f32 %v203_v18, %v713_v12  ;;  %v435_v31 = vsel %vm300_vm10, %v339_v14, 0.0  ;;  %v210_v13 = vld [vmem:[%s696_s21 + $0x98] sm:$0xff] }
  0x2d   : > { %v505_v32 = vmul.f32 %v432_v6, %v432_v6  ;;  %v534_v33 = vadd.f32 %v533_v25, %v503_v16  ;;  %v241_v35 = vadd.s32 128, %v700_v3  ;;  %v272_v36 = vadd.s32 %v704_v5, %v239_v19 }
  0x2e   : > { %v466_v29 = vadd.f32 %v465_v21, %v434_v23  ;;  %vm302_vm12 = vcmp.lt.s32.totalorder %v270_v20, 512  ;;  %v342_v38 = vsub.f32 %v204_v26, %v713_v12  ;;  %v436_v39 = vsel %vm301_vm11, %v340_v22, 0.0  ;;  %v211_v21 = vld [vmem:[%s696_s21 + $0xa0] sm:$0xff] }
  0x2f   : > { %v506_v40 = vmul.f32 %v433_v15, %v433_v15  ;;  %v535_v41 = vadd.f32 %v534_v33, %v504_v24  ;;  %v242_v43 = vadd.s32 136, %v700_v3  ;;  %v273_v44 = vadd.s32 %v704_v5, %v240_v27 }
  0x30   : > { %v467_v37 = vadd.f32 %v466_v29, %v435_v31  ;;  %vm303_vm13 = vcmp.lt.s32.totalorder %v271_v28, 512  ;;  %v343_v46 = vsub.f32 %v205_v34, %v713_v12  ;;  %v437_v47 = vsel %vm302_vm12, %v341_v30, 0.0  ;;  %v212_v29 = vld [vmem:[%s696_s21 + $0xa8] sm:$0xff] }
  0x31   : > { %v507_v48 = vmul.f32 %v434_v23, %v434_v23  ;;  %v536_v49 = vadd.f32 %v535_v41, %v505_v32  ;;  %v243_v51 = vadd.s32 144, %v700_v3  ;;  %v274_v52 = vadd.s32 %v704_v5, %v241_v35 }
  0x32   : > { %v468_v45 = vadd.f32 %v467_v37, %v436_v39  ;;  %vm304_vm14 = vcmp.lt.s32.totalorder %v272_v36, 512  ;;  %v344_v54 = vsub.f32 %v206_v42, %v713_v12  ;;  %v438_v55 = vsel %vm303_vm13, %v342_v38, 0.0  ;;  %v213_v37 = vld [vmem:[%s696_s21 + $0xb0] sm:$0xff] }
  0x33   : > { %v508_v56 = vmul.f32 %v435_v31, %v435_v31  ;;  %v537_v57 = vadd.f32 %v536_v49, %v506_v40  ;;  %v244_v59 = vadd.s32 152, %v700_v3  ;;  %v275_v60 = vadd.s32 %v704_v5, %v242_v43 }
  0x34   : > { %v469_v53 = vadd.f32 %v468_v45, %v437_v47  ;;  %vm305_vm15 = vcmp.lt.s32.totalorder %v273_v44, 512  ;;  %v345_v62 = vsub.f32 %v207_v50, %v713_v12  ;;  %v439_v63 = vsel %vm304_vm14, %v343_v46, 0.0  ;;  %v214_v45 = vld [vmem:[%s696_s21 + $0xb8] sm:$0xff] }
  0x35   : > { %v509_v0 = vmul.f32 %v436_v39, %v436_v39  ;;  %v538_v1 = vadd.f32 %v537_v57, %v507_v48  ;;  %v245_v4 = vadd.s32 160, %v700_v3  ;;  %v276_v6 = vadd.s32 %v704_v5, %v243_v51 }
  0x36   : > { %v470_v61 = vadd.f32 %v469_v53, %v438_v55  ;;  %vm306_vm0 = vcmp.lt.s32.totalorder %v274_v52, 512  ;;  %v346_v8 = vsub.f32 %v208_v58, %v713_v12  ;;  %v440_v9 = vsel %vm305_vm15, %v344_v54, 0.0  ;;  %v215_v53 = vld [vmem:[%s696_s21 + $0xc0] sm:$0xff] }
  0x37   : > { %v510_v10 = vmul.f32 %v437_v47, %v437_v47  ;;  %v539_v11 = vadd.f32 %v538_v1, %v508_v56  ;;  %v246_v14 = vadd.s32 168, %v700_v3  ;;  %v277_v15 = vadd.s32 %v704_v5, %v244_v59 }
  0x38   : > { %v471_v7 = vadd.f32 %v470_v61, %v439_v63  ;;  %vm307_vm1 = vcmp.lt.s32.totalorder %v275_v60, 512  ;;  %v347_v17 = vsub.f32 %v209_v2, %v713_v12  ;;  %v441_v18 = vsel %vm306_vm0, %v345_v62, 0.0  ;;  %v216_v61 = vld [vmem:[%s696_s21 + $0xc8] sm:$0xff] }
  0x39   : > { %v511_v19 = vmul.f32 %v438_v55, %v438_v55  ;;  %v540_v20 = vadd.f32 %v539_v11, %v509_v0  ;;  %v247_v22 = vadd.s32 176, %v700_v3  ;;  %v278_v23 = vadd.s32 %v704_v5, %v245_v4 }
  0x3a   : > { %v472_v16 = vadd.f32 %v471_v7, %v440_v9  ;;  %vm308_vm2 = vcmp.lt.s32.totalorder %v276_v6, 512  ;;  %v348_v25 = vsub.f32 %v210_v13, %v713_v12  ;;  %v442_v26 = vsel %vm307_vm1, %v346_v8, 0.0  ;;  %v217_v7 = vld [vmem:[%s696_s21 + $0xd0] sm:$0xff] }
  0x3b   : > { %v512_v27 = vmul.f32 %v439_v63, %v439_v63  ;;  %v541_v28 = vadd.f32 %v540_v20, %v510_v10  ;;  %v248_v30 = vadd.s32 184, %v700_v3  ;;  %v279_v31 = vadd.s32 %v704_v5, %v246_v14 }
  0x3c   : > { %v473_v24 = vadd.f32 %v472_v16, %v441_v18  ;;  %vm309_vm3 = vcmp.lt.s32.totalorder %v277_v15, 512  ;;  %v349_v33 = vsub.f32 %v211_v21, %v713_v12  ;;  %v443_v34 = vsel %vm308_vm2, %v347_v17, 0.0  ;;  %v218_v16 = vld [vmem:[%s696_s21 + $0xd8] sm:$0xff] }
  0x3d   : > { %v513_v35 = vmul.f32 %v440_v9, %v440_v9  ;;  %v542_v36 = vadd.f32 %v541_v28, %v511_v19  ;;  %v249_v38 = vadd.s32 192, %v700_v3  ;;  %v280_v39 = vadd.s32 %v704_v5, %v247_v22 }
  0x3e   : > { %v474_v32 = vadd.f32 %v473_v24, %v442_v26  ;;  %vm310_vm4 = vcmp.lt.s32.totalorder %v278_v23, 512  ;;  %v350_v41 = vsub.f32 %v212_v29, %v713_v12  ;;  %v444_v42 = vsel %vm309_vm3, %v348_v25, 0.0  ;;  %v219_v24 = vld [vmem:[%s696_s21 + $0xe0] sm:$0xff] }
  0x3f   : > { %v514_v43 = vmul.f32 %v441_v18, %v441_v18  ;;  %v543_v44 = vadd.f32 %v542_v36, %v512_v27  ;;  %v250_v46 = vadd.s32 200, %v700_v3  ;;  %v281_v47 = vadd.s32 %v704_v5, %v248_v30 }
  0x40   : > { %v475_v40 = vadd.f32 %v474_v32, %v443_v34  ;;  %vm311_vm5 = vcmp.lt.s32.totalorder %v279_v31, 512  ;;  %v351_v49 = vsub.f32 %v213_v37, %v713_v12  ;;  %v445_v50 = vsel %vm310_vm4, %v349_v33, 0.0  ;;  %v220_v32 = vld [vmem:[%s696_s21 + $0xe8] sm:$0xff] }
  0x41   : > { %v515_v51 = vmul.f32 %v442_v26, %v442_v26  ;;  %v544_v52 = vadd.f32 %v543_v44, %v513_v35  ;;  %v251_v54 = vadd.s32 208, %v700_v3  ;;  %v282_v55 = vadd.s32 %v704_v5, %v249_v38 }
  0x42   : > { %v476_v48 = vadd.f32 %v475_v40, %v444_v42  ;;  %vm312_vm6 = vcmp.lt.s32.totalorder %v280_v39, 512  ;;  %v352_v57 = vsub.f32 %v214_v45, %v713_v12  ;;  %v446_v58 = vsel %vm311_vm5, %v350_v41, 0.0  ;;  %v221_v40 = vld [vmem:[%s696_s21 + $0xf0] sm:$0xff] }
  0x43   : > { %v516_v59 = vmul.f32 %v443_v34, %v443_v34  ;;  %v545_v60 = vadd.f32 %v544_v52, %v514_v43  ;;  %v252_v62 = vadd.s32 216, %v700_v3  ;;  %v283_v63 = vadd.s32 %v704_v5, %v250_v46  ;;  %v222_v46 = vld [vmem:[%s696_s21 + $0xf8] sm:$0xff] }
  0x44   : > { %v477_v56 = vadd.f32 %v476_v48, %v445_v50  ;;  %vm313_vm7 = vcmp.lt.s32.totalorder %v281_v47, 512  ;;  %v353_v1 = vsub.f32 %v215_v53, %v713_v12  ;;  %v447_v2 = vsel %vm312_vm6, %v351_v49, 0.0 }
  0x45   : > { %v517_v4 = vmul.f32 %v444_v42, %v444_v42  ;;  %v546_v6 = vadd.f32 %v545_v60, %v515_v51  ;;  %v253_v8 = vadd.s32 224, %v700_v3  ;;  %v284_v9 = vadd.s32 %v704_v5, %v251_v54 }
  0x46   : > { %v478_v0 = vadd.f32 %v477_v56, %v446_v58  ;;  %vm314_vm8 = vcmp.lt.s32.totalorder %v282_v55, 512  ;;  %v354_v11 = vsub.f32 %v216_v61, %v713_v12  ;;  %v448_v13 = vsel %vm313_vm7, %v352_v57, 0.0 }
  0x47   : > { %v518_v14 = vmul.f32 %v445_v50, %v445_v50  ;;  %v547_v15 = vadd.f32 %v546_v6, %v516_v59  ;;  %v254_v17 = vadd.s32 232, %v700_v3  ;;  %v285_v18 = vadd.s32 %v704_v5, %v252_v62 }
  0x48   : > { %v479_v10 = vadd.f32 %v478_v0, %v447_v2  ;;  %vm315_vm9 = vcmp.lt.s32.totalorder %v283_v63, 512  ;;  %v355_v20 = vsub.f32 %v217_v7, %v713_v12  ;;  %v449_v21 = vsel %vm314_vm8, %v353_v1, 0.0 }
  0x49   : > { %v519_v22 = vmul.f32 %v446_v58, %v446_v58  ;;  %v548_v23 = vadd.f32 %v547_v15, %v517_v4  ;;  %v255_v25 = vadd.s32 240, %v700_v3  ;;  %v286_v26 = vadd.s32 %v704_v5, %v253_v8 }
  0x4a   : > { %v480_v19 = vadd.f32 %v479_v10, %v448_v13  ;;  %vm316_vm10 = vcmp.lt.s32.totalorder %v284_v9, 512  ;;  %v356_v28 = vsub.f32 %v218_v16, %v713_v12  ;;  %v450_v29 = vsel %vm315_vm9, %v354_v11, 0.0 }
  0x4b   : > { %v520_v30 = vmul.f32 %v447_v2, %v447_v2  ;;  %v549_v31 = vadd.f32 %v548_v23, %v518_v14  ;;  %v256_v33 = vadd.s32 248, %v700_v3  ;;  %v287_v34 = vadd.s32 %v704_v5, %v254_v17  ;;  %v457_v17 = vld [vmem:[#allocation2] sm:$0x1] }
  0x4c   : > { %v481_v27 = vadd.f32 %v480_v19, %v449_v21  ;;  %vm317_vm11 = vcmp.lt.s32.totalorder %v285_v18, 512  ;;  %v357_v36 = vsub.f32 %v219_v24, %v713_v12  ;;  %v451_v37 = vsel %vm316_vm10, %v355_v20, 0.0 }
  0x4d   : > { %v521_v38 = vmul.f32 %v448_v13, %v448_v13  ;;  %v550_v39 = vadd.f32 %v549_v31, %v519_v22  ;;  %v288_v41 = vadd.s32 %v704_v5, %v255_v25  ;;  %vm318_vm12 = vcmp.lt.s32.totalorder %v286_v26, 512  ;;  %v497_v25 = vld [vmem:[#allocation3] sm:$0x1] }
  0x4e   : > { %v482_v35 = vadd.f32 %v481_v27, %v450_v29  ;;  %v358_v43 = vsub.f32 %v220_v32, %v713_v12  ;;  %v452_v44 = vsel %vm317_vm11, %v356_v28, 0.0  ;;  %v522_v45 = vmul.f32 %v449_v21, %v449_v21 }
  0x4f   : > { %v551_v3 = vadd.f32 %v550_v39, %v520_v30  ;;  %v289_v47 = vadd.s32 %v704_v5, %v256_v33  ;;  %vm319_vm13 = vcmp.lt.s32.totalorder %v287_v34, 512  ;;  %v359_v49 = vsub.f32 %v221_v40, %v713_v12 }
  0x50   : > { %v483_v42 = vadd.f32 %v482_v35, %v451_v37  ;;  %v453_v50 = vsel %vm318_vm12, %v357_v36, 0.0  ;;  %v523_v51 = vmul.f32 %v450_v29, %v450_v29  ;;  %vm320_vm14 = vcmp.lt.s32.totalorder %v288_v41, 512  ;;  %v584_v36 = vld [vmem:[#allocation4] sm:$0x1] (!%p634_p5)  ;;  %v587_v41 = vld [vmem:[%s853_s2] sm:$0x1] (!%p634_p5) }
  0x51   : > { %v552_v52 = vadd.f32 %v551_v3, %v521_v38  ;;  %v360_v54 = vsub.f32 %v222_v46, %v713_v12  ;;  %v454_v55 = vsel %vm319_vm13, %v358_v43, 0.0  ;;  %v524_v56 = vmul.f32 %v451_v37, %v451_v37  ;;  %v580_v37 = vld [vmem:[%s852_s1] sm:$0x1] (!%p634_p5) }
  0x52   : > { %v484_v48 = vadd.f32 %v483_v42, %v452_v44  ;;  %vm321_vm15 = vcmp.lt.s32.totalorder %v289_v47, 512  ;;  %v455_v59 = vsel %vm320_vm14, %v359_v49, 0.0  ;;  %v525_v60 = vmul.f32 %v452_v44, %v452_v44 }
  0x53   : > { %v553_v57 = vadd.f32 %v552_v52, %v522_v45  ;;  %v456_v62 = vsel %vm321_vm15, %v360_v54, 0.0  ;;  %v526_v63 = vmul.f32 %v453_v50, %v453_v50  ;;  %v527_v2 = vmul.f32 %v454_v55, %v454_v55 }
  0x54   : > { %v485_v53 = vadd.f32 %v484_v48, %v453_v50  ;;  %v528_v7 = vmul.f32 %v455_v59, %v455_v59  ;;  %v529_v12 = vmul.f32 %v456_v62, %v456_v62 }
  0x55   : > { %v554_v61 = vadd.f32 %v553_v57, %v523_v51 }
  0x56   : > { %v486_v58 = vadd.f32 %v485_v53, %v454_v55 }
  0x57   : > { %v555_v0 = vadd.f32 %v554_v61, %v524_v56 }
  0x58   : > { %v487_v5 = vadd.f32 %v486_v58, %v455_v59 }
  0x59   : > { %v556_v4 = vadd.f32 %v555_v0, %v525_v60 }
  0x5a   : > { %v488_v1 = vadd.f32 %v487_v5, %v456_v62 }
  0x5b   : > { %v557_v8 = vadd.f32 %v556_v4, %v526_v63 }
  0x5c   : > { %v489_v6 = vrot.slane %v488_v1, 4 }
  0x5d   : > { %v558_v10 = vadd.f32 %v557_v8, %v527_v2 }
  0x5e   : > { %v490_v9 = vadd.f32 %v489_v6, %v488_v1 }
  0x5f   : > { %v559_v13 = vadd.f32 %v558_v10, %v528_v7 }
  0x60   : > { %v491_v11 = vrot.slane %v490_v9, 2 }
  0x61   : > { %v560_v15 = vadd.f32 %v559_v13, %v529_v12 }
  0x62   : > { %v492_v14 = vadd.f32 %v491_v11, %v490_v9 }
  0x63   : > { %v561_v18 = vrot.slane %v560_v15, 4 }
  0x64   : > { %v493_v16 = vrot.slane %v492_v14, 1 }
  0x65   : > { %v562_v20 = vadd.f32 %v561_v18, %v560_v15 }
  0x66   : > { %v494_v19 = vadd.f32 %v493_v16, %v492_v14 }
  0x67   : > { %v563_v22 = vrot.slane %v562_v20, 2 }
  0x68   : > { %v495_v21 = vadd.f32 %v494_v19, %v457_v17 }
  0x69   : > { %v564_v23 = vadd.f32 %v563_v22, %v562_v20 }
  0x6a   : > { %496 = vst [vmem:[#allocation2] sm:$0x1] %v495_v21 }
  0x6b   : > { %v565_v24 = vrot.slane %v564_v23, 1  ;;  %572 = sbr.rel (%p634_p5) target bundleno = 147 (0x93), region = 40 }
  0x6d   : > { %v566_v26 = vadd.f32 %v565_v24, %v564_v23 }
  0x6f   : > { %v567_v27 = vadd.f32 %v566_v26, %v497_v25 }
  0x71   : > { %568 = vst [vmem:[#allocation3] sm:$0x1] %v567_v27  ;;  %v573_v28 = vld [vmem:[#allocation2] sm:$0x1] (!%p634_p5) }
  0x72   : > { %v574_v30 = vmul.f32 0.001953125, %v573_v28 }
  0x74   : > { %v577_v32 = vmul.f32 %v574_v30, %v574_v30  ;;  %v585_v38 = vadd.f32 %v584_v36, %v574_v30 }
  0x78   : > { %v575_v29 = vld [vmem:[#allocation3] sm:$0x1] }
  0x79   : > { %v576_v31 = vmul.f32 0.001953125, %v575_v29 }
  0x7b   : > { %v578_v33 = vsub.f32 %v576_v31, %v577_v32 }
  0x7d   : > { %v579_v34 = vmax.f32 %v578_v33, 0.0 }
  0x7f   : > { %v581_v35 = vadd.f32 1e-05, %v579_v34 }
  0x81   : > { %646 = vrsqrt.f32 %v581_v35 }
  0x8b   : > { %v647_v39 = vpop.eup %646 }
  0x8c   : > { %v583_v40 = vmul.f32 %v647_v39, %v580_v37 }
  0x8e   : > { %586 = vst [vmem:[%s854_s3] sm:$0x1] %v583_v40  ;;  %v588_v42 = vmul.f32 %v585_v38, %v583_v40 }
  0x90   : > { %v589_v43 = vsub.f32 %v587_v41, %v588_v42 }
  0x92   : > { %590 = vst [vmem:[%s855_s4] sm:$0x1] %v589_v43 }
  0x93 PF: > { %s15_s15 = sadd.s32 1, %s654_s15  }
  0x94   : > { %p12_p6 = scmp.ge.s32.totalorder %s15_s15, 4  }
  0x96   :  { %14 = sbr.rel (!%p12_p6) target bundleno = 1 (0x1), region = 74 }

// kernel: preact_block_forward.11
= control target key start
LH: loop header
LB: loop body
LE: loop exit
PB: predicated region body
PF: predicated region fallthrough
CT: control target
= control target key end

     0   :  { %v259_v1 = vmov 0.0   ;;  %s366_s0 = inlined_call_operand.vmem [shape: f32[128,128], index: 0, kind: input, shape index: {}]   ;;  %s367_s1 = inlined_call_operand.vmem [shape: f32[1,128], index: 1, kind: input, shape index: {}]   ;;  %s368_s2 = inlined_call_operand.vmem [shape: f32[1,128], index: 2, kind: input, shape index: {}]   ;;  %s369_s3 = inlined_call_operand.vmem [shape: f32[1,128], index: 3, kind: output, shape index: {0}]   ;;  %s370_s4 = inlined_call_operand.vmem [shape: f32[1,128], index: 4, kind: output, shape index: {1}]  }
   0x1   :  { %v20_v0 = vld [vmem:[%s366_s0] sm:$0x1]  ;;  %22 = vst [vmem:[#allocation2] sm:$0x1] %v259_v1  ;;  %23 = vst [vmem:[#allocation3] sm:$0x1] %v259_v1 }
   0x2   :  { %21 = vst [vmem:[#allocation4] sm:$0x1] %v20_v0  ;;  %v24_v2 = vld [vmem:[%s366_s0] sm:$0xff]  ;;  %v25_v3 = vld [vmem:[%s366_s0 + $0x8] sm:$0xff]  ;;  %v26_v7 = vld [vmem:[%s366_s0 + $0x10] sm:$0xff] }
   0x3   :  { %v27_v8 = vld [vmem:[%s366_s0 + $0x18] sm:$0xff]  ;;  %v28_v13 = vld [vmem:[%s366_s0 + $0x20] sm:$0xff]  ;;  %v29_v16 = vld [vmem:[%s366_s0 + $0x28] sm:$0xff] }
   0x4   :  { %v30_v21 = vld [vmem:[%s366_s0 + $0x30] sm:$0xff]  ;;  %v31_v26 = vld [vmem:[%s366_s0 + $0x38] sm:$0xff]  ;;  %v32_v31 = vld [vmem:[%s366_s0 + $0x40] sm:$0xff] }
   0x5   :  { %v33_v36 = vld [vmem:[%s366_s0 + $0x48] sm:$0xff]  ;;  %v34_v41 = vld [vmem:[%s366_s0 + $0x50] sm:$0xff]  ;;  %v35_v46 = vld [vmem:[%s366_s0 + $0x58] sm:$0xff] }
   0x6   :  { %v36_v51 = vld [vmem:[%s366_s0 + $0x60] sm:$0xff]  ;;  %v37_v56 = vld [vmem:[%s366_s0 + $0x68] sm:$0xff]  ;;  %v38_v61 = vld [vmem:[%s366_s0 + $0x70] sm:$0xff] }
   0x9   :  { %v294_v4 = vld [vmem:[#allocation4] ss:$0 sm:$0xff] }
   0xa   :  { %v98_v5 = vsub.f32 %v24_v2, %v294_v4  ;;  %v99_v6 = vsub.f32 %v25_v3, %v294_v4  ;;  %v100_v9 = vsub.f32 %v26_v7, %v294_v4  ;;  %v101_v14 = vsub.f32 %v27_v8, %v294_v4  ;;  %v39_v2 = vld [vmem:[%s366_s0 + $0x78] sm:$0xff] }
   0xb   :  { %v102_v17 = vsub.f32 %v28_v13, %v294_v4  ;;  %v103_v22 = vsub.f32 %v29_v16, %v294_v4  ;;  %v104_v27 = vsub.f32 %v30_v21, %v294_v4  ;;  %v105_v32 = vsub.f32 %v31_v26, %v294_v4  ;;  %v162_v26 = vld [vmem:[#allocation2] sm:$0x1] }
   0xc   :  { %v163_v10 = vadd.f32 %v99_v6, %v98_v5  ;;  %v187_v11 = vmul.f32 %v98_v5, %v98_v5  ;;  %v188_v12 = vmul.f32 %v99_v6, %v99_v6  ;;  %v189_v19 = vmul.f32 %v100_v9, %v100_v9 }
   0xd   :  { %v190_v24 = vmul.f32 %v101_v14, %v101_v14  ;;  %v191_v29 = vmul.f32 %v102_v17, %v102_v17  ;;  %v192_v34 = vmul.f32 %v103_v22, %v103_v22  ;;  %v106_v37 = vsub.f32 %v32_v31, %v294_v4 }
   0xe   :  { %v164_v15 = vadd.f32 %v163_v10, %v100_v9  ;;  %v203_v20 = vadd.f32 %v188_v12, %v187_v11  ;;  %v193_v39 = vmul.f32 %v104_v27, %v104_v27  ;;  %v107_v42 = vsub.f32 %v33_v36, %v294_v4 }
   0xf   :  { %v194_v44 = vmul.f32 %v105_v32, %v105_v32  ;;  %v108_v47 = vsub.f32 %v34_v41, %v294_v4  ;;  %v195_v49 = vmul.f32 %v106_v37, %v106_v37  ;;  %v109_v52 = vsub.f32 %v35_v46, %v294_v4  ;;  %v236_v41 = vld [vmem:[%s367_s1] sm:$0x1] }
  0x10   :  { %v165_v18 = vadd.f32 %v164_v15, %v101_v14  ;;  %v204_v25 = vadd.f32 %v203_v20, %v189_v19  ;;  %v196_v54 = vmul.f32 %v107_v42, %v107_v42  ;;  %v110_v57 = vsub.f32 %v36_v51, %v294_v4  ;;  %v243_v46 = vld [vmem:[%s368_s2] sm:$0x1] }
  0x11   :  { %v197_v59 = vmul.f32 %v108_v47, %v108_v47  ;;  %v111_v62 = vsub.f32 %v37_v56, %v294_v4  ;;  %v198_v0 = vmul.f32 %v109_v52, %v109_v52  ;;  %v112_v3 = vsub.f32 %v38_v61, %v294_v4 }
  0x12   :  { %v166_v23 = vadd.f32 %v165_v18, %v102_v17  ;;  %v205_v30 = vadd.f32 %v204_v25, %v190_v24  ;;  %v199_v6 = vmul.f32 %v110_v57, %v110_v57  ;;  %v113_v8 = vsub.f32 %v39_v2, %v294_v4 }
  0x13   :  { %v200_v10 = vmul.f32 %v111_v62, %v111_v62  ;;  %v201_v13 = vmul.f32 %v112_v3, %v112_v3 }
  0x14   :  { %v167_v28 = vadd.f32 %v166_v23, %v103_v22  ;;  %v206_v35 = vadd.f32 %v205_v30, %v191_v29  ;;  %v202_v16 = vmul.f32 %v113_v8, %v113_v8  ;;  %v186_v30 = vld [vmem:[#allocation3] sm:$0x1] }
  0x16   :  { %v168_v33 = vadd.f32 %v167_v28, %v104_v27  ;;  %v207_v40 = vadd.f32 %v206_v35, %v192_v34 }
  0x18   :  { %v169_v38 = vadd.f32 %v168_v33, %v105_v32  ;;  %v208_v45 = vadd.f32 %v207_v40, %v193_v39 }
  0x1a   :  { %v170_v43 = vadd.f32 %v169_v38, %v106_v37  ;;  %v209_v50 = vadd.f32 %v208_v45, %v194_v44 }
  0x1c   :  { %v171_v48 = vadd.f32 %v170_v43, %v107_v42  ;;  %v210_v55 = vadd.f32 %v209_v50, %v195_v49  ;;  %v240_v43 = vld [vmem:[#allocation4] sm:$0x1] }
  0x1e   :  { %v172_v53 = vadd.f32 %v171_v48, %v108_v47  ;;  %v211_v60 = vadd.f32 %v210_v55, %v196_v54 }
  0x20   :  { %v173_v58 = vadd.f32 %v172_v53, %v109_v52  ;;  %v212_v1 = vadd.f32 %v211_v60, %v197_v59 }
  0x22   :  { %v174_v63 = vadd.f32 %v173_v58, %v110_v57  ;;  %v213_v7 = vadd.f32 %v212_v1, %v198_v0 }
  0x24   :  { %v175_v5 = vadd.f32 %v174_v63, %v111_v62  ;;  %v214_v11 = vadd.f32 %v213_v7, %v199_v6 }
  0x26   :  { %v176_v9 = vadd.f32 %v175_v5, %v112_v3  ;;  %v215_v14 = vadd.f32 %v214_v11, %v200_v10 }
  0x28   :  { %v177_v12 = vadd.f32 %v176_v9, %v113_v8  ;;  %v216_v17 = vadd.f32 %v215_v14, %v201_v13 }
  0x2a   :  { %v178_v15 = vrot.slane %v177_v12, 4  ;;  %v217_v19 = vadd.f32 %v216_v17, %v202_v16 }
  0x2c   :  { %v179_v18 = vadd.f32 %v178_v15, %v177_v12  ;;  %v218_v21 = vrot.slane %v217_v19, 4 }
  0x2e   :  { %v180_v20 = vrot.slane %v179_v18, 2  ;;  %v219_v23 = vadd.f32 %v218_v21, %v217_v19 }
  0x30   :  { %v181_v22 = vadd.f32 %v180_v20, %v179_v18  ;;  %v220_v25 = vrot.slane %v219_v23, 2 }
  0x32   :  { %v182_v24 = vrot.slane %v181_v22, 1  ;;  %v221_v4 = vadd.f32 %v220_v25, %v219_v23 }
  0x34   :  { %v183_v27 = vadd.f32 %v182_v24, %v181_v22  ;;  %v222_v29 = vrot.slane %v221_v4, 1 }
  0x36   :  { %v184_v28 = vadd.f32 %v183_v27, %v162_v26  ;;  %v223_v31 = vadd.f32 %v222_v29, %v221_v4 }
  0x38   :  { %185 = vst [vmem:[#allocation2] sm:$0x1] %v184_v28  ;;  %v224_v32 = vadd.f32 %v223_v31, %v186_v30 }
  0x3a   :  { %225 = vst [vmem:[#allocation3] sm:$0x1] %v224_v32 }
  0x3f   :  { %v229_v33 = vld [vmem:[#allocation2] sm:$0x1] }
  0x40   :  { %v230_v34 = vmul.f32 0.0078125, %v229_v33 }
  0x41   :  { %v231_v36 = vld [vmem:[#allocation3] sm:$0x1] }
  0x42   :  { %v233_v35 = vmul.f32 %v230_v34, %v230_v34  ;;  %v232_v37 = vmul.f32 0.0078125, %v231_v36  ;;  %v241_v45 = vadd.f32 %v240_v43, %v230_v34 }
  0x44   :  { %v234_v38 = vsub.f32 %v232_v37, %v233_v35 }
  0x46   :  { %v235_v39 = vmax.f32 %v234_v38, 0.0 }
  0x48   :  { %v237_v40 = vadd.f32 1e-05, %v235_v39 }
  0x4a   :  { %257 = vrsqrt.f32 %v237_v40 }
  0x54   :  { %v258_v42 = vpop.eup %257 }
  0x55   :  { %v239_v44 = vmul.f32 %v258_v42, %v236_v41 }
  0x57   :  { %242 = vst [vmem:[%s369_s3] sm:$0x1] %v239_v44  ;;  %v244_v47 = vmul.f32 %v241_v45, %v239_v44 }
  0x59   :  { %v245_v48 = vsub.f32 %v243_v46, %v244_v47 }
  0x5b   :  { %246 = vst [vmem:[%s370_s4] sm:$0x1] %v245_v48 }

// kernel: preact_block_forward.12
= control target key start
LH: loop header
LB: loop body
LE: loop exit
PB: predicated region body
PF: predicated region fallthrough
CT: control target
= control target key end

     0   :  { %s391_s0 = inlined_call_operand.vmem [shape: f32[128,128], index: 0, kind: input, shape index: {}]   ;;  %s392_s1 = inlined_call_operand.vmem [shape: f32[1,128], index: 1, kind: input, shape index: {}]   ;;  %s393_s2 = inlined_call_operand.vmem [shape: f32[1,128], index: 2, kind: input, shape index: {}]   ;;  %s394_s3 = inlined_call_operand.vmem [shape: bf16[128,128], index: 3, kind: output, shape index: {}]  }
   0x1   :  { %v14_v0 = vld [vmem:[%s391_s0] sm:$0xff]  ;;  %v15_v1 = vld [vmem:[%s391_s0 + $0x8] sm:$0xff]  ;;  %v16_v6 = vld [vmem:[%s391_s0 + $0x10] sm:$0xff] }
   0x2   :  { %v286_v2 = vld [vmem:[%s392_s1] ss:$0 sm:$0xff]  ;;  %v17_v7 = vld [vmem:[%s391_s0 + $0x18] sm:$0xff]  ;;  %v19_v11 = vld [vmem:[%s391_s0 + $0x28] sm:$0xff] }
   0x3   :  { %v37_v3 = vmul.f32 %v286_v2, %v14_v0  ;;  %v38_v4 = vmul.f32 %v286_v2, %v15_v1  ;;  %v293_v5 = vld [vmem:[%s393_s2] ss:$0 sm:$0xff]  ;;  %v39_v8 = vmul.f32 %v286_v2, %v16_v6  ;;  %v40_v9 = vmul.f32 %v286_v2, %v17_v7  ;;  %v20_v12 = vld [vmem:[%s391_s0 + $0x30] sm:$0xff]  ;;  %v21_v17 = vld [vmem:[%s391_s0 + $0x38] sm:$0xff] }
   0x4   :  { %v18_v10 = vld [vmem:[%s391_s0 + $0x20] sm:$0xff]  ;;  %v42_v16 = vmul.f32 %v286_v2, %v19_v11  ;;  %v43_v20 = vmul.f32 %v286_v2, %v20_v12  ;;  %v44_v21 = vmul.f32 %v286_v2, %v21_v17  ;;  %v23_v27 = vld [vmem:[%s391_s0 + $0x48] sm:$0xff]  ;;  %v24_v32 = vld [vmem:[%s391_s0 + $0x50] sm:$0xff] }
   0x5   :  { %v60_v13 = vadd.f32 %v293_v5, %v37_v3  ;;  %v61_v14 = vadd.f32 %v293_v5, %v38_v4  ;;  %v41_v15 = vmul.f32 %v286_v2, %v18_v10  ;;  %v62_v18 = vadd.f32 %v293_v5, %v39_v8  ;;  %v22_v22 = vld [vmem:[%s391_s0 + $0x40] sm:$0xff]  ;;  %v25_v33 = vld [vmem:[%s391_s0 + $0x58] sm:$0xff]  ;;  %v27_v39 = vld [vmem:[%s391_s0 + $0x68] sm:$0xff] }
   0x6   :  { %v63_v19 = vadd.f32 %v293_v5, %v40_v9  ;;  %v65_v26 = vadd.f32 %v293_v5, %v42_v16  ;;  %v66_v30 = vadd.f32 %v293_v5, %v43_v20  ;;  %v67_v31 = vadd.f32 %v293_v5, %v44_v21  ;;  %v26_v38 = vld [vmem:[%s391_s0 + $0x60] sm:$0xff]  ;;  %v28_v44 = vld [vmem:[%s391_s0 + $0x70] sm:$0xff]  ;;  %v29_v49 = vld [vmem:[%s391_s0 + $0x78] sm:$0xff] }
   0x7   :  { %v76_v23 = vmax.f32 %v60_v13, 0.0  ;;  %v77_v24 = vmax.f32 %v61_v14, 0.0  ;;  %v64_v25 = vadd.f32 %v293_v5, %v41_v15  ;;  %v78_v28 = vmax.f32 %v62_v18, 0.0 }
   0x8   :  { %v79_v29 = vmax.f32 %v63_v19, 0.0  ;;  %v81_v36 = vmax.f32 %v65_v26, 0.0  ;;  %v45_v37 = vmul.f32 %v286_v2, %v22_v22  ;;  %v82_v41 = vmax.f32 %v66_v30, 0.0 }
   0x9   :  { %v213_v34 = vpack.c.bf16 %v77_v24, %v76_v23  ;;  %v80_v35 = vmax.f32 %v64_v25, 0.0  ;;  %v83_v42 = vmax.f32 %v67_v31, 0.0  ;;  %v46_v43 = vmul.f32 %v286_v2, %v23_v27 }
   0xa   :  { %v218_v40 = vpack.c.bf16 %v79_v29, %v78_v28  ;;  %v68_v46 = vadd.f32 %v293_v5, %v45_v37  ;;  %v47_v47 = vmul.f32 %v286_v2, %v24_v32  ;;  %v48_v48 = vmul.f32 %v286_v2, %v25_v33 }
   0xb   :  { %214 = vst [vmem:[%s394_s3] sm:$0xff] %v213_v34   ;;  %v223_v45 = vpack.c.bf16 %v81_v36, %v80_v35  ;;  %v228_v50 = vpack.c.bf16 %v83_v42, %v82_v41  ;;  %v69_v51 = vadd.f32 %v293_v5, %v46_v43  ;;  %v49_v52 = vmul.f32 %v286_v2, %v26_v38 }
   0xc   :  { %250 = vst [vmem:[%s394_s3 + $0x8] sm:$0xff] %v218_v40   ;;  %v50_v53 = vmul.f32 %v286_v2, %v27_v39  ;;  %v84_v54 = vmax.f32 %v68_v46, 0.0  ;;  %v70_v55 = vadd.f32 %v293_v5, %v47_v47  ;;  %v71_v56 = vadd.f32 %v293_v5, %v48_v48 }
   0xd   :  { %251 = vst [vmem:[%s394_s3 + $0x10] sm:$0xff] %v223_v45   ;;  %v51_v57 = vmul.f32 %v286_v2, %v28_v44  ;;  %252 = vst [vmem:[%s394_s3 + $0x18] sm:$0xff] %v228_v50   ;;  %v85_v58 = vmax.f32 %v69_v51, 0.0  ;;  %v72_v59 = vadd.f32 %v293_v5, %v49_v52  ;;  %v52_v61 = vmul.f32 %v286_v2, %v29_v49 }
   0xe   :  { %v73_v60 = vadd.f32 %v293_v5, %v50_v53  ;;  %v86_v62 = vmax.f32 %v70_v55, 0.0  ;;  %v87_v63 = vmax.f32 %v71_v56, 0.0 }
   0xf   :  { %v74_v0 = vadd.f32 %v293_v5, %v51_v57  ;;  %v233_v1 = vpack.c.bf16 %v85_v58, %v84_v54  ;;  %v88_v3 = vmax.f32 %v72_v59, 0.0  ;;  %v75_v6 = vadd.f32 %v293_v5, %v52_v61 }
  0x10   :  { %v89_v4 = vmax.f32 %v73_v60, 0.0  ;;  %v238_v7 = vpack.c.bf16 %v87_v63, %v86_v62 }
  0x11   :  { %v90_v8 = vmax.f32 %v74_v0, 0.0  ;;  %253 = vst [vmem:[%s394_s3 + $0x20] sm:$0xff] %v233_v1   ;;  %v91_v10 = vmax.f32 %v75_v6, 0.0 }
  0x12   :  { %v243_v9 = vpack.c.bf16 %v89_v4, %v88_v3  ;;  %254 = vst [vmem:[%s394_s3 + $0x28] sm:$0xff] %v238_v7  }
  0x13   :  { %v248_v2 = vpack.c.bf16 %v91_v10, %v90_v8 }
  0x14   :  { %255 = vst [vmem:[%s394_s3 + $0x30] sm:$0xff] %v243_v9  }
  0x15   :  { %256 = vst [vmem:[%s394_s3 + $0x38] sm:$0xff] %v248_v2  }

// kernel: preact_block_forward.10
= control target key start
LH: loop header
LB: loop body
LE: loop exit
PB: predicated region body
PF: predicated region fallthrough
CT: control target
= control target key end

     0   :  { %s1417_s9 = smov 0   ;;  %s1419_s10 = smov 0   ;;  %s1652_s0 = inlined_call_operand.vmem [shape: bf16[128,1152], index: 0, kind: input, shape index: {}]   ;;  %s1653_s1 = inlined_call_operand.vmem [shape: bf16[1152,128], index: 1, kind: input, shape index: {}]   ;;  %s1654_s2 = inlined_call_operand.vmem [shape: f32[128,128], index: 2, kind: output, shape index: {}]  }
   0x1   :  { %s1421_s11 = smov 0   ;;  %s1423_s12 = smov 0  }
   0x2   :  { %s1425_s13 = smov 0  }
   0x3 LB: > { %s24_s14 = sadd.s32 1, %s1395_s12  ;;  %p47_p1 = scmp.ne.s32.totalorder %s1387_s10, %s1383_s9  ;;  %s1399_s13 = sphi %s1425_s13, %s12_s13   ;;  %s1395_s12 = sphi %s1423_s12, %s1658_s12   ;;  %s1391_s11 = sphi %s1421_s11, %s1657_s11   ;;  %s1387_s10 = sphi %s1419_s10, %s1656_s10   ;;  %s1383_s9 = sphi %s1417_s9, %s1655_s9  }
   0x4   : > { %p25_p0 = scmp.ge.s32.totalorder %s24_s14, 3  ;;  %p48_p2 = scmp.eq.s32.totalorder %s1399_s13, 0 }
   0x5   : > { %s40_s16 = sadd.s32 1, %s1387_s10  ;;  %p1059_p5 = scmp.ge.s32.totalorder %s1399_s13, 3 }
   0x6   : > { %s1660_s14 = smov (%p25_p0, %s24_s14), 0  ;;  %p49_p3 = por %p48_p2, %p47_p1 }
   0x7   : > { %s36_s15 = ssub.s32 %s1395_s12, %s1660_s14  ;;  %129 = sbr.rel (%p1059_p5) target bundleno = 37 (0x25), region = 16 }
   0x8   : > { %p38_p4 = scmp.eq.s32.totalorder %s36_s15, 0 }
   0xa   : > { %s1452_s17 = scalar_select %p38_p4, %s1387_s10, %s40_s16  }
   0xe   : > { %132 = sbr.rel (!%p49_p3) target bundleno = 37 (0x25), region = 20  ;;  %s134_s18 = sand.u32 (%p49_p3), 1, %s1387_s10  }
   0xf   : > { %s1149_s19 = smul.u32 (%p49_p3), 12, %s1395_s12 }
  0x10   : > { %s1262_s20 = smul.u32 (%p49_p3), 192, %s134_s18 }
  0x11   : > { %s1460_s23 = scalar_lea.vmem (%p49_p3), %s1652_s0, %s1149_s19 }
  0x12   : > { %v157_v0 = vld [vmem:[%s1460_s23] sm:$0xff] (%p49_p3)  ;;  %v161_v2 = vld [vmem:[%s1460_s23 + $0x48] sm:$0xff] (%p49_p3)  ;;  %s1465_s24 = scalar_lea.vmem (%p49_p3), [#allocation3], %s1262_s20  ;;  %v165_v4 = vld [vmem:[%s1460_s23 + $0x90] sm:$0xff] (%p49_p3) }
  0x13   : > { %v159_v1 = vld [vmem:[%s1460_s23 + $0x24] sm:$0xff] (%p49_p3)  ;;  %158 = vst [vmem:[%s1465_s24] sm:$0xff] (%p49_p3), %v157_v0  ;;  %162 = vst [vmem:[%s1465_s24 + $0x18] sm:$0xff] (%p49_p3), %v161_v2  ;;  %v163_v3 = vld [vmem:[%s1460_s23 + $0x6c] sm:$0xff] (%p49_p3) }
  0x14   : > { %160 = vst [vmem:[%s1465_s24 + $0xc] sm:$0xff] (%p49_p3), %v159_v1  ;;  %v167_v5 = vld [vmem:[%s1460_s23 + $0xb4] sm:$0xff] (%p49_p3)  ;;  %164 = vst [vmem:[%s1465_s24 + $0x24] sm:$0xff] (%p49_p3), %v163_v3  ;;  %v171_v7 = vld [vmem:[%s1460_s23 + $0xfc] sm:$0xff] (%p49_p3) }
  0x15   : > { %166 = vst [vmem:[%s1465_s24 + $0x30] sm:$0xff] %v165_v4  ;;  %168 = vst [vmem:[%s1465_s24 + $0x3c] sm:$0xff] %v167_v5  ;;  %v169_v6 = vld [vmem:[%s1460_s23 + $0xd8] sm:$0xff]  ;;  %v173_v8 = vld [vmem:[%s1460_s23 + $0x120] sm:$0xff] }
  0x16   : > { %170 = vst [vmem:[%s1465_s24 + $0x48] sm:$0xff] %v169_v6  ;;  %172 = vst [vmem:[%s1465_s24 + $0x54] sm:$0xff] %v171_v7  ;;  %v175_v9 = vld [vmem:[%s1460_s23 + $0x144] sm:$0xff]  ;;  %v179_v11 = vld [vmem:[%s1460_s23 + $0x18c] sm:$0xff] }
  0x17   : > { %174 = vst [vmem:[%s1465_s24 + $0x60] sm:$0xff] %v173_v8  ;;  %v177_v10 = vld [vmem:[%s1460_s23 + $0x168] sm:$0xff]  ;;  %176 = vst [vmem:[%s1465_s24 + $0x6c] sm:$0xff] %v175_v9  ;;  %v181_v12 = vld [vmem:[%s1460_s23 + $0x1b0] sm:$0xff] }
  0x18   : > { %178 = vst [vmem:[%s1465_s24 + $0x78] sm:$0xff] %v177_v10  ;;  %180 = vst [vmem:[%s1465_s24 + $0x84] sm:$0xff] %v179_v11  ;;  %v183_v13 = vld [vmem:[%s1460_s23 + $0x1d4] sm:$0xff]  ;;  %v187_v15 = vld [vmem:[%s1460_s23 + $0x21c] sm:$0xff] }
  0x19   : > { %v185_v14 = vld [vmem:[%s1460_s23 + $0x1f8] sm:$0xff]  ;;  %182 = vst [vmem:[%s1465_s24 + $0x90] sm:$0xff] %v181_v12  ;;  %184 = vst [vmem:[%s1465_s24 + $0x9c] sm:$0xff] %v183_v13  ;;  %v1061_v16 = vld [vmem:[%s1460_s23 + $0x8] sm:$0xf] }
  0x1a   : > { %186 = vst [vmem:[%s1465_s24 + $0xa8] sm:$0xff] %v185_v14  ;;  %v1063_v17 = vld [vmem:[%s1460_s23 + $0x2c] sm:$0xf]  ;;  %188 = vst [vmem:[%s1465_s24 + $0xb4] sm:$0xff] %v187_v15  ;;  %v1065_v18 = vld [vmem:[%s1460_s23 + $0x50] sm:$0xf] }
  0x1b   : > { %1062 = vst [vmem:[%s1465_s24 + $0x8] sm:$0xf] %v1061_v16  ;;  %1064 = vst [vmem:[%s1465_s24 + $0x14] sm:$0xf] %v1063_v17  ;;  %v1067_v19 = vld [vmem:[%s1460_s23 + $0x74] sm:$0xf] }
  0x1c   : > { %v1069_v20 = vld [vmem:[%s1460_s23 + $0x98] sm:$0xf]  ;;  %1066 = vst [vmem:[%s1465_s24 + $0x20] sm:$0xf] %v1065_v18  ;;  %1068 = vst [vmem:[%s1465_s24 + $0x2c] sm:$0xf] %v1067_v19 }
  0x1d   : > { %1070 = vst [vmem:[%s1465_s24 + $0x38] sm:$0xf] %v1069_v20  ;;  %v1071_v21 = vld [vmem:[%s1460_s23 + $0xbc] sm:$0xf]  ;;  %v1073_v22 = vld [vmem:[%s1460_s23 + $0xe0] sm:$0xf] }
  0x1e   : > { %v1075_v23 = vld [vmem:[%s1460_s23 + $0x104] sm:$0xf]  ;;  %1072 = vst [vmem:[%s1465_s24 + $0x44] sm:$0xf] %v1071_v21  ;;  %1074 = vst [vmem:[%s1465_s24 + $0x50] sm:$0xf] %v1073_v22 }
  0x1f   : > { %1076 = vst [vmem:[%s1465_s24 + $0x5c] sm:$0xf] %v1075_v23  ;;  %v1077_v24 = vld [vmem:[%s1460_s23 + $0x128] sm:$0xf]  ;;  %v1079_v25 = vld [vmem:[%s1460_s23 + $0x14c] sm:$0xf] }
  0x20   : > { %v1081_v26 = vld [vmem:[%s1460_s23 + $0x170] sm:$0xf]  ;;  %1078 = vst [vmem:[%s1465_s24 + $0x68] sm:$0xf] %v1077_v24  ;;  %1080 = vst [vmem:[%s1465_s24 + $0x74] sm:$0xf] %v1079_v25 }
  0x21   : > { %1082 = vst [vmem:[%s1465_s24 + $0x80] sm:$0xf] %v1081_v26  ;;  %v1083_v27 = vld [vmem:[%s1460_s23 + $0x194] sm:$0xf]  ;;  %v1085_v28 = vld [vmem:[%s1460_s23 + $0x1b8] sm:$0xf] }
  0x22   : > { %v1087_v29 = vld [vmem:[%s1460_s23 + $0x1dc] sm:$0xf]  ;;  %1084 = vst [vmem:[%s1465_s24 + $0x8c] sm:$0xf] %v1083_v27  ;;  %1086 = vst [vmem:[%s1465_s24 + $0x98] sm:$0xf] %v1085_v28 }
  0x23   : > { %1088 = vst [vmem:[%s1465_s24 + $0xa4] sm:$0xf] %v1087_v29  ;;  %v1089_v30 = vld [vmem:[%s1460_s23 + $0x200] sm:$0xf]  ;;  %v1091_v31 = vld [vmem:[%s1460_s23 + $0x224] sm:$0xf] }
  0x24   : > { %1090 = vst [vmem:[%s1465_s24 + $0xb0] sm:$0xf] %v1089_v30  ;;  %1092 = vst [vmem:[%s1465_s24 + $0xbc] sm:$0xf] %v1091_v31 }
  0x25 PF: > { %p1093_p6 = scmp.ge.s32.totalorder %s1399_s13, 1  ;;  %p244_p7 = scmp.lt.s32.totalorder %s1399_s13, 4 }
  0x27   : > { %p245_p8 = pnand %p1093_p6, %p244_p7 }
  0x28   : > { %s251_s25 = sand.u32 (!%p245_p8), 1, %s1383_s9   ;;  %s285_s26 = smul.u32 (!%p245_p8), 48, %s1391_s11 }
  0x29   : > { %248 = sbr.rel (%p245_p8) target bundleno = 377 (0x179), region = 50  ;;  %p1095_p10 = scmp.ne.s32.totalorder (!%p245_p8), %s1391_s11, 0 }
  0x2a   : > { %s1263_s27 = smul.u32 (!%p245_p8), 192, %s251_s25  ;;  %p286_p9 = scmp.lt.s32.totalorder (!%p245_p8), %s285_s26, 143 }
  0x2c   : > { %s1537_s4 = scalar_lea.vmem (!%p245_p8), [#allocation3], %s1263_s27 }
  0x30   : > { %s1662_s26 = smov (!%p286_p9, %s285_s26), 143  ;;  %307 = sbr.rel (%p1095_p10) target bundleno = 58 (0x3a), region = 58 }
  0x31   : > { %s1094_s28 = sshll.u32 %s1662_s26, 2  ;;  %v1401_v32 = vmov (!%p1095_p10), 0.0  }
  0x32   : > { %s1535_s3 = scalar_lea.vmem %s1653_s1, %s1094_s28  ;;  %308 = vst [vmem:[#allocation2] sm:$0xff] (!%p1095_p10), %v1401_v32  ;;  %309 = vst [vmem:[#allocation2 + $0x8] sm:$0xff] (!%p1095_p10), %v1401_v32 }
  0x33   : > { %310 = vst [vmem:[#allocation2 + $0x10] sm:$0xff] (!%p1095_p10), %v1401_v32  ;;  %311 = vst [vmem:[#allocation2 + $0x18] sm:$0xff] (!%p1095_p10), %v1401_v32 }
  0x34   : > { %312 = vst [vmem:[#allocation2 + $0x20] sm:$0xff] (!%p1095_p10), %v1401_v32  ;;  %313 = vst [vmem:[#allocation2 + $0x28] sm:$0xff] (!%p1095_p10), %v1401_v32 }
  0x35   : > { %314 = vst [vmem:[#allocation2 + $0x30] sm:$0xff] (!%p1095_p10), %v1401_v32  ;;  %315 = vst [vmem:[#allocation2 + $0x38] sm:$0xff] (!%p1095_p10), %v1401_v32 }
  0x36   : > { %316 = vst [vmem:[#allocation2 + $0x40] sm:$0xff] (!%p1095_p10), %v1401_v32  ;;  %317 = vst [vmem:[#allocation2 + $0x48] sm:$0xff] (!%p1095_p10), %v1401_v32 }
  0x37   : > { %318 = vst [vmem:[#allocation2 + $0x50] sm:$0xff] %v1401_v32  ;;  %319 = vst [vmem:[#allocation2 + $0x58] sm:$0xff] %v1401_v32 }
  0x38   : > { %320 = vst [vmem:[#allocation2 + $0x60] sm:$0xff] %v1401_v32  ;;  %321 = vst [vmem:[#allocation2 + $0x68] sm:$0xff] %v1401_v32 }
  0x39   : > { %322 = vst [vmem:[#allocation2 + $0x70] sm:$0xff] %v1401_v32  ;;  %323 = vst [vmem:[#allocation2 + $0x78] sm:$0xff] %v1401_v32 }
  0x3a PF: > { %v1305_v33 = vld [vmem:[%s1535_s3 + $0x40] sm:$0xff]   ;;  %v1308_v36 = vld [vmem:[%s1535_s3 + $0x48] sm:$0xff]   ;;  %v1311_v39 = vld [vmem:[%s1535_s3 + $0x50] sm:$0xff]   ;;  %p1144_p11 = scmp.ne.s32.totalorder %s1391_s11, 2 }
  0x3b   : > { %v1306_v34 = vld [vmem:[%s1535_s3] sm:$0xff]   ;;  %1150 = vmatprep.subr.bf16.mxu0 %v1305_v33  ;;  %v1309_v37 = vld [vmem:[%s1535_s3 + $0x8] sm:$0xff]   ;;  %v1312_v40 = vld [vmem:[%s1535_s3 + $0x10] sm:$0xff]  }
  0x3c   : > { %v1307_v35 = vld [vmem:[%s1535_s3 + $0x80] sm:$0xff]   ;;  %1151 = vmatpush3.bf16.msra.mxu0 %v1306_v34  ;;  %v1310_v38 = vld [vmem:[%s1535_s3 + $0x88] sm:$0xff]   ;;  %v1313_v41 = vld [vmem:[%s1535_s3 + $0x90] sm:$0xff]  }
  0x3d   : > { %1230 = vmatprep.subr.bf16.mxu1 %v1307_v35  ;;  %1152 = vmatprep.subr.bf16.mxu0 %v1308_v36  ;;  %v1314_v42 = vld [vmem:[%s1535_s3 + $0x58] sm:$0xff]   ;;  %v1317_v45 = vld [vmem:[%s1535_s3 + $0x60] sm:$0xff]   ;;  %v1320_v48 = vld [vmem:[%s1535_s3 + $0x68] sm:$0xff]  }
  0x3e   : > { %1231 = vmatpush3.bf16.msra.mxu1 %v1307_v35  ;;  %v1315_v43 = vld [vmem:[%s1535_s3 + $0x18] sm:$0xff]   ;;  %v1319_v46 = vld [vmem:[%s1535_s3 + $0xa0] sm:$0xff]   ;;  %v1322_v49 = vld [vmem:[%s1535_s3 + $0xa8] sm:$0xff]  }
  0x3f   : > { %1232 = vmatprep.subr.bf16.mxu1 %v1310_v38  ;;  %v1316_v44 = vld [vmem:[%s1535_s3 + $0x98] sm:$0xff]   ;;  %v1318_v47 = vld [vmem:[%s1535_s3 + $0x20] sm:$0xff]   ;;  %v1321_v50 = vld [vmem:[%s1535_s3 + $0x28] sm:$0xff]  }
  0x40   : > { %1153 = vmatpush3.bf16.msra.mxu0 %v1309_v37  ;;  %v1323_v51 = vld [vmem:[%s1535_s3 + $0x70] sm:$0xff]   ;;  %v1326_v54 = vld [vmem:[%s1535_s3 + $0x78] sm:$0xff]   ;;  %v1329_v59 = vld [vmem:[%s1537_s4] ss:$12 sps:$4 sm:$0xff]  }
  0x41   : > { %1154 = vmatprep.subr.bf16.mxu0 %v1311_v39  ;;  %v1324_v52 = vld [vmem:[%s1535_s3 + $0x30] sm:$0xff]   ;;  %v1328_v55 = vld [vmem:[%s1535_s3 + $0xb8] sm:$0xff]   ;;  %v1333_v61 = vld [vmem:[%s1537_s4 + $0x20] ss:$12 sps:$4 sm:$0xff]  }
  0x42   : > { %1233 = vmatpush3.bf16.msra.mxu1 %v1310_v38  ;;  %v1325_v53 = vld [vmem:[%s1535_s3 + $0xb0] sm:$0xff]   ;;  %v1327_v58 = vld [vmem:[%s1535_s3 + $0x38] sm:$0xff]   ;;  %v1349_v5 = vld [vmem:[%s1537_s4 + $0x80] ss:$12 sps:$4 sm:$0xff]  }
  0x43   : > { %1234 = vmatprep.subr.bf16.mxu1 %v1313_v41  ;;  %v1331_v56 = vld [vmem:[%s1537_s4 + $0x4] ss:$12 sps:$4 sm:$0xff]   ;;  %v1332_v57 = vld [vmem:[%s1537_s4 + $0x8] ss:$12 sps:$4 sm:$0xff]   ;;  %v1342_v4 = vld [vmem:[%s1537_s4 + $0x4c] ss:$12 sps:$4 sm:$0xff]  }
  0x44   : > { %1155 = vmatpush3.bf16.msra.mxu0 %v1312_v40  ;;  %724 = vmatprep.mubr.bf16.mxu0 %v1331_v56  ;;  %v1334_v60 = vld [vmem:[%s1537_s4 + $0x1c] ss:$12 sps:$4 sm:$0xff]   ;;  %v1340_v62 = vld [vmem:[%s1537_s4 + $0x38] ss:$12 sps:$4 sm:$0xff]   ;;  %v1337_v0 = vld [vmem:[%s1537_s4 + $0x34] ss:$12 sps:$4 sm:$0xff]  }
  0x45   : > { %1156 = vmatprep.subr.bf16.mxu0 %v1314_v42  ;;  %1246 = vmatprep.mubr.bf16.mxu1 %v1332_v57  ;;  %v1336_v63 = vld [vmem:[%s1537_s4 + $0x18] ss:$12 sps:$4 sm:$0xff]   ;;  %v1341_v1 = vld [vmem:[%s1537_s4 + $0x50] ss:$12 sps:$4 sm:$0xff]   ;;  %v1348_v2 = vld [vmem:[%s1537_s4 + $0x68] ss:$12 sps:$4 sm:$0xff]  }
  0x46   : > { %1235 = vmatpush3.bf16.msra.mxu1 %v1313_v41  ;;  %v1339_v3 = vld [vmem:[%s1537_s4 + $0x30] ss:$12 sps:$4 sm:$0xff]   ;;  %v1356_v6 = vld [vmem:[%s1537_s4 + $0x98] ss:$12 sps:$4 sm:$0xff]   ;;  %v1344_v7 = vld [vmem:[%s1537_s4 + $0x48] ss:$12 sps:$4 sm:$0xff]  }
  0x47   : > { %1236 = vmatprep.subr.bf16.mxu1 %v1316_v44  ;;  %v1345_v8 = vld [vmem:[%s1537_s4 + $0x64] ss:$12 sps:$4 sm:$0xff]   ;;  %v1347_v10 = vld [vmem:[%s1537_s4 + $0x60] ss:$12 sps:$4 sm:$0xff]   ;;  %v1350_v11 = vld [vmem:[%s1537_s4 + $0x7c] ss:$12 sps:$4 sm:$0xff]  }
  0x48   : > { %1157 = vmatpush3.bf16.msra.mxu0 %v1315_v43  ;;  %v1357_v9 = vld [vmem:[%s1537_s4 + $0xb0] ss:$12 sps:$4 sm:$0xff]   ;;  %v1352_v12 = vld [vmem:[%s1537_s4 + $0x78] ss:$12 sps:$4 sm:$0xff]   ;;  %v1353_v13 = vld [vmem:[%s1537_s4 + $0x94] ss:$12 sps:$4 sm:$0xff]  }
  0x49   : > { %1158 = vmatprep.subr.bf16.mxu0 %v1317_v45  ;;  %v1355_v14 = vld [vmem:[%s1537_s4 + $0x90] ss:$12 sps:$4 sm:$0xff]   ;;  %v1358_v15 = vld [vmem:[%s1537_s4 + $0xac] ss:$12 sps:$4 sm:$0xff]   ;;  %v1360_v16 = vld [vmem:[%s1537_s4 + $0xa8] ss:$12 sps:$4 sm:$0xff]  }
  0x4a   : > { %1237 = vmatpush3.bf16.msra.mxu1 %v1316_v44  ;;  %v324_v23 = vld [vmem:[#allocation2] sm:$0xff]  ;;  %v325_v28 = vld [vmem:[#allocation2 + $0x8] sm:$0xff]  ;;  %v326_v38 = vld [vmem:[#allocation2 + $0x10] sm:$0xff] }
  0x4b   : > { %1238 = vmatprep.subr.bf16.mxu1 %v1319_v46  ;;  %v327_v44 = vld [vmem:[#allocation2 + $0x18] sm:$0xff] }
  0x4c   : > { %1159 = vmatpush3.bf16.msra.mxu0 %v1318_v47 }
  0x4d   : > { %1160 = vmatprep.subr.bf16.mxu0 %v1320_v48 }
  0x4e   : > { %1239 = vmatpush3.bf16.msra.mxu1 %v1319_v46 }
  0x4f   : > { %1240 = vmatprep.subr.bf16.mxu1 %v1322_v49 }
  0x50   : > { %1161 = vmatpush3.bf16.msra.mxu0 %v1321_v50 }
  0x51   : > { %1162 = vmatprep.subr.bf16.mxu0 %v1323_v51 }
  0x52   : > { %1241 = vmatpush3.bf16.msra.mxu1 %v1322_v49 }
  0x53   : > { %1242 = vmatprep.subr.bf16.mxu1 %v1325_v53 }
  0x54   : > { %1163 = vmatpush3.bf16.msra.mxu0 %v1324_v52 }
  0x55   : > { %1164 = vmatprep.subr.bf16.mxu0 %v1326_v54 }
  0x56   : > { %1243 = vmatpush3.bf16.msra.mxu1 %v1325_v53 }
  0x57   : > { %1244 = vmatprep.subr.bf16.mxu1 %v1328_v55 }
  0x58   : > { %1165 = vmatpush3.bf16.msra.mxu0 %v1327_v58 }
  0x5a   : > { %1245 = vmatpush3.bf16.msra.mxu1 %v1328_v55  ;;  %v328_v55 = vld [vmem:[#allocation2 + $0x20] sm:$0xff] }
  0x5b   : > { %725 = vmatmul.mubr.bf16.vlgmr.msra.gmra.mrb[0].mxu0 %v1329_v59 }
  0x5c   : > { %732 = vmatprep.mubr.bf16.mxu0 %v1334_v60  ;;  %v329_v60 = vld [vmem:[#allocation2 + $0x28] sm:$0xff] }
  0x5d   : > { %1247 = vmatmul.mubr.bf16.vlgmr.msra.gmra.mrb[0].mxu1 %v1333_v61 }
  0x5e   : > { %1250 = vmatprep.mubr.bf16.mxu1 %v1340_v62 }
  0x63   : > { %733 = vmatmul.mubr.bf16.gmra.mrb[4].mxu0 %v1336_v63 }
  0x64   : > { %740 = vmatprep.mubr.bf16.mxu0 %v1337_v0 }
  0x65   : > { %1251 = vmatmul.mubr.bf16.gmra.mrb[4].mxu1 %v1341_v1 }
  0x66   : > { %1254 = vmatprep.mubr.bf16.mxu1 %v1348_v2 }
  0x6b   : > { %741 = vmatmul.mubr.bf16.gmra.mrb[8].mxu0 %v1339_v3 }
  0x6c   : > { %748 = vmatprep.mubr.bf16.mxu0 %v1342_v4 }
  0x6d   : > { %1255 = vmatmul.mubr.bf16.gmra.mrb[8].mxu1 %v1349_v5 }
  0x6e   : > { %1258 = vmatprep.mubr.bf16.mxu1 %v1356_v6  ;;  %v330_v6 = vld [vmem:[#allocation2 + $0x30] sm:$0xff] }
  0x73   : > { %749 = vmatmul.mubr.bf16.gmra.mrb[12].mxu0 %v1344_v7 }
  0x74   : > { %756 = vmatprep.mubr.bf16.mxu0 %v1345_v8 }
  0x75   : > { %1259 = vmatmul.mubr.bf16.gmra.mrb[12].mxu1 %v1357_v9 }
  0x7b   : > { %757 = vmatmul.mubr.bf16.gmra.mrb[16].mxu0 %v1347_v10 }
  0x7c   : > { %764 = vmatprep.mubr.bf16.mxu0 %v1350_v11 }
  0x83   : > { %765 = vmatmul.mubr.bf16.gmra.mrb[20].mxu0 %v1352_v12  ;;  %v331_v12 = vld [vmem:[#allocation2 + $0x38] sm:$0xff] }
  0x84   : > { %772 = vmatprep.mubr.bf16.mxu0 %v1353_v13 }
  0x8b   : > { %773 = vmatmul.mubr.bf16.gmra.mrb[24].mxu0 %v1355_v14 }
  0x8c   : > { %780 = vmatprep.mubr.bf16.mxu0 %v1358_v15 }
  0x93   : > { %781 = vmatmul.mubr.bf16.gmra.mrb[28].mxu0 %v1360_v16 }
 0x12e   : > { %v1166_v17 = vpop.f32.mrb[0].mxu0 }
 0x12f   : > { %v1167_v18 = vpop.f32.mrb[1].mxu0 }
 0x130   : > { %v1168_v19 = vadd.f32 %v1167_v18, %v1166_v17  ;;  %v1169_v20 = vpop.f32.mrb[2].mxu0  ;;  %v1248_v21 = vpop.f32.mrb[0].mxu1 }
 0x131   : > { %v1170_v22 = vpop.f32.mrb[3].mxu0  ;;  %v823_v24 = vpop.f32.mrb[1].mxu1 }
 0x132   : > { %v1171_v25 = vadd.f32 %v1170_v22, %v1169_v20  ;;  %v824_v26 = vadd.f32 %v1168_v19, %v823_v24  ;;  %v1249_v27 = vpop.f32.mrb[2].mxu1  ;;  %v332_v22 = vld [vmem:[#allocation2 + $0x40] sm:$0xff] }
 0x133   : > { %v826_v29 = vpop.f32.mrb[3].mxu1 }
 0x134   : > { %v886_v30 = vadd.f32 %v824_v26, %v324_v23  ;;  %v827_v31 = vadd.f32 %v1171_v25, %v826_v29  ;;  %v333_v25 = vld [vmem:[#allocation2 + $0x48] sm:$0xff] }
 0x136   : > { %902 = vst [vmem:[#allocation2] sm:$0xff] %v886_v30  ;;  %v887_v32 = vadd.f32 %v827_v31, %v325_v28  ;;  %v1172_v33 = vpop.f32.mrb[4].mxu0 }
 0x137   : > { %v1173_v34 = vpop.f32.mrb[5].mxu0 }
 0x138   : > { %903 = vst [vmem:[#allocation2 + $0x8] sm:$0xff] %v887_v32  ;;  %v1174_v35 = vadd.f32 %v1173_v34, %v1172_v33  ;;  %v1175_v36 = vpop.f32.mrb[6].mxu0  ;;  %v1252_v37 = vpop.f32.mrb[4].mxu1  ;;  %v334_v33 = vld [vmem:[#allocation2 + $0x50] sm:$0xff] }
 0x139   : > { %v1176_v39 = vpop.f32.mrb[7].mxu0  ;;  %v839_v40 = vpop.f32.mrb[5].mxu1 }
 0x13a   : > { %v832_v41 = vadd.f32 %v1248_v21, %v1174_v35  ;;  %v1177_v42 = vadd.f32 %v1176_v39, %v1175_v36  ;;  %v1253_v43 = vpop.f32.mrb[6].mxu1 }
 0x13b   : > { %v842_v45 = vpop.f32.mrb[7].mxu1 }
 0x13c   : > { %v888_v46 = vadd.f32 %v832_v41, %v326_v38  ;;  %v835_v47 = vadd.f32 %v1249_v27, %v1177_v42 }
 0x13e   : > { %904 = vst [vmem:[#allocation2 + $0x10] sm:$0xff] %v888_v46  ;;  %v889_v48 = vadd.f32 %v835_v47, %v327_v44  ;;  %v1178_v49 = vpop.f32.mrb[8].mxu0  ;;  %v336_v46 = vld [vmem:[#allocation2 + $0x60] sm:$0xff] }
 0x13f   : > { %v1179_v50 = vpop.f32.mrb[9].mxu0 }
 0x140   : > { %905 = vst [vmem:[#allocation2 + $0x18] sm:$0xff] %v889_v48  ;;  %v1180_v51 = vadd.f32 %v1179_v50, %v1178_v49  ;;  %v1181_v52 = vpop.f32.mrb[10].mxu0  ;;  %v1256_v53 = vpop.f32.mrb[8].mxu1  ;;  %v337_v49 = vld [vmem:[#allocation2 + $0x68] sm:$0xff] }
 0x141   : > { %v1182_v54 = vpop.f32.mrb[11].mxu0  ;;  %v855_v56 = vpop.f32.mrb[9].mxu1 }
 0x142   : > { %v1183_v57 = vadd.f32 %v1182_v54, %v1181_v52  ;;  %v840_v58 = vadd.f32 %v1180_v51, %v839_v40  ;;  %v1257_v59 = vpop.f32.mrb[10].mxu1 }
 0x143   : > { %v858_v61 = vpop.f32.mrb[11].mxu1 }
 0x144   : > { %v890_v62 = vadd.f32 %v840_v58, %v328_v55  ;;  %v843_v63 = vadd.f32 %v1183_v57, %v842_v45  ;;  %v338_v57 = vld [vmem:[#allocation2 + $0x70] sm:$0xff] }
 0x146   : > { %906 = vst [vmem:[#allocation2 + $0x20] sm:$0xff] %v890_v62  ;;  %v891_v0 = vadd.f32 %v843_v63, %v329_v60  ;;  %v1184_v1 = vpop.f32.mrb[12].mxu0 }
 0x147   : > { %v1185_v2 = vpop.f32.mrb[13].mxu0 }
 0x148   : > { %907 = vst [vmem:[#allocation2 + $0x28] sm:$0xff] %v891_v0  ;;  %v1186_v3 = vadd.f32 %v1185_v2, %v1184_v1  ;;  %v1187_v4 = vpop.f32.mrb[14].mxu0  ;;  %v1260_v5 = vpop.f32.mrb[12].mxu1  ;;  %v922_v1 = vld [vmem:[#allocation2] sm:$0xff] (!%p1144_p11)  ;;  %v923_v2 = vld [vmem:[#allocation2 + $0x8] sm:$0xff] (!%p1144_p11) }
 0x149   : > { %v1188_v7 = vpop.f32.mrb[15].mxu0  ;;  %v871_v8 = vpop.f32.mrb[13].mxu1  ;;  %938 = vst [vmem:[%s1654_s2] sm:$0xff] (!%p1144_p11), %v922_v1  ;;  %939 = vst [vmem:[%s1654_s2 + $0x8] sm:$0xff] (!%p1144_p11), %v923_v2 }
 0x14a   : > { %v848_v9 = vadd.f32 %v1252_v37, %v1186_v3  ;;  %v1189_v10 = vadd.f32 %v1188_v7, %v1187_v4  ;;  %v1261_v11 = vpop.f32.mrb[14].mxu1  ;;  %v335_v37 = vld [vmem:[#allocation2 + $0x58] sm:$0xff]  ;;  %v924_v3 = vld [vmem:[#allocation2 + $0x10] sm:$0xff] (!%p1144_p11) }
 0x14b   : > { %v874_v13 = vpop.f32.mrb[15].mxu1  ;;  %940 = vst [vmem:[%s1654_s2 + $0x10] sm:$0xff] (!%p1144_p11), %v924_v3  ;;  %v925_v4 = vld [vmem:[#allocation2 + $0x18] sm:$0xff] (!%p1144_p11) }
 0x14c   : > { %v892_v14 = vadd.f32 %v848_v9, %v330_v6  ;;  %v851_v15 = vadd.f32 %v1253_v43, %v1189_v10  ;;  %941 = vst [vmem:[%s1654_s2 + $0x18] sm:$0xff] (!%p1144_p11), %v925_v4 }
 0x14e   : > { %908 = vst [vmem:[#allocation2 + $0x30] sm:$0xff] %v892_v14  ;;  %v893_v16 = vadd.f32 %v851_v15, %v331_v12  ;;  %v1190_v17 = vpop.f32.mrb[16].mxu0 }
 0x14f   : > { %v1191_v18 = vpop.f32.mrb[17].mxu0  ;;  %v927_v6 = vld [vmem:[#allocation2 + $0x28] sm:$0xff] (!%p1144_p11) }
 0x150   : > { %909 = vst [vmem:[#allocation2 + $0x38] sm:$0xff] %v893_v16  ;;  %v1192_v19 = vadd.f32 %v1191_v18, %v1190_v17  ;;  %v1193_v20 = vpop.f32.mrb[18].mxu0  ;;  %943 = vst [vmem:[%s1654_s2 + $0x28] sm:$0xff] (!%p1144_p11), %v927_v6 }
 0x151   : > { %v1194_v21 = vpop.f32.mrb[19].mxu0 }
 0x152   : > { %v1195_v23 = vadd.f32 %v1194_v21, %v1193_v20  ;;  %v856_v24 = vadd.f32 %v1192_v19, %v855_v56 }
 0x154   : > { %v894_v26 = vadd.f32 %v856_v24, %v332_v22  ;;  %v859_v27 = vadd.f32 %v1195_v23, %v858_v61  ;;  %v339_v61 = vld [vmem:[#allocation2 + $0x78] sm:$0xff] }
 0x155   : > { %v928_v7 = vld [vmem:[#allocation2 + $0x30] sm:$0xff] (!%p1144_p11) }
 0x156   : > { %910 = vst [vmem:[#allocation2 + $0x40] sm:$0xff] %v894_v26  ;;  %v895_v28 = vadd.f32 %v859_v27, %v333_v25  ;;  %v1196_v29 = vpop.f32.mrb[20].mxu0  ;;  %944 = vst [vmem:[%s1654_s2 + $0x30] sm:$0xff] (!%p1144_p11), %v928_v7 }
 0x157   : > { %v1197_v30 = vpop.f32.mrb[21].mxu0 }
 0x158   : > { %911 = vst [vmem:[#allocation2 + $0x48] sm:$0xff] %v895_v28  ;;  %v1198_v31 = vadd.f32 %v1197_v30, %v1196_v29  ;;  %v1199_v32 = vpop.f32.mrb[22].mxu0 }
 0x159   : > { %v1200_v34 = vpop.f32.mrb[23].mxu0 }
 0x15a   : > { %v864_v35 = vadd.f32 %v1256_v53, %v1198_v31  ;;  %v1201_v36 = vadd.f32 %v1200_v34, %v1199_v32 }
 0x15c   : > { %v896_v38 = vadd.f32 %v864_v35, %v334_v33  ;;  %v867_v39 = vadd.f32 %v1257_v59, %v1201_v36 }
 0x15d   : > { %v930_v9 = vld [vmem:[#allocation2 + $0x40] sm:$0xff] (!%p1144_p11) }
 0x15e   : > { %912 = vst [vmem:[#allocation2 + $0x50] sm:$0xff] %v896_v38  ;;  %v897_v40 = vadd.f32 %v867_v39, %v335_v37  ;;  %v1202_v41 = vpop.f32.mrb[24].mxu0  ;;  %946 = vst [vmem:[%s1654_s2 + $0x40] sm:$0xff] (!%p1144_p11), %v930_v9 }
 0x15f   : > { %v1203_v42 = vpop.f32.mrb[25].mxu0  ;;  %v931_v10 = vld [vmem:[#allocation2 + $0x48] sm:$0xff] (!%p1144_p11) }
 0x160   : > { %913 = vst [vmem:[#allocation2 + $0x58] sm:$0xff] %v897_v40  ;;  %v1204_v43 = vadd.f32 %v1203_v42, %v1202_v41  ;;  %v1205_v44 = vpop.f32.mrb[26].mxu0  ;;  %947 = vst [vmem:[%s1654_s2 + $0x48] sm:$0xff] (!%p1144_p11), %v931_v10 }
 0x161   : > { %v1206_v45 = vpop.f32.mrb[27].mxu0 }
 0x162   : > { %v1207_v47 = vadd.f32 %v1206_v45, %v1205_v44  ;;  %v872_v48 = vadd.f32 %v1204_v43, %v871_v8  ;;  %v929_v8 = vld [vmem:[#allocation2 + $0x38] sm:$0xff] (!%p1144_p11) }
 0x163   : > { %945 = vst [vmem:[%s1654_s2 + $0x38] sm:$0xff] (!%p1144_p11), %v929_v8 }
 0x164   : > { %v898_v50 = vadd.f32 %v872_v48, %v336_v46  ;;  %v875_v51 = vadd.f32 %v1207_v47, %v874_v13 }
 0x166   : > { %914 = vst [vmem:[#allocation2 + $0x60] sm:$0xff] %v898_v50  ;;  %v899_v52 = vadd.f32 %v875_v51, %v337_v49  ;;  %v1208_v53 = vpop.f32.mrb[28].mxu0 }
 0x167   : > { %v1209_v54 = vpop.f32.mrb[29].mxu0  ;;  %v933_v12 = vld [vmem:[#allocation2 + $0x58] sm:$0xff] (!%p1144_p11) }
 0x168   : > { %915 = vst [vmem:[#allocation2 + $0x68] sm:$0xff] %v899_v52  ;;  %v1210_v55 = vadd.f32 %v1209_v54, %v1208_v53  ;;  %v1211_v56 = vpop.f32.mrb[30].mxu0  ;;  %949 = vst [vmem:[%s1654_s2 + $0x58] sm:$0xff] (!%p1144_p11), %v933_v12 }
 0x169   : > { %v1212_v58 = vpop.f32.mrb[31].mxu0 }
 0x16a   : > { %v880_v59 = vadd.f32 %v1260_v5, %v1210_v55  ;;  %v1213_v60 = vadd.f32 %v1212_v58, %v1211_v56  ;;  %921 = sbr.rel (%p1144_p11) target bundleno = 377 (0x179), region = 62  ;;  %v926_v5 = vld [vmem:[#allocation2 + $0x20] sm:$0xff] (!%p1144_p11) }
 0x16b   : > { %942 = vst [vmem:[%s1654_s2 + $0x20] sm:$0xff] (!%p1144_p11), %v926_v5 }
 0x16c   : > { %v900_v62 = vadd.f32 %v880_v59, %v338_v57  ;;  %v883_v63 = vadd.f32 %v1261_v11, %v1213_v60  ;;  %v932_v11 = vld [vmem:[#allocation2 + $0x50] sm:$0xff] (!%p1144_p11) }
 0x16d   : > { %948 = vst [vmem:[%s1654_s2 + $0x50] sm:$0xff] (!%p1144_p11), %v932_v11  ;;  %v934_v13 = vld [vmem:[#allocation2 + $0x60] sm:$0xff] (!%p1144_p11) }
 0x16e   : > { %916 = vst [vmem:[#allocation2 + $0x70] sm:$0xff] %v900_v62  ;;  %v901_v0 = vadd.f32 %v883_v63, %v339_v61  ;;  %950 = vst [vmem:[%s1654_s2 + $0x60] sm:$0xff] (!%p1144_p11), %v934_v13 }
 0x16f   : > { %v935_v14 = vld [vmem:[#allocation2 + $0x68] sm:$0xff] (!%p1144_p11) }
 0x170   : > { %917 = vst [vmem:[#allocation2 + $0x78] sm:$0xff] %v901_v0  ;;  %951 = vst [vmem:[%s1654_s2 + $0x68] sm:$0xff] (!%p1144_p11), %v935_v14 }
 0x175   : > { %v936_v15 = vld [vmem:[#allocation2 + $0x70] sm:$0xff] }
 0x176   : > { %952 = vst [vmem:[%s1654_s2 + $0x70] sm:$0xff] %v936_v15 }
 0x177   : > { %v937_v16 = vld [vmem:[#allocation2 + $0x78] sm:$0xff] }
 0x178   : > { %953 = vst [vmem:[%s1654_s2 + $0x78] sm:$0xff] %v937_v16 }
 0x179 PF: > { %s12_s13 = sadd.s32 1, %s1399_s13   ;;  %s1655_s9 = smov %s1387_s10 }
 0x17a   : > { %p9_p12 = scmp.ge.s32.totalorder %s12_s13, 5   ;;  %s1656_s10 = smov %s1452_s17 }
 0x17b   : > { %s1657_s11 = smov %s1395_s12  ;;  %s1658_s12 = smov %s1660_s14 }
 0x17c   :  { %11 = sbr.rel (!%p9_p12) target bundleno = 3 (0x3), region = 106 }

// kernel: preact_block_forward.9
= control target key start
LH: loop header
LB: loop body
LE: loop exit
PB: predicated region body
PF: predicated region fallthrough
CT: control target
= control target key end

     0   :  { %s551_s1 = inlined_call_operand.vmem [shape: bf16[128,128], index: 1, kind: input, shape index: {}]   ;;  %s552_s0 = inlined_call_operand.vmem [shape: bf16[128,128], index: 0, kind: input, shape index: {}]   ;;  %s553_s2 = inlined_call_operand.vmem [shape: f32[128,128], index: 2, kind: output, shape index: {}]  }
   0x1   :  { %v424_v0 = vld [vmem:[%s551_s1] sm:$0xff]   ;;  %v425_v1 = vld [vmem:[%s551_s1 + $0x8] sm:$0xff]   ;;  %v426_v2 = vld [vmem:[%s551_s1 + $0x10] sm:$0xff]  }
   0x2   :  { %376 = vmatprep.subr.bf16.mxu0 %v424_v0  ;;  %408 = vmatprep.subr.bf16.mxu1 %v424_v0  ;;  %v427_v3 = vld [vmem:[%s551_s1 + $0x18] sm:$0xff]   ;;  %v432_v4 = vld [vmem:[%s552_s0] sm:$0xff]   ;;  %v429_v7 = vld [vmem:[%s551_s1 + $0x28] sm:$0xff]  }
   0x3   :  { %377 = vmatpush3.bf16.msra.mxu0 %v424_v0  ;;  %416 = vmatpush3.bf16.msra.mxu1 %v424_v0  ;;  %v433_v5 = vld [vmem:[%s552_s0 + $0x20] sm:$0xff]   ;;  %v430_v8 = vld [vmem:[%s551_s1 + $0x30] sm:$0xff]   ;;  %v431_v9 = vld [vmem:[%s551_s1 + $0x38] sm:$0xff]  }
   0x4   :  { %378 = vmatprep.subr.bf16.mxu0 %v425_v1  ;;  %409 = vmatprep.subr.bf16.mxu1 %v425_v1  ;;  %v428_v6 = vld [vmem:[%s551_s1 + $0x20] sm:$0xff]   ;;  %v434_v10 = vld [vmem:[%s552_s0 + $0x8] sm:$0xff]   ;;  %v436_v12 = vld [vmem:[%s552_s0 + $0x10] sm:$0xff]  }
   0x5   :  { %392 = vmatprep.mubr.bf16.mxu0 %v432_v4  ;;  %400 = vmatprep.mubr.bf16.mxu1 %v433_v5  ;;  %v435_v11 = vld [vmem:[%s552_s0 + $0x28] sm:$0xff]   ;;  %v437_v13 = vld [vmem:[%s552_s0 + $0x30] sm:$0xff]   ;;  %v438_v14 = vld [vmem:[%s552_s0 + $0x18] sm:$0xff]  }
   0x6   :  { %v439_v15 = vld [vmem:[%s552_s0 + $0x38] sm:$0xff]  }
   0x7   :  { %379 = vmatpush3.bf16.msra.mxu0 %v425_v1  ;;  %417 = vmatpush3.bf16.msra.mxu1 %v425_v1 }
   0x8   :  { %380 = vmatprep.subr.bf16.mxu0 %v426_v2  ;;  %410 = vmatprep.subr.bf16.mxu1 %v426_v2 }
   0xb   :  { %381 = vmatpush3.bf16.msra.mxu0 %v426_v2  ;;  %418 = vmatpush3.bf16.msra.mxu1 %v426_v2 }
   0xc   :  { %382 = vmatprep.subr.bf16.mxu0 %v427_v3  ;;  %411 = vmatprep.subr.bf16.mxu1 %v427_v3 }
   0xf   :  { %383 = vmatpush3.bf16.msra.mxu0 %v427_v3  ;;  %419 = vmatpush3.bf16.msra.mxu1 %v427_v3 }
  0x10   :  { %384 = vmatprep.subr.bf16.mxu0 %v428_v6  ;;  %412 = vmatprep.subr.bf16.mxu1 %v428_v6 }
  0x13   :  { %385 = vmatpush3.bf16.msra.mxu0 %v428_v6  ;;  %420 = vmatpush3.bf16.msra.mxu1 %v428_v6 }
  0x14   :  { %386 = vmatprep.subr.bf16.mxu0 %v429_v7  ;;  %413 = vmatprep.subr.bf16.mxu1 %v429_v7 }
  0x17   :  { %387 = vmatpush3.bf16.msra.mxu0 %v429_v7  ;;  %421 = vmatpush3.bf16.msra.mxu1 %v429_v7 }
  0x18   :  { %388 = vmatprep.subr.bf16.mxu0 %v430_v8  ;;  %414 = vmatprep.subr.bf16.mxu1 %v430_v8 }
  0x1b   :  { %389 = vmatpush3.bf16.msra.mxu0 %v430_v8  ;;  %422 = vmatpush3.bf16.msra.mxu1 %v430_v8 }
  0x1c   :  { %390 = vmatprep.subr.bf16.mxu0 %v431_v9  ;;  %415 = vmatprep.subr.bf16.mxu1 %v431_v9 }
  0x1f   :  { %391 = vmatpush3.bf16.msra.mxu0 %v431_v9  ;;  %423 = vmatpush3.bf16.msra.mxu1 %v431_v9 }
  0x22   :  { %393 = vmatmul.mubr.bf16.vlgmr.msra.gmra.mrb[0].mxu0 %v434_v10  ;;  %401 = vmatmul.mubr.bf16.vlgmr.msra.gmra.mrb[0].mxu1 %v435_v11 }
  0x23   :  { %396 = vmatprep.mubr.bf16.mxu0 %v436_v12  ;;  %404 = vmatprep.mubr.bf16.mxu1 %v437_v13 }
  0x2a   :  { %397 = vmatmul.mubr.bf16.gmra.mrb[4].mxu0 %v438_v14  ;;  %405 = vmatmul.mubr.bf16.gmra.mrb[4].mxu1 %v439_v15 }
  0xf5   :  { %v394_v16 = vpop.f32.mrb[0].mxu0  ;;  %v402_v17 = vpop.f32.mrb[0].mxu1 }
  0xf6   :  { %326 = vst [vmem:[%s553_s2 + $0x10] sm:$0xff] %v394_v16  ;;  %334 = vst [vmem:[%s553_s2 + $0x50] sm:$0xff] %v402_v17  ;;  %v210_v18 = vpop.f32.mrb[1].mxu0  ;;  %v242_v19 = vpop.f32.mrb[1].mxu1 }
  0xf7   :  { %324 = vst [vmem:[%s553_s2] sm:$0xff] %v210_v18  ;;  %332 = vst [vmem:[%s553_s2 + $0x40] sm:$0xff] %v242_v19  ;;  %v395_v20 = vpop.f32.mrb[2].mxu0  ;;  %v403_v21 = vpop.f32.mrb[2].mxu1 }
  0xf8   :  { %327 = vst [vmem:[%s553_s2 + $0x18] sm:$0xff] %v395_v20  ;;  %335 = vst [vmem:[%s553_s2 + $0x58] sm:$0xff] %v403_v21  ;;  %v213_v22 = vpop.f32.mrb[3].mxu0  ;;  %v245_v23 = vpop.f32.mrb[3].mxu1 }
  0xf9   :  { %325 = vst [vmem:[%s553_s2 + $0x8] sm:$0xff] %v213_v22  ;;  %333 = vst [vmem:[%s553_s2 + $0x48] sm:$0xff] %v245_v23 }
  0xfd   :  { %v398_v24 = vpop.f32.mrb[4].mxu0  ;;  %v406_v25 = vpop.f32.mrb[4].mxu1 }
  0xfe   :  { %330 = vst [vmem:[%s553_s2 + $0x30] sm:$0xff] %v398_v24  ;;  %338 = vst [vmem:[%s553_s2 + $0x70] sm:$0xff] %v406_v25  ;;  %v226_v26 = vpop.f32.mrb[5].mxu0  ;;  %v258_v27 = vpop.f32.mrb[5].mxu1 }
  0xff   :  { %328 = vst [vmem:[%s553_s2 + $0x20] sm:$0xff] %v226_v26  ;;  %336 = vst [vmem:[%s553_s2 + $0x60] sm:$0xff] %v258_v27  ;;  %v399_v28 = vpop.f32.mrb[6].mxu0  ;;  %v407_v29 = vpop.f32.mrb[6].mxu1 }
 0x100   :  { %331 = vst [vmem:[%s553_s2 + $0x38] sm:$0xff] %v399_v28  ;;  %339 = vst [vmem:[%s553_s2 + $0x78] sm:$0xff] %v407_v29  ;;  %v229_v30 = vpop.f32.mrb[7].mxu0  ;;  %v261_v31 = vpop.f32.mrb[7].mxu1 }
 0x101   :  { %329 = vst [vmem:[%s553_s2 + $0x28] sm:$0xff] %v229_v30  ;;  %337 = vst [vmem:[%s553_s2 + $0x68] sm:$0xff] %v261_v31 }

// kernel: preact_block_forward.13
= control target key start
LH: loop header
LB: loop body
LE: loop exit
PB: predicated region body
PF: predicated region fallthrough
CT: control target
= control target key end

     0   :  { %s1533_s12 = smov 0   ;;  %s1535_s13 = smov 0   ;;  %s1816_s0 = inlined_call_operand.vmem [shape: bf16[128,1152], index: 0, kind: input, shape index: {}]   ;;  %s1817_s1 = inlined_call_operand.vmem [shape: bf16[1152,128], index: 1, kind: input, shape index: {}]   ;;  %s1818_s2 = inlined_call_operand.vmem [shape: f32[128,128], index: 2, kind: input, shape index: {}]   ;;  %s1819_s3 = inlined_call_operand.vmem [shape: f32[128,128], index: 3, kind: output, shape index: {}]  }
   0x1   :  { %s1537_s14 = smov 0   ;;  %s1539_s15 = smov 0  }
   0x2   :  { %s1541_s16 = smov 0  }
   0x3 LB: > { %s25_s17 = sadd.s32 1, %s1506_s15  ;;  %p48_p1 = scmp.ne.s32.totalorder %s1498_s13, %s1494_s12  ;;  %s1510_s16 = sphi %s1541_s16, %s13_s16   ;;  %s1506_s15 = sphi %s1539_s15, %s1823_s15   ;;  %s1502_s14 = sphi %s1537_s14, %s1822_s14   ;;  %s1498_s13 = sphi %s1535_s13, %s1821_s13   ;;  %s1494_s12 = sphi %s1533_s12, %s1820_s12  }
   0x4   : > { %p26_p0 = scmp.ge.s32.totalorder %s25_s17, 3  ;;  %p49_p2 = scmp.eq.s32.totalorder %s1510_s16, 0 }
   0x5   : > { %s41_s19 = sadd.s32 1, %s1498_s13  ;;  %p1170_p5 = scmp.ge.s32.totalorder %s1510_s16, 3 }
   0x6   : > { %s1825_s17 = smov (%p26_p0, %s25_s17), 0  ;;  %p50_p3 = por %p49_p2, %p48_p1 }
   0x7   : > { %s37_s18 = ssub.s32 %s1506_s15, %s1825_s17  ;;  %170 = sbr.rel (%p1170_p5) target bundleno = 37 (0x25), region = 20 }
   0x8   : > { %p39_p4 = scmp.eq.s32.totalorder %s37_s18, 0 }
   0xa   : > { %s1568_s20 = scalar_select %p39_p4, %s1498_s13, %s41_s19  }
   0xe   : > { %173 = sbr.rel (!%p50_p3) target bundleno = 37 (0x25), region = 24  ;;  %s175_s21 = sand.u32 (%p50_p3), 1, %s1498_s13  }
   0xf   : > { %s1260_s22 = smul.u32 (%p50_p3), 12, %s1506_s15 }
  0x10   : > { %s1373_s23 = smul.u32 (%p50_p3), 192, %s175_s21 }
  0x11   : > { %s1576_s26 = scalar_lea.vmem (%p50_p3), %s1816_s0, %s1260_s22 }
  0x12   : > { %v198_v0 = vld [vmem:[%s1576_s26] sm:$0xff] (%p50_p3)  ;;  %v202_v2 = vld [vmem:[%s1576_s26 + $0x48] sm:$0xff] (%p50_p3)  ;;  %s1581_s27 = scalar_lea.vmem (%p50_p3), [#allocation3], %s1373_s23  ;;  %v206_v4 = vld [vmem:[%s1576_s26 + $0x90] sm:$0xff] (%p50_p3) }
  0x13   : > { %v200_v1 = vld [vmem:[%s1576_s26 + $0x24] sm:$0xff] (%p50_p3)  ;;  %199 = vst [vmem:[%s1581_s27] sm:$0xff] (%p50_p3), %v198_v0  ;;  %203 = vst [vmem:[%s1581_s27 + $0x18] sm:$0xff] (%p50_p3), %v202_v2  ;;  %v204_v3 = vld [vmem:[%s1576_s26 + $0x6c] sm:$0xff] (%p50_p3) }
  0x14   : > { %201 = vst [vmem:[%s1581_s27 + $0xc] sm:$0xff] (%p50_p3), %v200_v1  ;;  %v208_v5 = vld [vmem:[%s1576_s26 + $0xb4] sm:$0xff] (%p50_p3)  ;;  %205 = vst [vmem:[%s1581_s27 + $0x24] sm:$0xff] (%p50_p3), %v204_v3  ;;  %v212_v7 = vld [vmem:[%s1576_s26 + $0xfc] sm:$0xff] (%p50_p3) }
  0x15   : > { %207 = vst [vmem:[%s1581_s27 + $0x30] sm:$0xff] %v206_v4  ;;  %209 = vst [vmem:[%s1581_s27 + $0x3c] sm:$0xff] %v208_v5  ;;  %v210_v6 = vld [vmem:[%s1576_s26 + $0xd8] sm:$0xff]  ;;  %v214_v8 = vld [vmem:[%s1576_s26 + $0x120] sm:$0xff] }
  0x16   : > { %211 = vst [vmem:[%s1581_s27 + $0x48] sm:$0xff] %v210_v6  ;;  %213 = vst [vmem:[%s1581_s27 + $0x54] sm:$0xff] %v212_v7  ;;  %v216_v9 = vld [vmem:[%s1576_s26 + $0x144] sm:$0xff]  ;;  %v220_v11 = vld [vmem:[%s1576_s26 + $0x18c] sm:$0xff] }
  0x17   : > { %215 = vst [vmem:[%s1581_s27 + $0x60] sm:$0xff] %v214_v8  ;;  %v218_v10 = vld [vmem:[%s1576_s26 + $0x168] sm:$0xff]  ;;  %217 = vst [vmem:[%s1581_s27 + $0x6c] sm:$0xff] %v216_v9  ;;  %v222_v12 = vld [vmem:[%s1576_s26 + $0x1b0] sm:$0xff] }
  0x18   : > { %219 = vst [vmem:[%s1581_s27 + $0x78] sm:$0xff] %v218_v10  ;;  %221 = vst [vmem:[%s1581_s27 + $0x84] sm:$0xff] %v220_v11  ;;  %v224_v13 = vld [vmem:[%s1576_s26 + $0x1d4] sm:$0xff]  ;;  %v228_v15 = vld [vmem:[%s1576_s26 + $0x21c] sm:$0xff] }
  0x19   : > { %v226_v14 = vld [vmem:[%s1576_s26 + $0x1f8] sm:$0xff]  ;;  %223 = vst [vmem:[%s1581_s27 + $0x90] sm:$0xff] %v222_v12  ;;  %225 = vst [vmem:[%s1581_s27 + $0x9c] sm:$0xff] %v224_v13  ;;  %v1172_v16 = vld [vmem:[%s1576_s26 + $0x8] sm:$0xf] }
  0x1a   : > { %227 = vst [vmem:[%s1581_s27 + $0xa8] sm:$0xff] %v226_v14  ;;  %v1174_v17 = vld [vmem:[%s1576_s26 + $0x2c] sm:$0xf]  ;;  %229 = vst [vmem:[%s1581_s27 + $0xb4] sm:$0xff] %v228_v15  ;;  %v1176_v18 = vld [vmem:[%s1576_s26 + $0x50] sm:$0xf] }
  0x1b   : > { %1173 = vst [vmem:[%s1581_s27 + $0x8] sm:$0xf] %v1172_v16  ;;  %1175 = vst [vmem:[%s1581_s27 + $0x14] sm:$0xf] %v1174_v17  ;;  %v1178_v19 = vld [vmem:[%s1576_s26 + $0x74] sm:$0xf] }
  0x1c   : > { %v1180_v20 = vld [vmem:[%s1576_s26 + $0x98] sm:$0xf]  ;;  %1177 = vst [vmem:[%s1581_s27 + $0x20] sm:$0xf] %v1176_v18  ;;  %1179 = vst [vmem:[%s1581_s27 + $0x2c] sm:$0xf] %v1178_v19 }
  0x1d   : > { %1181 = vst [vmem:[%s1581_s27 + $0x38] sm:$0xf] %v1180_v20  ;;  %v1182_v21 = vld [vmem:[%s1576_s26 + $0xbc] sm:$0xf]  ;;  %v1184_v22 = vld [vmem:[%s1576_s26 + $0xe0] sm:$0xf] }
  0x1e   : > { %v1186_v23 = vld [vmem:[%s1576_s26 + $0x104] sm:$0xf]  ;;  %1183 = vst [vmem:[%s1581_s27 + $0x44] sm:$0xf] %v1182_v21  ;;  %1185 = vst [vmem:[%s1581_s27 + $0x50] sm:$0xf] %v1184_v22 }
  0x1f   : > { %1187 = vst [vmem:[%s1581_s27 + $0x5c] sm:$0xf] %v1186_v23  ;;  %v1188_v24 = vld [vmem:[%s1576_s26 + $0x128] sm:$0xf]  ;;  %v1190_v25 = vld [vmem:[%s1576_s26 + $0x14c] sm:$0xf] }
  0x20   : > { %v1192_v26 = vld [vmem:[%s1576_s26 + $0x170] sm:$0xf]  ;;  %1189 = vst [vmem:[%s1581_s27 + $0x68] sm:$0xf] %v1188_v24  ;;  %1191 = vst [vmem:[%s1581_s27 + $0x74] sm:$0xf] %v1190_v25 }
  0x21   : > { %1193 = vst [vmem:[%s1581_s27 + $0x80] sm:$0xf] %v1192_v26  ;;  %v1194_v27 = vld [vmem:[%s1576_s26 + $0x194] sm:$0xf]  ;;  %v1196_v28 = vld [vmem:[%s1576_s26 + $0x1b8] sm:$0xf] }
  0x22   : > { %v1198_v29 = vld [vmem:[%s1576_s26 + $0x1dc] sm:$0xf]  ;;  %1195 = vst [vmem:[%s1581_s27 + $0x8c] sm:$0xf] %v1194_v27  ;;  %1197 = vst [vmem:[%s1581_s27 + $0x98] sm:$0xf] %v1196_v28 }
  0x23   : > { %1199 = vst [vmem:[%s1581_s27 + $0xa4] sm:$0xf] %v1198_v29  ;;  %v1200_v30 = vld [vmem:[%s1576_s26 + $0x200] sm:$0xf]  ;;  %v1202_v31 = vld [vmem:[%s1576_s26 + $0x224] sm:$0xf] }
  0x24   : > { %1201 = vst [vmem:[%s1581_s27 + $0xb0] sm:$0xf] %v1200_v30  ;;  %1203 = vst [vmem:[%s1581_s27 + $0xbc] sm:$0xf] %v1202_v31 }
  0x25 PF: > { %p1204_p6 = scmp.ge.s32.totalorder %s1510_s16, 1  ;;  %p285_p7 = scmp.lt.s32.totalorder %s1510_s16, 4 }
  0x27   : > { %p286_p8 = pnand %p1204_p6, %p285_p7 }
  0x28   : > { %s292_s28 = sand.u32 (!%p286_p8), 1, %s1494_s12   ;;  %s336_s29 = smul.u32 (!%p286_p8), 48, %s1502_s14 }
  0x29   : > { %289 = sbr.rel (%p286_p8) target bundleno = 379 (0x17b), region = 54  ;;  %p1206_p10 = scmp.ne.s32.totalorder (!%p286_p8), %s1502_s14, 0 }
  0x2a   : > { %s1374_s30 = smul.u32 (!%p286_p8), 192, %s292_s28  ;;  %p337_p9 = scmp.lt.s32.totalorder (!%p286_p8), %s336_s29, 143 }
  0x2c   : > { %s1653_s8 = scalar_lea.vmem (!%p286_p8), [#allocation3], %s1374_s30 }
  0x30   : > { %s1827_s29 = smov (!%p337_p9, %s336_s29), 143  ;;  %367 = sbr.rel (%p1206_p10) target bundleno = 58 (0x3a), region = 62 }
  0x31   : > { %s1205_s4 = sshll.u32 %s1827_s29, 2  ;;  %v1512_v32 = vmov (!%p1206_p10), 0.0  }
  0x32   : > { %s1651_s7 = scalar_lea.vmem %s1817_s1, %s1205_s4  ;;  %368 = vst [vmem:[#allocation2] sm:$0xff] (!%p1206_p10), %v1512_v32  ;;  %369 = vst [vmem:[#allocation2 + $0x8] sm:$0xff] (!%p1206_p10), %v1512_v32 }
  0x33   : > { %370 = vst [vmem:[#allocation2 + $0x10] sm:$0xff] (!%p1206_p10), %v1512_v32  ;;  %371 = vst [vmem:[#allocation2 + $0x18] sm:$0xff] (!%p1206_p10), %v1512_v32 }
  0x34   : > { %372 = vst [vmem:[#allocation2 + $0x20] sm:$0xff] (!%p1206_p10), %v1512_v32  ;;  %373 = vst [vmem:[#allocation2 + $0x28] sm:$0xff] (!%p1206_p10), %v1512_v32 }
  0x35   : > { %374 = vst [vmem:[#allocation2 + $0x30] sm:$0xff] (!%p1206_p10), %v1512_v32  ;;  %375 = vst [vmem:[#allocation2 + $0x38] sm:$0xff] (!%p1206_p10), %v1512_v32 }
  0x36   : > { %376 = vst [vmem:[#allocation2 + $0x40] sm:$0xff] (!%p1206_p10), %v1512_v32  ;;  %377 = vst [vmem:[#allocation2 + $0x48] sm:$0xff] (!%p1206_p10), %v1512_v32 }
  0x37   : > { %378 = vst [vmem:[#allocation2 + $0x50] sm:$0xff] %v1512_v32  ;;  %379 = vst [vmem:[#allocation2 + $0x58] sm:$0xff] %v1512_v32 }
  0x38   : > { %380 = vst [vmem:[#allocation2 + $0x60] sm:$0xff] %v1512_v32  ;;  %381 = vst [vmem:[#allocation2 + $0x68] sm:$0xff] %v1512_v32 }
  0x39   : > { %382 = vst [vmem:[#allocation2 + $0x70] sm:$0xff] %v1512_v32  ;;  %383 = vst [vmem:[#allocation2 + $0x78] sm:$0xff] %v1512_v32 }
  0x3a PF: > { %v1416_v33 = vld [vmem:[%s1651_s7 + $0x40] sm:$0xff]   ;;  %v1419_v36 = vld [vmem:[%s1651_s7 + $0x48] sm:$0xff]   ;;  %v1422_v39 = vld [vmem:[%s1651_s7 + $0x50] sm:$0xff]   ;;  %p1255_p11 = scmp.ne.s32.totalorder %s1502_s14, 2 }
  0x3b   : > { %v1417_v34 = vld [vmem:[%s1651_s7] sm:$0xff]   ;;  %1261 = vmatprep.subr.bf16.mxu0 %v1416_v33  ;;  %v1420_v37 = vld [vmem:[%s1651_s7 + $0x8] sm:$0xff]   ;;  %v1423_v40 = vld [vmem:[%s1651_s7 + $0x10] sm:$0xff]  }
  0x3c   : > { %v1418_v35 = vld [vmem:[%s1651_s7 + $0x80] sm:$0xff]   ;;  %1262 = vmatpush3.bf16.msra.mxu0 %v1417_v34  ;;  %v1421_v38 = vld [vmem:[%s1651_s7 + $0x88] sm:$0xff]   ;;  %v1424_v41 = vld [vmem:[%s1651_s7 + $0x90] sm:$0xff]  }
  0x3d   : > { %1341 = vmatprep.subr.bf16.mxu1 %v1418_v35  ;;  %1263 = vmatprep.subr.bf16.mxu0 %v1419_v36  ;;  %v1425_v42 = vld [vmem:[%s1651_s7 + $0x58] sm:$0xff]   ;;  %v1428_v45 = vld [vmem:[%s1651_s7 + $0x60] sm:$0xff]   ;;  %v1431_v48 = vld [vmem:[%s1651_s7 + $0x68] sm:$0xff]  }
  0x3e   : > { %1342 = vmatpush3.bf16.msra.mxu1 %v1418_v35  ;;  %v1426_v43 = vld [vmem:[%s1651_s7 + $0x18] sm:$0xff]   ;;  %v1430_v46 = vld [vmem:[%s1651_s7 + $0xa0] sm:$0xff]   ;;  %v1433_v49 = vld [vmem:[%s1651_s7 + $0xa8] sm:$0xff]  }
  0x3f   : > { %1343 = vmatprep.subr.bf16.mxu1 %v1421_v38  ;;  %v1427_v44 = vld [vmem:[%s1651_s7 + $0x98] sm:$0xff]   ;;  %v1429_v47 = vld [vmem:[%s1651_s7 + $0x20] sm:$0xff]   ;;  %v1432_v50 = vld [vmem:[%s1651_s7 + $0x28] sm:$0xff]  }
  0x40   : > { %1264 = vmatpush3.bf16.msra.mxu0 %v1420_v37  ;;  %v1434_v51 = vld [vmem:[%s1651_s7 + $0x70] sm:$0xff]   ;;  %v1437_v54 = vld [vmem:[%s1651_s7 + $0x78] sm:$0xff]   ;;  %v1440_v59 = vld [vmem:[%s1653_s8] ss:$12 sps:$4 sm:$0xff]  }
  0x41   : > { %1265 = vmatprep.subr.bf16.mxu0 %v1422_v39  ;;  %v1435_v52 = vld [vmem:[%s1651_s7 + $0x30] sm:$0xff]   ;;  %v1439_v55 = vld [vmem:[%s1651_s7 + $0xb8] sm:$0xff]   ;;  %v1444_v61 = vld [vmem:[%s1653_s8 + $0x20] ss:$12 sps:$4 sm:$0xff]  }
  0x42   : > { %1344 = vmatpush3.bf16.msra.mxu1 %v1421_v38  ;;  %v1436_v53 = vld [vmem:[%s1651_s7 + $0xb0] sm:$0xff]   ;;  %v1438_v58 = vld [vmem:[%s1651_s7 + $0x38] sm:$0xff]   ;;  %v1460_v5 = vld [vmem:[%s1653_s8 + $0x80] ss:$12 sps:$4 sm:$0xff]  }
  0x43   : > { %1345 = vmatprep.subr.bf16.mxu1 %v1424_v41  ;;  %v1442_v56 = vld [vmem:[%s1653_s8 + $0x4] ss:$12 sps:$4 sm:$0xff]   ;;  %v1443_v57 = vld [vmem:[%s1653_s8 + $0x8] ss:$12 sps:$4 sm:$0xff]   ;;  %v1453_v4 = vld [vmem:[%s1653_s8 + $0x4c] ss:$12 sps:$4 sm:$0xff]  }
  0x44   : > { %1266 = vmatpush3.bf16.msra.mxu0 %v1423_v40  ;;  %784 = vmatprep.mubr.bf16.mxu0 %v1442_v56  ;;  %v1445_v60 = vld [vmem:[%s1653_s8 + $0x1c] ss:$12 sps:$4 sm:$0xff]   ;;  %v1451_v62 = vld [vmem:[%s1653_s8 + $0x38] ss:$12 sps:$4 sm:$0xff]   ;;  %v1448_v0 = vld [vmem:[%s1653_s8 + $0x34] ss:$12 sps:$4 sm:$0xff]  }
  0x45   : > { %1267 = vmatprep.subr.bf16.mxu0 %v1425_v42  ;;  %1357 = vmatprep.mubr.bf16.mxu1 %v1443_v57  ;;  %v1447_v63 = vld [vmem:[%s1653_s8 + $0x18] ss:$12 sps:$4 sm:$0xff]   ;;  %v1452_v1 = vld [vmem:[%s1653_s8 + $0x50] ss:$12 sps:$4 sm:$0xff]   ;;  %v1459_v2 = vld [vmem:[%s1653_s8 + $0x68] ss:$12 sps:$4 sm:$0xff]  }
  0x46   : > { %1346 = vmatpush3.bf16.msra.mxu1 %v1424_v41  ;;  %v1450_v3 = vld [vmem:[%s1653_s8 + $0x30] ss:$12 sps:$4 sm:$0xff]   ;;  %v1467_v6 = vld [vmem:[%s1653_s8 + $0x98] ss:$12 sps:$4 sm:$0xff]   ;;  %v1455_v7 = vld [vmem:[%s1653_s8 + $0x48] ss:$12 sps:$4 sm:$0xff]  }
  0x47   : > { %1347 = vmatprep.subr.bf16.mxu1 %v1427_v44  ;;  %v1456_v8 = vld [vmem:[%s1653_s8 + $0x64] ss:$12 sps:$4 sm:$0xff]   ;;  %v1458_v10 = vld [vmem:[%s1653_s8 + $0x60] ss:$12 sps:$4 sm:$0xff]   ;;  %v1461_v11 = vld [vmem:[%s1653_s8 + $0x7c] ss:$12 sps:$4 sm:$0xff]  }
  0x48   : > { %1268 = vmatpush3.bf16.msra.mxu0 %v1426_v43  ;;  %v1468_v9 = vld [vmem:[%s1653_s8 + $0xb0] ss:$12 sps:$4 sm:$0xff]   ;;  %v1463_v12 = vld [vmem:[%s1653_s8 + $0x78] ss:$12 sps:$4 sm:$0xff]   ;;  %v1464_v13 = vld [vmem:[%s1653_s8 + $0x94] ss:$12 sps:$4 sm:$0xff]  }
  0x49   : > { %1269 = vmatprep.subr.bf16.mxu0 %v1428_v45  ;;  %v1466_v14 = vld [vmem:[%s1653_s8 + $0x90] ss:$12 sps:$4 sm:$0xff]   ;;  %v1469_v15 = vld [vmem:[%s1653_s8 + $0xac] ss:$12 sps:$4 sm:$0xff]   ;;  %v1471_v16 = vld [vmem:[%s1653_s8 + $0xa8] ss:$12 sps:$4 sm:$0xff]  }
  0x4a   : > { %1348 = vmatpush3.bf16.msra.mxu1 %v1427_v44  ;;  %v384_v23 = vld [vmem:[#allocation2] sm:$0xff]  ;;  %v385_v28 = vld [vmem:[#allocation2 + $0x8] sm:$0xff]  ;;  %v386_v38 = vld [vmem:[#allocation2 + $0x10] sm:$0xff] }
  0x4b   : > { %1349 = vmatprep.subr.bf16.mxu1 %v1430_v46  ;;  %v387_v44 = vld [vmem:[#allocation2 + $0x18] sm:$0xff] }
  0x4c   : > { %1270 = vmatpush3.bf16.msra.mxu0 %v1429_v47 }
  0x4d   : > { %1271 = vmatprep.subr.bf16.mxu0 %v1431_v48 }
  0x4e   : > { %1350 = vmatpush3.bf16.msra.mxu1 %v1430_v46 }
  0x4f   : > { %1351 = vmatprep.subr.bf16.mxu1 %v1433_v49 }
  0x50   : > { %1272 = vmatpush3.bf16.msra.mxu0 %v1432_v50 }
  0x51   : > { %1273 = vmatprep.subr.bf16.mxu0 %v1434_v51 }
  0x52   : > { %1352 = vmatpush3.bf16.msra.mxu1 %v1433_v49 }
  0x53   : > { %1353 = vmatprep.subr.bf16.mxu1 %v1436_v53 }
  0x54   : > { %1274 = vmatpush3.bf16.msra.mxu0 %v1435_v52 }
  0x55   : > { %1275 = vmatprep.subr.bf16.mxu0 %v1437_v54 }
  0x56   : > { %1354 = vmatpush3.bf16.msra.mxu1 %v1436_v53 }
  0x57   : > { %1355 = vmatprep.subr.bf16.mxu1 %v1439_v55 }
  0x58   : > { %1276 = vmatpush3.bf16.msra.mxu0 %v1438_v58 }
  0x5a   : > { %1356 = vmatpush3.bf16.msra.mxu1 %v1439_v55  ;;  %v388_v55 = vld [vmem:[#allocation2 + $0x20] sm:$0xff] }
  0x5b   : > { %785 = vmatmul.mubr.bf16.vlgmr.msra.gmra.mrb[0].mxu0 %v1440_v59 }
  0x5c   : > { %792 = vmatprep.mubr.bf16.mxu0 %v1445_v60  ;;  %v389_v60 = vld [vmem:[#allocation2 + $0x28] sm:$0xff] }
  0x5d   : > { %1358 = vmatmul.mubr.bf16.vlgmr.msra.gmra.mrb[0].mxu1 %v1444_v61 }
  0x5e   : > { %1361 = vmatprep.mubr.bf16.mxu1 %v1451_v62 }
  0x63   : > { %793 = vmatmul.mubr.bf16.gmra.mrb[4].mxu0 %v1447_v63 }
  0x64   : > { %800 = vmatprep.mubr.bf16.mxu0 %v1448_v0 }
  0x65   : > { %1362 = vmatmul.mubr.bf16.gmra.mrb[4].mxu1 %v1452_v1 }
  0x66   : > { %1365 = vmatprep.mubr.bf16.mxu1 %v1459_v2 }
  0x6b   : > { %801 = vmatmul.mubr.bf16.gmra.mrb[8].mxu0 %v1450_v3 }
  0x6c   : > { %808 = vmatprep.mubr.bf16.mxu0 %v1453_v4 }
  0x6d   : > { %1366 = vmatmul.mubr.bf16.gmra.mrb[8].mxu1 %v1460_v5 }
  0x6e   : > { %1369 = vmatprep.mubr.bf16.mxu1 %v1467_v6  ;;  %v390_v6 = vld [vmem:[#allocation2 + $0x30] sm:$0xff] }
  0x73   : > { %809 = vmatmul.mubr.bf16.gmra.mrb[12].mxu0 %v1455_v7 }
  0x74   : > { %816 = vmatprep.mubr.bf16.mxu0 %v1456_v8 }
  0x75   : > { %1370 = vmatmul.mubr.bf16.gmra.mrb[12].mxu1 %v1468_v9 }
  0x7b   : > { %817 = vmatmul.mubr.bf16.gmra.mrb[16].mxu0 %v1458_v10 }
  0x7c   : > { %824 = vmatprep.mubr.bf16.mxu0 %v1461_v11 }
  0x83   : > { %825 = vmatmul.mubr.bf16.gmra.mrb[20].mxu0 %v1463_v12  ;;  %v391_v12 = vld [vmem:[#allocation2 + $0x38] sm:$0xff] }
  0x84   : > { %832 = vmatprep.mubr.bf16.mxu0 %v1464_v13 }
  0x8b   : > { %833 = vmatmul.mubr.bf16.gmra.mrb[24].mxu0 %v1466_v14 }
  0x8c   : > { %840 = vmatprep.mubr.bf16.mxu0 %v1469_v15 }
  0x93   : > { %841 = vmatmul.mubr.bf16.gmra.mrb[28].mxu0 %v1471_v16 }
 0x12e   : > { %v1277_v17 = vpop.f32.mrb[0].mxu0 }
 0x12f   : > { %v1278_v18 = vpop.f32.mrb[1].mxu0 }
 0x130   : > { %v1279_v19 = vadd.f32 %v1278_v18, %v1277_v17  ;;  %v1280_v20 = vpop.f32.mrb[2].mxu0  ;;  %v1359_v21 = vpop.f32.mrb[0].mxu1 }
 0x131   : > { %v1281_v22 = vpop.f32.mrb[3].mxu0  ;;  %v883_v24 = vpop.f32.mrb[1].mxu1 }
 0x132   : > { %v1282_v25 = vadd.f32 %v1281_v22, %v1280_v20  ;;  %v884_v26 = vadd.f32 %v1279_v19, %v883_v24  ;;  %v1360_v27 = vpop.f32.mrb[2].mxu1  ;;  %v392_v22 = vld [vmem:[#allocation2 + $0x40] sm:$0xff] }
 0x133   : > { %v886_v29 = vpop.f32.mrb[3].mxu1 }
 0x134   : > { %v946_v30 = vadd.f32 %v884_v26, %v384_v23  ;;  %v887_v31 = vadd.f32 %v1282_v25, %v886_v29  ;;  %v393_v25 = vld [vmem:[#allocation2 + $0x48] sm:$0xff] }
 0x136   : > { %962 = vst [vmem:[#allocation2] sm:$0xff] %v946_v30  ;;  %v947_v32 = vadd.f32 %v887_v31, %v385_v28  ;;  %v1283_v33 = vpop.f32.mrb[4].mxu0 }
 0x137   : > { %v1284_v34 = vpop.f32.mrb[5].mxu0 }
 0x138   : > { %963 = vst [vmem:[#allocation2 + $0x8] sm:$0xff] %v947_v32  ;;  %v1285_v35 = vadd.f32 %v1284_v34, %v1283_v33  ;;  %v1286_v36 = vpop.f32.mrb[6].mxu0  ;;  %v1363_v37 = vpop.f32.mrb[4].mxu1  ;;  %v394_v33 = vld [vmem:[#allocation2 + $0x50] sm:$0xff] }
 0x139   : > { %v1287_v39 = vpop.f32.mrb[7].mxu0  ;;  %v899_v40 = vpop.f32.mrb[5].mxu1 }
 0x13a   : > { %v892_v41 = vadd.f32 %v1359_v21, %v1285_v35  ;;  %v1288_v42 = vadd.f32 %v1287_v39, %v1286_v36  ;;  %v1364_v43 = vpop.f32.mrb[6].mxu1 }
 0x13b   : > { %v902_v45 = vpop.f32.mrb[7].mxu1 }
 0x13c   : > { %v948_v46 = vadd.f32 %v892_v41, %v386_v38  ;;  %v895_v47 = vadd.f32 %v1360_v27, %v1288_v42 }
 0x13e   : > { %964 = vst [vmem:[#allocation2 + $0x10] sm:$0xff] %v948_v46  ;;  %v949_v48 = vadd.f32 %v895_v47, %v387_v44  ;;  %v1289_v49 = vpop.f32.mrb[8].mxu0  ;;  %v396_v46 = vld [vmem:[#allocation2 + $0x60] sm:$0xff] }
 0x13f   : > { %v1290_v50 = vpop.f32.mrb[9].mxu0 }
 0x140   : > { %965 = vst [vmem:[#allocation2 + $0x18] sm:$0xff] %v949_v48  ;;  %v1291_v51 = vadd.f32 %v1290_v50, %v1289_v49  ;;  %v1292_v52 = vpop.f32.mrb[10].mxu0  ;;  %v1367_v53 = vpop.f32.mrb[8].mxu1  ;;  %v397_v49 = vld [vmem:[#allocation2 + $0x68] sm:$0xff] }
 0x141   : > { %v1293_v54 = vpop.f32.mrb[11].mxu0  ;;  %v915_v56 = vpop.f32.mrb[9].mxu1 }
 0x142   : > { %v1294_v57 = vadd.f32 %v1293_v54, %v1292_v52  ;;  %v900_v58 = vadd.f32 %v1291_v51, %v899_v40  ;;  %v1368_v59 = vpop.f32.mrb[10].mxu1 }
 0x143   : > { %v918_v61 = vpop.f32.mrb[11].mxu1 }
 0x144   : > { %v950_v62 = vadd.f32 %v900_v58, %v388_v55  ;;  %v903_v63 = vadd.f32 %v1294_v57, %v902_v45  ;;  %v398_v57 = vld [vmem:[#allocation2 + $0x70] sm:$0xff] }
 0x146   : > { %966 = vst [vmem:[#allocation2 + $0x20] sm:$0xff] %v950_v62  ;;  %v951_v0 = vadd.f32 %v903_v63, %v389_v60  ;;  %v1295_v1 = vpop.f32.mrb[12].mxu0 }
 0x147   : > { %v1296_v2 = vpop.f32.mrb[13].mxu0 }
 0x148   : > { %967 = vst [vmem:[#allocation2 + $0x28] sm:$0xff] %v951_v0  ;;  %v1297_v3 = vadd.f32 %v1296_v2, %v1295_v1  ;;  %v1298_v4 = vpop.f32.mrb[14].mxu0  ;;  %v1371_v5 = vpop.f32.mrb[12].mxu1  ;;  %v982_v1 = vld [vmem:[#allocation2] sm:$0xff] (!%p1255_p11) }
 0x149   : > { %v1299_v7 = vpop.f32.mrb[15].mxu0  ;;  %v931_v8 = vpop.f32.mrb[13].mxu1  ;;  %v998_v2 = vld [vmem:[%s1818_s2] sm:$0xff] (!%p1255_p11) }
 0x14a   : > { %v908_v9 = vadd.f32 %v1363_v37, %v1297_v3  ;;  %v1300_v10 = vadd.f32 %v1299_v7, %v1298_v4  ;;  %v1372_v11 = vpop.f32.mrb[14].mxu1  ;;  %v395_v37 = vld [vmem:[#allocation2 + $0x58] sm:$0xff]  ;;  %v983_v3 = vld [vmem:[#allocation2 + $0x8] sm:$0xff] (!%p1255_p11)  ;;  %v1014_v4 = vadd.f32 (!%p1255_p11), %v998_v2, %v982_v1  ;;  %v1000_v7 = vld [vmem:[%s1818_s2 + $0x10] sm:$0xff] (!%p1255_p11) }
 0x14b   : > { %v934_v13 = vpop.f32.mrb[15].mxu1 }
 0x14c   : > { %v952_v14 = vadd.f32 %v908_v9, %v390_v6  ;;  %v911_v15 = vadd.f32 %v1364_v43, %v1300_v10  ;;  %v984_v6 = vld [vmem:[#allocation2 + $0x10] sm:$0xff] (!%p1255_p11)  ;;  %v985_v10 = vld [vmem:[#allocation2 + $0x18] sm:$0xff] (!%p1255_p11)  ;;  %1030 = vst [vmem:[%s1819_s3] sm:$0xff] (!%p1255_p11), %v1014_v4 }
 0x14d   : > { %v1016_v9 = vadd.f32 (!%p1255_p11), %v1000_v7, %v984_v6 }
 0x14e   : > { %968 = vst [vmem:[#allocation2 + $0x30] sm:$0xff] %v952_v14  ;;  %v953_v16 = vadd.f32 %v911_v15, %v391_v12  ;;  %v1301_v17 = vpop.f32.mrb[16].mxu0  ;;  %v986_v12 = vld [vmem:[#allocation2 + $0x20] sm:$0xff] (!%p1255_p11) }
 0x14f   : > { %v1302_v18 = vpop.f32.mrb[17].mxu0  ;;  %v1002_v14 = vld [vmem:[%s1818_s2 + $0x20] sm:$0xff] (!%p1255_p11)  ;;  %v987_v15 = vld [vmem:[#allocation2 + $0x28] sm:$0xff] (!%p1255_p11)  ;;  %1032 = vst [vmem:[%s1819_s3 + $0x10] sm:$0xff] (!%p1255_p11), %v1016_v9 }
 0x150   : > { %969 = vst [vmem:[#allocation2 + $0x38] sm:$0xff] %v953_v16  ;;  %v1303_v19 = vadd.f32 %v1302_v18, %v1301_v17  ;;  %v1304_v20 = vpop.f32.mrb[18].mxu0  ;;  %v1003_v16 = vld [vmem:[%s1818_s2 + $0x28] sm:$0xff] (!%p1255_p11)  ;;  %v1018_v17 = vadd.f32 (!%p1255_p11), %v1002_v14, %v986_v12 }
 0x151   : > { %v1305_v21 = vpop.f32.mrb[19].mxu0  ;;  %v1019_v18 = vadd.f32 (!%p1255_p11), %v1003_v16, %v987_v15 }
 0x152   : > { %v1306_v23 = vadd.f32 %v1305_v21, %v1304_v20  ;;  %v916_v24 = vadd.f32 %v1303_v19, %v915_v56  ;;  %v1004_v20 = vld [vmem:[%s1818_s2 + $0x30] sm:$0xff] (!%p1255_p11)  ;;  %1034 = vst [vmem:[%s1819_s3 + $0x20] sm:$0xff] (!%p1255_p11), %v1018_v17 }
 0x153   : > { %1035 = vst [vmem:[%s1819_s3 + $0x28] sm:$0xff] (!%p1255_p11), %v1019_v18 }
 0x154   : > { %v954_v26 = vadd.f32 %v916_v24, %v392_v22  ;;  %v919_v27 = vadd.f32 %v1306_v23, %v918_v61  ;;  %v399_v61 = vld [vmem:[#allocation2 + $0x78] sm:$0xff] }
 0x155   : > { %v988_v19 = vld [vmem:[#allocation2 + $0x30] sm:$0xff] (!%p1255_p11)  ;;  %v1005_v23 = vld [vmem:[%s1818_s2 + $0x38] sm:$0xff] (!%p1255_p11) }
 0x156   : > { %970 = vst [vmem:[#allocation2 + $0x40] sm:$0xff] %v954_v26  ;;  %v955_v28 = vadd.f32 %v919_v27, %v393_v25  ;;  %v1307_v29 = vpop.f32.mrb[20].mxu0  ;;  %v1020_v22 = vadd.f32 (!%p1255_p11), %v1004_v20, %v988_v19  ;;  %v1006_v25 = vld [vmem:[%s1818_s2 + $0x40] sm:$0xff] (!%p1255_p11) }
 0x157   : > { %v1308_v30 = vpop.f32.mrb[21].mxu0  ;;  %v989_v21 = vld [vmem:[#allocation2 + $0x38] sm:$0xff] (!%p1255_p11) }
 0x158   : > { %971 = vst [vmem:[#allocation2 + $0x48] sm:$0xff] %v955_v28  ;;  %v1309_v31 = vadd.f32 %v1308_v30, %v1307_v29  ;;  %v1310_v32 = vpop.f32.mrb[22].mxu0  ;;  %v1021_v26 = vadd.f32 (!%p1255_p11), %v1005_v23, %v989_v21  ;;  %v1007_v29 = vld [vmem:[%s1818_s2 + $0x48] sm:$0xff] (!%p1255_p11)  ;;  %1036 = vst [vmem:[%s1819_s3 + $0x30] sm:$0xff] (!%p1255_p11), %v1020_v22 }
 0x159   : > { %v1311_v34 = vpop.f32.mrb[23].mxu0 }
 0x15a   : > { %v924_v35 = vadd.f32 %v1367_v53, %v1309_v31  ;;  %v1312_v36 = vadd.f32 %v1311_v34, %v1310_v32  ;;  %v1008_v32 = vld [vmem:[%s1818_s2 + $0x50] sm:$0xff] (!%p1255_p11)  ;;  %v1009_v34 = vld [vmem:[%s1818_s2 + $0x58] sm:$0xff] (!%p1255_p11)  ;;  %1037 = vst [vmem:[%s1819_s3 + $0x38] sm:$0xff] (!%p1255_p11), %v1021_v26 }
 0x15c   : > { %v956_v38 = vadd.f32 %v924_v35, %v394_v33  ;;  %v927_v39 = vadd.f32 %v1368_v59, %v1312_v36 }
 0x15d   : > { %v990_v24 = vld [vmem:[#allocation2 + $0x40] sm:$0xff] (!%p1255_p11) }
 0x15e   : > { %972 = vst [vmem:[#allocation2 + $0x50] sm:$0xff] %v956_v38  ;;  %v957_v40 = vadd.f32 %v927_v39, %v395_v37  ;;  %v1313_v41 = vpop.f32.mrb[24].mxu0  ;;  %v1022_v27 = vadd.f32 (!%p1255_p11), %v1006_v25, %v990_v24  ;;  %v1010_v38 = vld [vmem:[%s1818_s2 + $0x60] sm:$0xff] (!%p1255_p11) }
 0x15f   : > { %v1314_v42 = vpop.f32.mrb[25].mxu0  ;;  %v991_v28 = vld [vmem:[#allocation2 + $0x48] sm:$0xff] (!%p1255_p11) }
 0x160   : > { %973 = vst [vmem:[#allocation2 + $0x58] sm:$0xff] %v957_v40  ;;  %v1315_v43 = vadd.f32 %v1314_v42, %v1313_v41  ;;  %v1316_v44 = vpop.f32.mrb[26].mxu0  ;;  %v1023_v31 = vadd.f32 (!%p1255_p11), %v1007_v29, %v991_v28  ;;  %1038 = vst [vmem:[%s1819_s3 + $0x40] sm:$0xff] (!%p1255_p11), %v1022_v27  ;;  %v1011_v41 = vld [vmem:[%s1818_s2 + $0x68] sm:$0xff] (!%p1255_p11) }
 0x161   : > { %v1317_v45 = vpop.f32.mrb[27].mxu0 }
 0x162   : > { %v1318_v47 = vadd.f32 %v1317_v45, %v1316_v44  ;;  %v932_v48 = vadd.f32 %v1315_v43, %v931_v8  ;;  %1039 = vst [vmem:[%s1819_s3 + $0x48] sm:$0xff] (!%p1255_p11), %v1023_v31  ;;  %v1012_v43 = vld [vmem:[%s1818_s2 + $0x70] sm:$0xff] (!%p1255_p11) }
 0x164   : > { %v958_v50 = vadd.f32 %v932_v48, %v396_v46  ;;  %v935_v51 = vadd.f32 %v1318_v47, %v934_v13  ;;  %v1013_v47 = vld [vmem:[%s1818_s2 + $0x78] sm:$0xff] (!%p1255_p11) }
 0x165   : > { %v992_v30 = vld [vmem:[#allocation2 + $0x50] sm:$0xff] (!%p1255_p11) }
 0x166   : > { %974 = vst [vmem:[#allocation2 + $0x60] sm:$0xff] %v958_v50  ;;  %v959_v52 = vadd.f32 %v935_v51, %v397_v49  ;;  %v1319_v53 = vpop.f32.mrb[28].mxu0  ;;  %v1024_v35 = vadd.f32 (!%p1255_p11), %v1008_v32, %v992_v30 }
 0x167   : > { %v1320_v54 = vpop.f32.mrb[29].mxu0  ;;  %v993_v33 = vld [vmem:[#allocation2 + $0x58] sm:$0xff] (!%p1255_p11) }
 0x168   : > { %975 = vst [vmem:[#allocation2 + $0x68] sm:$0xff] %v959_v52  ;;  %v1321_v55 = vadd.f32 %v1320_v54, %v1319_v53  ;;  %v1322_v56 = vpop.f32.mrb[30].mxu0  ;;  %v1025_v36 = vadd.f32 (!%p1255_p11), %v1009_v34, %v993_v33  ;;  %1040 = vst [vmem:[%s1819_s3 + $0x50] sm:$0xff] (!%p1255_p11), %v1024_v35 }
 0x169   : > { %v1323_v58 = vpop.f32.mrb[31].mxu0 }
 0x16a   : > { %v940_v59 = vadd.f32 %v1371_v5, %v1321_v55  ;;  %v1324_v60 = vadd.f32 %v1323_v58, %v1322_v56  ;;  %981 = sbr.rel (%p1255_p11) target bundleno = 379 (0x17b), region = 66  ;;  %v999_v5 = vld [vmem:[%s1818_s2 + $0x8] sm:$0xff] (!%p1255_p11)  ;;  %1041 = vst [vmem:[%s1819_s3 + $0x58] sm:$0xff] (!%p1255_p11), %v1025_v36 }
 0x16b   : > { %v1015_v8 = vadd.f32 (!%p1255_p11), %v999_v5, %v983_v3 }
 0x16c   : > { %v960_v62 = vadd.f32 %v940_v59, %v398_v57  ;;  %v943_v63 = vadd.f32 %v1372_v11, %v1324_v60  ;;  %v1001_v11 = vld [vmem:[%s1818_s2 + $0x18] sm:$0xff] (!%p1255_p11) }
 0x16d   : > { %v1017_v13 = vadd.f32 (!%p1255_p11), %v1001_v11, %v985_v10  ;;  %1031 = vst [vmem:[%s1819_s3 + $0x8] sm:$0xff] (!%p1255_p11), %v1015_v8  ;;  %v994_v37 = vld [vmem:[#allocation2 + $0x60] sm:$0xff] (!%p1255_p11) }
 0x16e   : > { %976 = vst [vmem:[#allocation2 + $0x70] sm:$0xff] %v960_v62  ;;  %v961_v0 = vadd.f32 %v943_v63, %v399_v61  ;;  %v1026_v40 = vadd.f32 (!%p1255_p11), %v1010_v38, %v994_v37 }
 0x16f   : > { %1033 = vst [vmem:[%s1819_s3 + $0x18] sm:$0xff] (!%p1255_p11), %v1017_v13  ;;  %v995_v39 = vld [vmem:[#allocation2 + $0x68] sm:$0xff] (!%p1255_p11) }
 0x170   : > { %977 = vst [vmem:[#allocation2 + $0x78] sm:$0xff] %v961_v0  ;;  %v1027_v44 = vadd.f32 (!%p1255_p11), %v1011_v41, %v995_v39  ;;  %1042 = vst [vmem:[%s1819_s3 + $0x60] sm:$0xff] (!%p1255_p11), %v1026_v40 }
 0x172   : > { %1043 = vst [vmem:[%s1819_s3 + $0x68] sm:$0xff] %v1027_v44 }
 0x175   : > { %v996_v42 = vld [vmem:[#allocation2 + $0x70] sm:$0xff] }
 0x176   : > { %v1028_v45 = vadd.f32 %v1012_v43, %v996_v42 }
 0x177   : > { %v997_v46 = vld [vmem:[#allocation2 + $0x78] sm:$0xff] }
 0x178   : > { %v1029_v48 = vadd.f32 %v1013_v47, %v997_v46  ;;  %1044 = vst [vmem:[%s1819_s3 + $0x70] sm:$0xff] %v1028_v45 }
 0x17a   : > { %1045 = vst [vmem:[%s1819_s3 + $0x78] sm:$0xff] %v1029_v48 }
 0x17b PF: > { %s13_s16 = sadd.s32 1, %s1510_s16   ;;  %s1820_s12 = smov %s1498_s13 }
 0x17c   : > { %p10_p12 = scmp.ge.s32.totalorder %s13_s16, 5   ;;  %s1821_s13 = smov %s1568_s20 }
 0x17d   : > { %s1822_s14 = smov %s1506_s15  ;;  %s1823_s15 = smov %s1825_s17 }
 0x17e   :  { %12 = sbr.rel (!%p10_p12) target bundleno = 3 (0x3), region = 113 }

</bundles_post_ra>
